<compile_context>
chip_gen: v5e
topology: v5e:2x2
jax: 0.10.0
libtpu: 0.0.40
codegen_flags: <defaults>
</compile_context>

<pallas_src>
import functools

import jax
import jax.numpy as jnp
from jax import lax
from jax.experimental import pallas as pl
from jax.experimental.pallas import tpu as pltpu

# Storage dtype for activations / weights (f32 default; bf16 is a drop-in
# bandwidth win on v6e/v7x — accumulation stays f32).
ACT_DTYPE = jnp.float32

LANES = 128       # lane-dense channel padding for every kernel output
CIN1_PAD = 8      # conv1 has Cin=1; pad input channels only to 8 (input side)


# ---------------------------------------------------------------------------
# Kernels
# ---------------------------------------------------------------------------
def _conv_row(x_ref, w_ref, bias, oh, ow):
    """ReLU(3x3 valid conv + bias) for one output row `oh`.

    x_ref : (1, H, W, Cin_p) VMEM tile of one NHWC image.
    w_ref : (9, Cin_p, Cout_p) packed taps, tap index t = 3*di + dj.
    bias  : (1, Cout_p) f32 value.
    Returns a (ow, Cout_p) f32 value.
    """
    cout_p = w_ref.shape[2]
    acc = jnp.zeros((ow, cout_p), jnp.float32)
    for t in range(9):                                   # static tap unroll
        di, dj = t // 3, t % 3
        tap = x_ref[0, oh + di, pl.ds(dj, ow), :]        # (ow, Cin_p)
        acc = acc + jnp.dot(tap, w_ref[t, :, :],
                            preferred_element_type=jnp.float32)
    return jnp.maximum(acc + bias, 0.0)


def _conv3x3_relu_pool_kernel(x_ref, w_ref, b_ref, o_ref, row_buf, *, ph, pw, ow):
    """Fused 3x3 conv + bias + ReLU + 2x2/2 max-pool for one image."""
    bias = b_ref[...].astype(jnp.float32)

    def body(poh, carry):
        oh = 2 * poh
        r0 = _conv_row(x_ref, w_ref, bias, oh, ow)
        r1 = _conv_row(x_ref, w_ref, bias, oh + 1, ow)
        row_buf[...] = jnp.maximum(r0, r1)               # pool along H
        pooled = jnp.maximum(                            # pool along W via
            row_buf[pl.ds(0, pw, 2), :],                 # stride-2 VMEM reads
            row_buf[pl.ds(1, pw, 2), :])
        o_ref[0, poh, :, :] = pooled.astype(o_ref.dtype)
        return carry

    lax.fori_loop(0, ph, body, 0)


def _conv3x3_relu_kernel(x_ref, w_ref, b_ref, o_ref, *, oh_n, ow):
    """Fused 3x3 conv + bias + ReLU (no pool) for one image."""
    bias = b_ref[...].astype(jnp.float32)
    for oh in range(oh_n):                               # small static unroll (3)
        o_ref[0, oh, :, :] = _conv_row(x_ref, w_ref, bias, oh, ow).astype(o_ref.dtype)


def _fc_fused_kernel(x_ref, w1_ref, b1_ref, w2_ref, b2_ref, o_ref):
    """relu(x @ w1 + b1) @ w2 + b2 on one (tm, K) row tile (fc1+fc2 fused)."""
    h = jnp.dot(x_ref[...], w1_ref[...], preferred_element_type=jnp.float32)
    h = jnp.maximum(h + b1_ref[...], 0.0).astype(w2_ref.dtype)
    out = jnp.dot(h, w2_ref[...], preferred_element_type=jnp.float32)
    o_ref[...] = (out + b2_ref[...]).astype(o_ref.dtype)


# ---------------------------------------------------------------------------
# pallas_call wrappers
# ---------------------------------------------------------------------------
def conv3x3_relu(x, w9, b, *, pool):
    """x: (B, H, W, Cin_p); w9: (9, Cin_p, Cout_p); b: (1, Cout_p) f32."""
    B, H, W, cin_p = x.shape
    cout_p = w9.shape[2]
    OH, OW = H - 2, W - 2
    if pool:
        PH, PW = OH // 2, OW // 2                        # floor, like MaxPool2d
        out_shape = jax.ShapeDtypeStruct((B, PH, PW, cout_p), ACT_DTYPE)
        kernel = functools.partial(_conv3x3_relu_pool_kernel, ph=PH, pw=PW, ow=OW)
        out_spec = pl.BlockSpec((1, PH, PW, cout_p), lambda n: (n, 0, 0, 0))
        scratch = (pltpu.VMEM((OW, cout_p), jnp.float32),)   # H-pooled conv row
    else:
        out_shape = jax.ShapeDtypeStruct((B, OH, OW, cout_p), ACT_DTYPE)
        kernel = functools.partial(_conv3x3_relu_kernel, oh_n=OH, ow=OW)
        out_spec = pl.BlockSpec((1, OH, OW, cout_p), lambda n: (n, 0, 0, 0))
        scratch = ()

    return pl.pallas_call(
        kernel,
        out_shape=out_shape,
        grid_spec=pltpu.PrefetchScalarGridSpec(
            num_scalar_prefetch=0,
            grid=(B,),                                   # one image per step
            in_specs=[
                pl.BlockSpec((1, H, W, cin_p), lambda n: (n, 0, 0, 0)),
                pl.BlockSpec((9, cin_p, cout_p), lambda n: (0, 0, 0)),
                pl.BlockSpec((1, cout_p), lambda n: (0, 0)),
            ],
            out_specs=out_spec,
            scratch_shapes=scratch,
        ),
        compiler_params=pltpu.CompilerParams(
            dimension_semantics=("parallel",)),          # megacore-shardable
    )(x, w9, b)


def fc_fused(x, w1, b1, w2, b2, *, tm=256):
    """relu(x @ w1 + b1) @ w2 + b2, tiled over row blocks. Returns f32 (M, N2)."""
    M, K = x.shape
    N1 = w1.shape[1]
    N2 = w2.shape[1]
    Mp = pl.cdiv(M, 8) * 8                               # sublane-align rows
    if Mp != M:
        x = jnp.pad(x, ((0, Mp - M), (0, 0)))
    tm = min(tm, Mp)
    out = pl.pallas_call(
        _fc_fused_kernel,
        out_shape=jax.ShapeDtypeStruct((Mp, N2), jnp.float32),
        grid_spec=pltpu.PrefetchScalarGridSpec(
            num_scalar_prefetch=0,
            grid=(pl.cdiv(Mp, tm),),                     # ragged last tile is
            in_specs=[                                   # masked by Pallas
                pl.BlockSpec((tm, K), lambda i: (i, 0)),
                pl.BlockSpec((K, N1), lambda i: (0, 0)),
                pl.BlockSpec((1, N1), lambda i: (0, 0)),
                pl.BlockSpec((N1, N2), lambda i: (0, 0)),
                pl.BlockSpec((1, N2), lambda i: (0, 0)),
            ],
            out_specs=pl.BlockSpec((tm, N2), lambda i: (i, 0)),
        ),
        compiler_params=pltpu.CompilerParams(
            dimension_semantics=("parallel",)),
    )(x, w1, b1, w2, b2)
    return out[:M]


# ---------------------------------------------------------------------------
# One-time parameter packing (layout + permutation folded into weights)
# ---------------------------------------------------------------------------
def _pack_conv(w, b, cin_p, cout_p=LANES):
    """PyTorch OIHW (Cout, Cin, 3, 3) -> taps (9, cin_p, cout_p) + bias (1, cout_p)."""
    cout, cin, kh, kw = w.shape
    wk = jnp.transpose(w, (2, 3, 1, 0)).reshape(kh * kw, cin, cout)
    wk = jnp.pad(wk, ((0, 0), (0, cin_p - cin), (0, cout_p - cout)))
    bk = jnp.pad(b, (0, cout_p - cout)).reshape(1, cout_p)
    return wk.astype(ACT_DTYPE), bk.astype(jnp.float32)


def _pack_fc1(w, b, c=64, s=3, c_p=LANES, nout_p=LANES):
    """fc1 (64, 576) indexed by PyTorch's NCHW flatten (c*9 + h*3 + w) -> weights
    over the NHWC-with-padded-channels flatten (h*s*c_p + w*c_p + c) that the
    conv3 kernel output reshapes to.  Folds the permutation into the weights."""
    nout = w.shape[0]
    wt = w.reshape(nout, c, s, s)                        # (o, c, h, w)
    wt = jnp.transpose(wt, (2, 3, 1, 0))                 # (h, w, c, o)
    wt = jnp.pad(wt, ((0, 0), (0, 0), (0, c_p - c), (0, nout_p - nout)))
    wt = wt.reshape(s * s * c_p, nout_p)                 # row = h*s*c_p + w*c_p + c
    bt = jnp.pad(b, (0, nout_p - nout)).reshape(1, nout_p)
    return wt.astype(ACT_DTYPE), bt.astype(jnp.float32)


def _pack_fc2(w, b, nin_p=LANES, nout_p=LANES):
    nout, nin = w.shape                                  # (10, 64)
    wt = jnp.pad(jnp.transpose(w), ((0, nin_p - nin), (0, nout_p - nout)))
    bt = jnp.pad(b, (0, nout_p - nout)).reshape(1, nout_p)
    return wt.astype(ACT_DTYPE), bt.astype(jnp.float32)


def pack_params(params):
    w1, b1 = _pack_conv(params["conv1_w"], params["conv1_b"], cin_p=CIN1_PAD)
    w2, b2 = _pack_conv(params["conv2_w"], params["conv2_b"], cin_p=LANES)
    w3, b3 = _pack_conv(params["conv3_w"], params["conv3_b"], cin_p=LANES)
    fw1, fb1 = _pack_fc1(params["fc1_w"], params["fc1_b"])
    fw2, fb2 = _pack_fc2(params["fc2_w"], params["fc2_b"])
    return dict(w1=w1, b1=b1, w2=w2, b2=b2, w3=w3, b3=b3,
                fw1=fw1, fb1=fb1, fw2=fw2, fb2=fb2)


# ---------------------------------------------------------------------------
# Forward pass
# ---------------------------------------------------------------------------
def mnist_cnn_forward(x, packed):
    """Pallas forward of Mnist_CNN. x: anything reshapeable to (-1, 1, 28, 28)."""
    x = x.reshape(-1, 1, 28, 28).astype(ACT_DTYPE)       # like x.view(...)
    B = x.shape[0]
    x = jnp.transpose(x, (0, 2, 3, 1))                   # NHWC (B, 28, 28, 1)
    x = jnp.pad(x, ((0, 0), (0, 0), (0, 0), (0, CIN1_PAD - 1)))

    y = conv3x3_relu(x, packed["w1"], packed["b1"], pool=True)    # (B, 13, 13, 128)
    y = conv3x3_relu(y, packed["w2"], packed["b2"], pool=True)    # (B, 5, 5, 128)
    y = conv3x3_relu(y, packed["w3"], packed["b3"], pool=False)   # (B, 3, 3, 128)

    # Contiguous NHWC flatten (metadata-only reshape); the NCHW flatten order of
    # PyTorch's x.view(-1, 576) is already folded into the fc1 weight packing.
    y = y.reshape(B, 3 * 3 * LANES)                               # (B, 1152)
    logits = fc_fused(y, packed["fw1"], packed["fb1"],
                      packed["fw2"], packed["fb2"])               # (B, 128)
    return logits[:, :10]


# ---------------------------------------------------------------------------
# Parameters + pure-JAX reference (mirrors the PyTorch forward in NCHW)
# ---------------------------------------------------------------------------
def init_params():
    keys = jax.random.split(jax.random.PRNGKey(42), 10)
    f32 = jnp.float32
    return {
        "conv1_w": jax.random.normal(keys[0], (32, 1, 3, 3), f32) * 0.1,
        "conv1_b": jax.random.normal(keys[1], (32,), f32) * 0.1,
        "conv2_w": jax.random.normal(keys[2], (64, 32, 3, 3), f32) * 0.05,
        "conv2_b": jax.random.normal(keys[3], (64,), f32) * 0.05,
        "conv3_w": jax.random.normal(keys[4], (64, 64, 3, 3), f32) * 0.05,
        "conv3_b": jax.random.normal(keys[5], (64,), f32) * 0.05,
        "fc1_w": jax.random.normal(keys[6], (64, 576), f32) * 0.04,   # (out, in)
        "fc1_b": jax.random.normal(keys[7], (64,), f32) * 0.04,
        "fc2_w": jax.random.normal(keys[8], (10, 64), f32) * 0.1,
        "fc2_b": jax.random.normal(keys[9], (10,), f32) * 0.1,
    }


def reference_forward(x, params):
    x = x.reshape(-1, 1, 28, 28).astype(jnp.float32)
    dn = ("NCHW", "OIHW", "NCHW")

    def conv(z, w, b):
        z = lax.conv_general_dilated(z, w, (1, 1), "VALID", dimension_numbers=dn)
        return jnp.maximum(z + b[None, :, None, None], 0.0)

    def pool(z):
        return lax.reduce_window(z, -jnp.inf, lax.max,
                                 (1, 1, 2, 2), (1, 1, 2, 2), "VALID")

    y = pool(conv(x, params["conv1_w"], params["conv1_b"]))
    y = pool(conv(y, params["conv2_w"], params["conv2_b"]))
    y = conv(y, params["conv3_w"], params["conv3_b"])
    y = y.reshape(-1, 3 * 3 * 64)
    y = jnp.maximum(y @ params["fc1_w"].T + params["fc1_b"], 0.0)
    y = y @ params["fc2_w"].T + params["fc2_b"]
    return y


if __name__ == "__main__":
    params = init_params()
    packed = pack_params(params)                         # one-time weight packing

    x = jax.random.normal(jax.random.PRNGKey(0), (2, 1, 28, 28), jnp.float32)

    fwd = jax.jit(mnist_cnn_forward)
    out = jax.block_until_ready(fwd(x, packed))

    assert out.shape == (2, 10), out.shape
    assert bool(jnp.all(jnp.isfinite(out)))

    ref = jax.block_until_ready(reference_forward(x, params))
    tol = 1e-3 if ACT_DTYPE == jnp.float32 else 3e-2
    assert bool(jnp.allclose(out, ref, rtol=tol, atol=tol)), (out, ref)

    print("KERNEL_OK")
</pallas_src>

<mosaic_0001>
module attributes {stable_mosaic.version = 11 : i64} {
  func.func @_conv3x3_relu_pool_kernel(%arg0: i32, %arg1: memref<1x28x28x8xf32, #tpu.memory_space<vmem>>, %arg2: memref<9x8x128xf32, #tpu.memory_space<vmem>>, %arg3: memref<1x128xf32, #tpu.memory_space<vmem>>, %arg4: memref<1x13x13x128xf32, #tpu.memory_space<vmem>>, %arg5: memref<26x128xf32, #tpu.memory_space<vmem>>) attributes {dimension_semantics = [#tpu.dimension_semantics<parallel>], iteration_bounds = array<i64: 2>, scalar_prefetch = 0 : i64, scratch_operands = 1 : i64, tpu.core_type = #tpu.core_type<tc>, window_params = [{transform_indices = @transform_0, window_bounds = array<i64: 1, 28, 28, 8>}, {pipeline_mode = #tpu.pipeline_mode<synchronous>, transform_indices = @transform_1, window_bounds = array<i64: 9, 8, 128>}, {pipeline_mode = #tpu.pipeline_mode<synchronous>, transform_indices = @transform_2, window_bounds = array<i64: 1, 128>}, {transform_indices = @transform_3, window_bounds = array<i64: 1, 13, 13, 128>}]} {
    %c0 = arith.constant 0 : index
    %c0_0 = arith.constant 0 : index
    %0 = vector.load %arg3[%c0, %c0_0] : memref<1x128xf32, #tpu.memory_space<vmem>>, vector<1x128xf32>
    %c0_i32 = arith.constant 0 : i32
    %c13_i32 = arith.constant 13 : i32
    %1 = arith.addi %c0_i32, %c13_i32 : i32
    %c1_i32 = arith.constant 1 : i32
    scf.for %arg6 = %c0_i32 to %1 step %c1_i32  : i32 {
      %c2_i32 = arith.constant 2 : i32
      %2 = arith.muli %c2_i32, %arg6 : i32
      %cst = arith.constant 0.000000e+00 : f32
      %3 = vector.broadcast %cst : f32 to vector<26x128xf32>
      %c0_i32_2 = arith.constant 0 : i32
      %4 = arith.addi %2, %c0_i32_2 : i32
      %c0_3 = arith.constant 0 : index
      %5 = arith.index_cast %4 : i32 to index
      %c0_4 = arith.constant 0 : index
      %c0_5 = arith.constant 0 : index
      %6 = vector.load %arg1[%c0_3, %5, %c0_4, %c0_5] : memref<1x28x28x8xf32, #tpu.memory_space<vmem>>, vector<1x1x26x8xf32>
      %7 = vector.shape_cast %6 : vector<1x1x26x8xf32> to vector<26x8xf32>
      %c0_6 = arith.constant 0 : index
      %c0_7 = arith.constant 0 : index
      %c0_8 = arith.constant 0 : index
      %8 = vector.load %arg2[%c0_6, %c0_7, %c0_8] : memref<9x8x128xf32, #tpu.memory_space<vmem>>, vector<1x8x128xf32>
      %9 = vector.shape_cast %8 : vector<1x8x128xf32> to vector<8x128xf32>
      %cst_9 = arith.constant dense<0.000000e+00> : vector<26x128xf32>
      %10 = tpu.matmul %7, %9, %cst_9 {dimension_numbers = #tpu.dot_dimension_numbers<[1], [0], [0], [1], [0, 0, 1, 1], [], []>} : vector<26x8xf32>, vector<8x128xf32>, vector<26x128xf32> -> vector<26x128xf32>
      %11 = arith.addf %3, %10 : vector<26x128xf32>
      %c0_i32_10 = arith.constant 0 : i32
      %12 = arith.addi %2, %c0_i32_10 : i32
      %c0_11 = arith.constant 0 : index
      %13 = arith.index_cast %12 : i32 to index
      %c1 = arith.constant 1 : index
      %c0_12 = arith.constant 0 : index
      %14 = vector.load %arg1[%c0_11, %13, %c1, %c0_12] : memref<1x28x28x8xf32, #tpu.memory_space<vmem>>, vector<1x1x26x8xf32>
      %15 = vector.shape_cast %14 : vector<1x1x26x8xf32> to vector<26x8xf32>
      %c1_13 = arith.constant 1 : index
      %c0_14 = arith.constant 0 : index
      %c0_15 = arith.constant 0 : index
      %16 = vector.load %arg2[%c1_13, %c0_14, %c0_15] : memref<9x8x128xf32, #tpu.memory_space<vmem>>, vector<1x8x128xf32>
      %17 = vector.shape_cast %16 : vector<1x8x128xf32> to vector<8x128xf32>
      %cst_16 = arith.constant dense<0.000000e+00> : vector<26x128xf32>
      %18 = tpu.matmul %15, %17, %cst_16 {dimension_numbers = #tpu.dot_dimension_numbers<[1], [0], [0], [1], [0, 0, 1, 1], [], []>} : vector<26x8xf32>, vector<8x128xf32>, vector<26x128xf32> -> vector<26x128xf32>
      %19 = arith.addf %11, %18 : vector<26x128xf32>
      %c0_i32_17 = arith.constant 0 : i32
      %20 = arith.addi %2, %c0_i32_17 : i32
      %c0_18 = arith.constant 0 : index
      %21 = arith.index_cast %20 : i32 to index
      %c2 = arith.constant 2 : index
      %c0_19 = arith.constant 0 : index
      %22 = vector.load %arg1[%c0_18, %21, %c2, %c0_19] : memref<1x28x28x8xf32, #tpu.memory_space<vmem>>, vector<1x1x26x8xf32>
      %23 = vector.shape_cast %22 : vector<1x1x26x8xf32> to vector<26x8xf32>
      %c2_20 = arith.constant 2 : index
      %c0_21 = arith.constant 0 : index
      %c0_22 = arith.constant 0 : index
      %24 = vector.load %arg2[%c2_20, %c0_21, %c0_22] : memref<9x8x128xf32, #tpu.memory_space<vmem>>, vector<1x8x128xf32>
      %25 = vector.shape_cast %24 : vector<1x8x128xf32> to vector<8x128xf32>
      %cst_23 = arith.constant dense<0.000000e+00> : vector<26x128xf32>
      %26 = tpu.matmul %23, %25, %cst_23 {dimension_numbers = #tpu.dot_dimension_numbers<[1], [0], [0], [1], [0, 0, 1, 1], [], []>} : vector<26x8xf32>, vector<8x128xf32>, vector<26x128xf32> -> vector<26x128xf32>
      %27 = arith.addf %19, %26 : vector<26x128xf32>
      %c1_i32_24 = arith.constant 1 : i32
      %28 = arith.addi %2, %c1_i32_24 : i32
      %c0_25 = arith.constant 0 : index
      %29 = arith.index_cast %28 : i32 to index
      %c0_26 = arith.constant 0 : index
      %c0_27 = arith.constant 0 : index
      %30 = vector.load %arg1[%c0_25, %29, %c0_26, %c0_27] : memref<1x28x28x8xf32, #tpu.memory_space<vmem>>, vector<1x1x26x8xf32>
      %31 = vector.shape_cast %30 : vector<1x1x26x8xf32> to vector<26x8xf32>
      %c3 = arith.constant 3 : index
      %c0_28 = arith.constant 0 : index
      %c0_29 = arith.constant 0 : index
      %32 = vector.load %arg2[%c3, %c0_28, %c0_29] : memref<9x8x128xf32, #tpu.memory_space<vmem>>, vector<1x8x128xf32>
      %33 = vector.shape_cast %32 : vector<1x8x128xf32> to vector<8x128xf32>
      %cst_30 = arith.constant dense<0.000000e+00> : vector<26x128xf32>
      %34 = tpu.matmul %31, %33, %cst_30 {dimension_numbers = #tpu.dot_dimension_numbers<[1], [0], [0], [1], [0, 0, 1, 1], [], []>} : vector<26x8xf32>, vector<8x128xf32>, vector<26x128xf32> -> vector<26x128xf32>
      %35 = arith.addf %27, %34 : vector<26x128xf32>
      %c1_i32_31 = arith.constant 1 : i32
      %36 = arith.addi %2, %c1_i32_31 : i32
      %c0_32 = arith.constant 0 : index
      %37 = arith.index_cast %36 : i32 to index
      %c1_33 = arith.constant 1 : index
      %c0_34 = arith.constant 0 : index
      %38 = vector.load %arg1[%c0_32, %37, %c1_33, %c0_34] : memref<1x28x28x8xf32, #tpu.memory_space<vmem>>, vector<1x1x26x8xf32>
      %39 = vector.shape_cast %38 : vector<1x1x26x8xf32> to vector<26x8xf32>
      %c4 = arith.constant 4 : index
      %c0_35 = arith.constant 0 : index
      %c0_36 = arith.constant 0 : index
      %40 = vector.load %arg2[%c4, %c0_35, %c0_36] : memref<9x8x128xf32, #tpu.memory_space<vmem>>, vector<1x8x128xf32>
      %41 = vector.shape_cast %40 : vector<1x8x128xf32> to vector<8x128xf32>
      %cst_37 = arith.constant dense<0.000000e+00> : vector<26x128xf32>
      %42 = tpu.matmul %39, %41, %cst_37 {dimension_numbers = #tpu.dot_dimension_numbers<[1], [0], [0], [1], [0, 0, 1, 1], [], []>} : vector<26x8xf32>, vector<8x128xf32>, vector<26x128xf32> -> vector<26x128xf32>
      %43 = arith.addf %35, %42 : vector<26x128xf32>
      %c1_i32_38 = arith.constant 1 : i32
      %44 = arith.addi %2, %c1_i32_38 : i32
      %c0_39 = arith.constant 0 : index
      %45 = arith.index_cast %44 : i32 to index
      %c2_40 = arith.constant 2 : index
      %c0_41 = arith.constant 0 : index
      %46 = vector.load %arg1[%c0_39, %45, %c2_40, %c0_41] : memref<1x28x28x8xf32, #tpu.memory_space<vmem>>, vector<1x1x26x8xf32>
      %47 = vector.shape_cast %46 : vector<1x1x26x8xf32> to vector<26x8xf32>
      %c5 = arith.constant 5 : index
      %c0_42 = arith.constant 0 : index
      %c0_43 = arith.constant 0 : index
      %48 = vector.load %arg2[%c5, %c0_42, %c0_43] : memref<9x8x128xf32, #tpu.memory_space<vmem>>, vector<1x8x128xf32>
      %49 = vector.shape_cast %48 : vector<1x8x128xf32> to vector<8x128xf32>
      %cst_44 = arith.constant dense<0.000000e+00> : vector<26x128xf32>
      %50 = tpu.matmul %47, %49, %cst_44 {dimension_numbers = #tpu.dot_dimension_numbers<[1], [0], [0], [1], [0, 0, 1, 1], [], []>} : vector<26x8xf32>, vector<8x128xf32>, vector<26x128xf32> -> vector<26x128xf32>
      %51 = arith.addf %43, %50 : vector<26x128xf32>
      %c2_i32_45 = arith.constant 2 : i32
      %52 = arith.addi %2, %c2_i32_45 : i32
      %c0_46 = arith.constant 0 : index
      %53 = arith.index_cast %52 : i32 to index
      %c0_47 = arith.constant 0 : index
      %c0_48 = arith.constant 0 : index
      %54 = vector.load %arg1[%c0_46, %53, %c0_47, %c0_48] : memref<1x28x28x8xf32, #tpu.memory_space<vmem>>, vector<1x1x26x8xf32>
      %55 = vector.shape_cast %54 : vector<1x1x26x8xf32> to vector<26x8xf32>
      %c6 = arith.constant 6 : index
      %c0_49 = arith.constant 0 : index
      %c0_50 = arith.constant 0 : index
      %56 = vector.load %arg2[%c6, %c0_49, %c0_50] : memref<9x8x128xf32, #tpu.memory_space<vmem>>, vector<1x8x128xf32>
      %57 = vector.shape_cast %56 : vector<1x8x128xf32> to vector<8x128xf32>
      %cst_51 = arith.constant dense<0.000000e+00> : vector<26x128xf32>
      %58 = tpu.matmul %55, %57, %cst_51 {dimension_numbers = #tpu.dot_dimension_numbers<[1], [0], [0], [1], [0, 0, 1, 1], [], []>} : vector<26x8xf32>, vector<8x128xf32>, vector<26x128xf32> -> vector<26x128xf32>
      %59 = arith.addf %51, %58 : vector<26x128xf32>
      %c2_i32_52 = arith.constant 2 : i32
      %60 = arith.addi %2, %c2_i32_52 : i32
      %c0_53 = arith.constant 0 : index
      %61 = arith.index_cast %60 : i32 to index
      %c1_54 = arith.constant 1 : index
      %c0_55 = arith.constant 0 : index
      %62 = vector.load %arg1[%c0_53, %61, %c1_54, %c0_55] : memref<1x28x28x8xf32, #tpu.memory_space<vmem>>, vector<1x1x26x8xf32>
      %63 = vector.shape_cast %62 : vector<1x1x26x8xf32> to vector<26x8xf32>
      %c7 = arith.constant 7 : index
      %c0_56 = arith.constant 0 : index
      %c0_57 = arith.constant 0 : index
      %64 = vector.load %arg2[%c7, %c0_56, %c0_57] : memref<9x8x128xf32, #tpu.memory_space<vmem>>, vector<1x8x128xf32>
      %65 = vector.shape_cast %64 : vector<1x8x128xf32> to vector<8x128xf32>
      %cst_58 = arith.constant dense<0.000000e+00> : vector<26x128xf32>
      %66 = tpu.matmul %63, %65, %cst_58 {dimension_numbers = #tpu.dot_dimension_numbers<[1], [0], [0], [1], [0, 0, 1, 1], [], []>} : vector<26x8xf32>, vector<8x128xf32>, vector<26x128xf32> -> vector<26x128xf32>
      %67 = arith.addf %59, %66 : vector<26x128xf32>
      %c2_i32_59 = arith.constant 2 : i32
      %68 = arith.addi %2, %c2_i32_59 : i32
      %c0_60 = arith.constant 0 : index
      %69 = arith.index_cast %68 : i32 to index
      %c2_61 = arith.constant 2 : index
      %c0_62 = arith.constant 0 : index
      %70 = vector.load %arg1[%c0_60, %69, %c2_61, %c0_62] : memref<1x28x28x8xf32, #tpu.memory_space<vmem>>, vector<1x1x26x8xf32>
      %71 = vector.shape_cast %70 : vector<1x1x26x8xf32> to vector<26x8xf32>
      %c8 = arith.constant 8 : index
      %c0_63 = arith.constant 0 : index
      %c0_64 = arith.constant 0 : index
      %72 = vector.load %arg2[%c8, %c0_63, %c0_64] : memref<9x8x128xf32, #tpu.memory_space<vmem>>, vector<1x8x128xf32>
      %73 = vector.shape_cast %72 : vector<1x8x128xf32> to vector<8x128xf32>
      %cst_65 = arith.constant dense<0.000000e+00> : vector<26x128xf32>
      %74 = tpu.matmul %71, %73, %cst_65 {dimension_numbers = #tpu.dot_dimension_numbers<[1], [0], [0], [1], [0, 0, 1, 1], [], []>} : vector<26x8xf32>, vector<8x128xf32>, vector<26x128xf32> -> vector<26x128xf32>
      %75 = arith.addf %67, %74 : vector<26x128xf32>
      %76 = vector.broadcast %0 : vector<1x128xf32> to vector<26x128xf32>
      %77 = arith.addf %75, %76 : vector<26x128xf32>
      %cst_66 = arith.constant 0.000000e+00 : f32
      %78 = vector.broadcast %cst_66 : f32 to vector<26x128xf32>
      %79 = arith.maximumf %77, %78 : vector<26x128xf32>
      %c1_i32_67 = arith.constant 1 : i32
      %80 = arith.addi %2, %c1_i32_67 : i32
      %cst_68 = arith.constant 0.000000e+00 : f32
      %81 = vector.broadcast %cst_68 : f32 to vector<26x128xf32>
      %c0_i32_69 = arith.constant 0 : i32
      %82 = arith.addi %80, %c0_i32_69 : i32
      %c0_70 = arith.constant 0 : index
      %83 = arith.index_cast %82 : i32 to index
      %c0_71 = arith.constant 0 : index
      %c0_72 = arith.constant 0 : index
      %84 = vector.load %arg1[%c0_70, %83, %c0_71, %c0_72] : memref<1x28x28x8xf32, #tpu.memory_space<vmem>>, vector<1x1x26x8xf32>
      %85 = vector.shape_cast %84 : vector<1x1x26x8xf32> to vector<26x8xf32>
      %c0_73 = arith.constant 0 : index
      %c0_74 = arith.constant 0 : index
      %c0_75 = arith.constant 0 : index
      %86 = vector.load %arg2[%c0_73, %c0_74, %c0_75] : memref<9x8x128xf32, #tpu.memory_space<vmem>>, vector<1x8x128xf32>
      %87 = vector.shape_cast %86 : vector<1x8x128xf32> to vector<8x128xf32>
      %cst_76 = arith.constant dense<0.000000e+00> : vector<26x128xf32>
      %88 = tpu.matmul %85, %87, %cst_76 {dimension_numbers = #tpu.dot_dimension_numbers<[1], [0], [0], [1], [0, 0, 1, 1], [], []>} : vector<26x8xf32>, vector<8x128xf32>, vector<26x128xf32> -> vector<26x128xf32>
      %89 = arith.addf %81, %88 : vector<26x128xf32>
      %c0_i32_77 = arith.constant 0 : i32
      %90 = arith.addi %80, %c0_i32_77 : i32
      %c0_78 = arith.constant 0 : index
      %91 = arith.index_cast %90 : i32 to index
      %c1_79 = arith.constant 1 : index
      %c0_80 = arith.constant 0 : index
      %92 = vector.load %arg1[%c0_78, %91, %c1_79, %c0_80] : memref<1x28x28x8xf32, #tpu.memory_space<vmem>>, vector<1x1x26x8xf32>
      %93 = vector.shape_cast %92 : vector<1x1x26x8xf32> to vector<26x8xf32>
      %c1_81 = arith.constant 1 : index
      %c0_82 = arith.constant 0 : index
      %c0_83 = arith.constant 0 : index
      %94 = vector.load %arg2[%c1_81, %c0_82, %c0_83] : memref<9x8x128xf32, #tpu.memory_space<vmem>>, vector<1x8x128xf32>
      %95 = vector.shape_cast %94 : vector<1x8x128xf32> to vector<8x128xf32>
      %cst_84 = arith.constant dense<0.000000e+00> : vector<26x128xf32>
      %96 = tpu.matmul %93, %95, %cst_84 {dimension_numbers = #tpu.dot_dimension_numbers<[1], [0], [0], [1], [0, 0, 1, 1], [], []>} : vector<26x8xf32>, vector<8x128xf32>, vector<26x128xf32> -> vector<26x128xf32>
      %97 = arith.addf %89, %96 : vector<26x128xf32>
      %c0_i32_85 = arith.constant 0 : i32
      %98 = arith.addi %80, %c0_i32_85 : i32
      %c0_86 = arith.constant 0 : index
      %99 = arith.index_cast %98 : i32 to index
      %c2_87 = arith.constant 2 : index
      %c0_88 = arith.constant 0 : index
      %100 = vector.load %arg1[%c0_86, %99, %c2_87, %c0_88] : memref<1x28x28x8xf32, #tpu.memory_space<vmem>>, vector<1x1x26x8xf32>
      %101 = vector.shape_cast %100 : vector<1x1x26x8xf32> to vector<26x8xf32>
      %c2_89 = arith.constant 2 : index
      %c0_90 = arith.constant 0 : index
      %c0_91 = arith.constant 0 : index
      %102 = vector.load %arg2[%c2_89, %c0_90, %c0_91] : memref<9x8x128xf32, #tpu.memory_space<vmem>>, vector<1x8x128xf32>
      %103 = vector.shape_cast %102 : vector<1x8x128xf32> to vector<8x128xf32>
      %cst_92 = arith.constant dense<0.000000e+00> : vector<26x128xf32>
      %104 = tpu.matmul %101, %103, %cst_92 {dimension_numbers = #tpu.dot_dimension_numbers<[1], [0], [0], [1], [0, 0, 1, 1], [], []>} : vector<26x8xf32>, vector<8x128xf32>, vector<26x128xf32> -> vector<26x128xf32>
      %105 = arith.addf %97, %104 : vector<26x128xf32>
      %c1_i32_93 = arith.constant 1 : i32
      %106 = arith.addi %80, %c1_i32_93 : i32
      %c0_94 = arith.constant 0 : index
      %107 = arith.index_cast %106 : i32 to index
      %c0_95 = arith.constant 0 : index
      %c0_96 = arith.constant 0 : index
      %108 = vector.load %arg1[%c0_94, %107, %c0_95, %c0_96] : memref<1x28x28x8xf32, #tpu.memory_space<vmem>>, vector<1x1x26x8xf32>
      %109 = vector.shape_cast %108 : vector<1x1x26x8xf32> to vector<26x8xf32>
      %c3_97 = arith.constant 3 : index
      %c0_98 = arith.constant 0 : index
      %c0_99 = arith.constant 0 : index
      %110 = vector.load %arg2[%c3_97, %c0_98, %c0_99] : memref<9x8x128xf32, #tpu.memory_space<vmem>>, vector<1x8x128xf32>
      %111 = vector.shape_cast %110 : vector<1x8x128xf32> to vector<8x128xf32>
      %cst_100 = arith.constant dense<0.000000e+00> : vector<26x128xf32>
      %112 = tpu.matmul %109, %111, %cst_100 {dimension_numbers = #tpu.dot_dimension_numbers<[1], [0], [0], [1], [0, 0, 1, 1], [], []>} : vector<26x8xf32>, vector<8x128xf32>, vector<26x128xf32> -> vector<26x128xf32>
      %113 = arith.addf %105, %112 : vector<26x128xf32>
      %c1_i32_101 = arith.constant 1 : i32
      %114 = arith.addi %80, %c1_i32_101 : i32
      %c0_102 = arith.constant 0 : index
      %115 = arith.index_cast %114 : i32 to index
      %c1_103 = arith.constant 1 : index
      %c0_104 = arith.constant 0 : index
      %116 = vector.load %arg1[%c0_102, %115, %c1_103, %c0_104] : memref<1x28x28x8xf32, #tpu.memory_space<vmem>>, vector<1x1x26x8xf32>
      %117 = vector.shape_cast %116 : vector<1x1x26x8xf32> to vector<26x8xf32>
      %c4_105 = arith.constant 4 : index
      %c0_106 = arith.constant 0 : index
      %c0_107 = arith.constant 0 : index
      %118 = vector.load %arg2[%c4_105, %c0_106, %c0_107] : memref<9x8x128xf32, #tpu.memory_space<vmem>>, vector<1x8x128xf32>
      %119 = vector.shape_cast %118 : vector<1x8x128xf32> to vector<8x128xf32>
      %cst_108 = arith.constant dense<0.000000e+00> : vector<26x128xf32>
      %120 = tpu.matmul %117, %119, %cst_108 {dimension_numbers = #tpu.dot_dimension_numbers<[1], [0], [0], [1], [0, 0, 1, 1], [], []>} : vector<26x8xf32>, vector<8x128xf32>, vector<26x128xf32> -> vector<26x128xf32>
      %121 = arith.addf %113, %120 : vector<26x128xf32>
      %c1_i32_109 = arith.constant 1 : i32
      %122 = arith.addi %80, %c1_i32_109 : i32
      %c0_110 = arith.constant 0 : index
      %123 = arith.index_cast %122 : i32 to index
      %c2_111 = arith.constant 2 : index
      %c0_112 = arith.constant 0 : index
      %124 = vector.load %arg1[%c0_110, %123, %c2_111, %c0_112] : memref<1x28x28x8xf32, #tpu.memory_space<vmem>>, vector<1x1x26x8xf32>
      %125 = vector.shape_cast %124 : vector<1x1x26x8xf32> to vector<26x8xf32>
      %c5_113 = arith.constant 5 : index
      %c0_114 = arith.constant 0 : index
      %c0_115 = arith.constant 0 : index
      %126 = vector.load %arg2[%c5_113, %c0_114, %c0_115] : memref<9x8x128xf32, #tpu.memory_space<vmem>>, vector<1x8x128xf32>
      %127 = vector.shape_cast %126 : vector<1x8x128xf32> to vector<8x128xf32>
      %cst_116 = arith.constant dense<0.000000e+00> : vector<26x128xf32>
      %128 = tpu.matmul %125, %127, %cst_116 {dimension_numbers = #tpu.dot_dimension_numbers<[1], [0], [0], [1], [0, 0, 1, 1], [], []>} : vector<26x8xf32>, vector<8x128xf32>, vector<26x128xf32> -> vector<26x128xf32>
      %129 = arith.addf %121, %128 : vector<26x128xf32>
      %c2_i32_117 = arith.constant 2 : i32
      %130 = arith.addi %80, %c2_i32_117 : i32
      %c0_118 = arith.constant 0 : index
      %131 = arith.index_cast %130 : i32 to index
      %c0_119 = arith.constant 0 : index
      %c0_120 = arith.constant 0 : index
      %132 = vector.load %arg1[%c0_118, %131, %c0_119, %c0_120] : memref<1x28x28x8xf32, #tpu.memory_space<vmem>>, vector<1x1x26x8xf32>
      %133 = vector.shape_cast %132 : vector<1x1x26x8xf32> to vector<26x8xf32>
      %c6_121 = arith.constant 6 : index
      %c0_122 = arith.constant 0 : index
      %c0_123 = arith.constant 0 : index
      %134 = vector.load %arg2[%c6_121, %c0_122, %c0_123] : memref<9x8x128xf32, #tpu.memory_space<vmem>>, vector<1x8x128xf32>
      %135 = vector.shape_cast %134 : vector<1x8x128xf32> to vector<8x128xf32>
      %cst_124 = arith.constant dense<0.000000e+00> : vector<26x128xf32>
      %136 = tpu.matmul %133, %135, %cst_124 {dimension_numbers = #tpu.dot_dimension_numbers<[1], [0], [0], [1], [0, 0, 1, 1], [], []>} : vector<26x8xf32>, vector<8x128xf32>, vector<26x128xf32> -> vector<26x128xf32>
      %137 = arith.addf %129, %136 : vector<26x128xf32>
      %c2_i32_125 = arith.constant 2 : i32
      %138 = arith.addi %80, %c2_i32_125 : i32
      %c0_126 = arith.constant 0 : index
      %139 = arith.index_cast %138 : i32 to index
      %c1_127 = arith.constant 1 : index
      %c0_128 = arith.constant 0 : index
      %140 = vector.load %arg1[%c0_126, %139, %c1_127, %c0_128] : memref<1x28x28x8xf32, #tpu.memory_space<vmem>>, vector<1x1x26x8xf32>
      %141 = vector.shape_cast %140 : vector<1x1x26x8xf32> to vector<26x8xf32>
      %c7_129 = arith.constant 7 : index
      %c0_130 = arith.constant 0 : index
      %c0_131 = arith.constant 0 : index
      %142 = vector.load %arg2[%c7_129, %c0_130, %c0_131] : memref<9x8x128xf32, #tpu.memory_space<vmem>>, vector<1x8x128xf32>
      %143 = vector.shape_cast %142 : vector<1x8x128xf32> to vector<8x128xf32>
      %cst_132 = arith.constant dense<0.000000e+00> : vector<26x128xf32>
      %144 = tpu.matmul %141, %143, %cst_132 {dimension_numbers = #tpu.dot_dimension_numbers<[1], [0], [0], [1], [0, 0, 1, 1], [], []>} : vector<26x8xf32>, vector<8x128xf32>, vector<26x128xf32> -> vector<26x128xf32>
      %145 = arith.addf %137, %144 : vector<26x128xf32>
      %c2_i32_133 = arith.constant 2 : i32
      %146 = arith.addi %80, %c2_i32_133 : i32
      %c0_134 = arith.constant 0 : index
      %147 = arith.index_cast %146 : i32 to index
      %c2_135 = arith.constant 2 : index
      %c0_136 = arith.constant 0 : index
      %148 = vector.load %arg1[%c0_134, %147, %c2_135, %c0_136] : memref<1x28x28x8xf32, #tpu.memory_space<vmem>>, vector<1x1x26x8xf32>
      %149 = vector.shape_cast %148 : vector<1x1x26x8xf32> to vector<26x8xf32>
      %c8_137 = arith.constant 8 : index
      %c0_138 = arith.constant 0 : index
      %c0_139 = arith.constant 0 : index
      %150 = vector.load %arg2[%c8_137, %c0_138, %c0_139] : memref<9x8x128xf32, #tpu.memory_space<vmem>>, vector<1x8x128xf32>
      %151 = vector.shape_cast %150 : vector<1x8x128xf32> to vector<8x128xf32>
      %cst_140 = arith.constant dense<0.000000e+00> : vector<26x128xf32>
      %152 = tpu.matmul %149, %151, %cst_140 {dimension_numbers = #tpu.dot_dimension_numbers<[1], [0], [0], [1], [0, 0, 1, 1], [], []>} : vector<26x8xf32>, vector<8x128xf32>, vector<26x128xf32> -> vector<26x128xf32>
      %153 = arith.addf %145, %152 : vector<26x128xf32>
      %154 = vector.broadcast %0 : vector<1x128xf32> to vector<26x128xf32>
      %155 = arith.addf %153, %154 : vector<26x128xf32>
      %cst_141 = arith.constant 0.000000e+00 : f32
      %156 = vector.broadcast %cst_141 : f32 to vector<26x128xf32>
      %157 = arith.maximumf %155, %156 : vector<26x128xf32>
      %158 = arith.maximumf %79, %157 : vector<26x128xf32>
      %c0_142 = arith.constant 0 : index
      %c0_143 = arith.constant 0 : index
      %159 = vector.load %arg5[%c0_142, %c0_143] : memref<26x128xf32, #tpu.memory_space<vmem>>, vector<26x128xf32>
      tpu.vector_store %arg5[%c0_142, %c0_143], %158 {strides = array<i32>} : memref<26x128xf32, #tpu.memory_space<vmem>>, vector<26x128xf32>,
      %c0_144 = arith.constant 0 : index
      %c0_145 = arith.constant 0 : index
      %160 = tpu.strided_load %arg5[%c0_144, %c0_145] {strides = array<i32: 2, 1>} : memref<26x128xf32, #tpu.memory_space<vmem>>, vector<13x128xf32>
      %c1_146 = arith.constant 1 : index
      %c0_147 = arith.constant 0 : index
      %161 = tpu.strided_load %arg5[%c1_146, %c0_147] {strides = array<i32: 2, 1>} : memref<26x128xf32, #tpu.memory_space<vmem>>, vector<13x128xf32>
      %162 = arith.maximumf %160, %161 : vector<13x128xf32>
      %c0_148 = arith.constant 0 : index
      %163 = arith.index_cast %arg6 : i32 to index
      %c0_149 = arith.constant 0 : index
      %c0_150 = arith.constant 0 : index
      %164 = vector.load %arg4[%c0_148, %163, %c0_149, %c0_150] : memref<1x13x13x128xf32, #tpu.memory_space<vmem>>, vector<1x1x13x128xf32>
      %165 = vector.shape_cast %164 : vector<1x1x13x128xf32> to vector<13x128xf32>
      %166 = vector.shape_cast %162 : vector<13x128xf32> to vector<1x1x13x128xf32>
      tpu.vector_store %arg4[%c0_148, %163, %c0_149, %c0_150], %166 {strides = array<i32>} : memref<1x13x13x128xf32, #tpu.memory_space<vmem>>, vector<1x1x13x128xf32>,
    }
    %c13_i32_1 = arith.constant 13 : i32
    return
  }
  func.func @transform_0(%arg0: i32) -> (i32, i32, i32, i32) {
    %c0_i32 = arith.constant 0 : i32
    %c0_i32_0 = arith.constant 0 : i32
    %c0_i32_1 = arith.constant 0 : i32
    %c0_i32_2 = arith.constant 0 : i32
    return %arg0, %c0_i32, %c0_i32_0, %c0_i32_1 : i32, i32, i32, i32
  }
  func.func @transform_1(%arg0: i32) -> (i32, i32, i32) {
    %c0_i32 = arith.constant 0 : i32
    %c0_i32_0 = arith.constant 0 : i32
    %c0_i32_1 = arith.constant 0 : i32
    %c0_i32_2 = arith.constant 0 : i32
    return %c0_i32, %c0_i32_0, %c0_i32_1 : i32, i32, i32
  }
  func.func @transform_2(%arg0: i32) -> (i32, i32) {
    %c0_i32 = arith.constant 0 : i32
    %c0_i32_0 = arith.constant 0 : i32
    %c0_i32_1 = arith.constant 0 : i32
    return %c0_i32, %c0_i32_0 : i32, i32
  }
  func.func @transform_3(%arg0: i32) -> (i32, i32, i32, i32) {
    %c0_i32 = arith.constant 0 : i32
    %c0_i32_0 = arith.constant 0 : i32
    %c0_i32_1 = arith.constant 0 : i32
    %c0_i32_2 = arith.constant 0 : i32
    return %arg0, %c0_i32, %c0_i32_0, %c0_i32_1 : i32, i32, i32, i32
  }
}

module attributes {stable_mosaic.version = 11 : i64} {
  func.func @_conv3x3_relu_pool_kernel(%arg0: i32, %arg1: memref<1x13x13x128xf32, #tpu.memory_space<vmem>>, %arg2: memref<9x128x128xf32, #tpu.memory_space<vmem>>, %arg3: memref<1x128xf32, #tpu.memory_space<vmem>>, %arg4: memref<1x5x5x128xf32, #tpu.memory_space<vmem>>, %arg5: memref<11x128xf32, #tpu.memory_space<vmem>>) attributes {dimension_semantics = [#tpu.dimension_semantics<parallel>], iteration_bounds = array<i64: 2>, scalar_prefetch = 0 : i64, scratch_operands = 1 : i64, tpu.core_type = #tpu.core_type<tc>, window_params = [{transform_indices = @transform_0, window_bounds = array<i64: 1, 13, 13, 128>}, {pipeline_mode = #tpu.pipeline_mode<synchronous>, transform_indices = @transform_1, window_bounds = array<i64: 9, 128, 128>}, {pipeline_mode = #tpu.pipeline_mode<synchronous>, transform_indices = @transform_2, window_bounds = array<i64: 1, 128>}, {transform_indices = @transform_3, window_bounds = array<i64: 1, 5, 5, 128>}]} {
    %c0 = arith.constant 0 : index
    %c0_0 = arith.constant 0 : index
    %0 = vector.load %arg3[%c0, %c0_0] : memref<1x128xf32, #tpu.memory_space<vmem>>, vector<1x128xf32>
    %c0_i32 = arith.constant 0 : i32
    %c5_i32 = arith.constant 5 : i32
    %1 = arith.addi %c0_i32, %c5_i32 : i32
    %c1_i32 = arith.constant 1 : i32
    scf.for %arg6 = %c0_i32 to %1 step %c1_i32  : i32 {
      %c2_i32 = arith.constant 2 : i32
      %2 = arith.muli %c2_i32, %arg6 : i32
      %cst = arith.constant 0.000000e+00 : f32
      %3 = vector.broadcast %cst : f32 to vector<11x128xf32>
      %c0_i32_2 = arith.constant 0 : i32
      %4 = arith.addi %2, %c0_i32_2 : i32
      %c0_3 = arith.constant 0 : index
      %5 = arith.index_cast %4 : i32 to index
      %c0_4 = arith.constant 0 : index
      %c0_5 = arith.constant 0 : index
      %6 = vector.load %arg1[%c0_3, %5, %c0_4, %c0_5] : memref<1x13x13x128xf32, #tpu.memory_space<vmem>>, vector<1x1x11x128xf32>
      %7 = vector.shape_cast %6 : vector<1x1x11x128xf32> to vector<11x128xf32>
      %c0_6 = arith.constant 0 : index
      %c0_7 = arith.constant 0 : index
      %c0_8 = arith.constant 0 : index
      %8 = vector.load %arg2[%c0_6, %c0_7, %c0_8] : memref<9x128x128xf32, #tpu.memory_space<vmem>>, vector<1x128x128xf32>
      %9 = vector.shape_cast %8 : vector<1x128x128xf32> to vector<128x128xf32>
      %cst_9 = arith.constant dense<0.000000e+00> : vector<11x128xf32>
      %10 = tpu.matmul %7, %9, %cst_9 {dimension_numbers = #tpu.dot_dimension_numbers<[1], [0], [0], [1], [0, 0, 1, 1], [], []>} : vector<11x128xf32>, vector<128x128xf32>, vector<11x128xf32> -> vector<11x128xf32>
      %11 = arith.addf %3, %10 : vector<11x128xf32>
      %c0_i32_10 = arith.constant 0 : i32
      %12 = arith.addi %2, %c0_i32_10 : i32
      %c0_11 = arith.constant 0 : index
      %13 = arith.index_cast %12 : i32 to index
      %c1 = arith.constant 1 : index
      %c0_12 = arith.constant 0 : index
      %14 = vector.load %arg1[%c0_11, %13, %c1, %c0_12] : memref<1x13x13x128xf32, #tpu.memory_space<vmem>>, vector<1x1x11x128xf32>
      %15 = vector.shape_cast %14 : vector<1x1x11x128xf32> to vector<11x128xf32>
      %c1_13 = arith.constant 1 : index
      %c0_14 = arith.constant 0 : index
      %c0_15 = arith.constant 0 : index
      %16 = vector.load %arg2[%c1_13, %c0_14, %c0_15] : memref<9x128x128xf32, #tpu.memory_space<vmem>>, vector<1x128x128xf32>
      %17 = vector.shape_cast %16 : vector<1x128x128xf32> to vector<128x128xf32>
      %cst_16 = arith.constant dense<0.000000e+00> : vector<11x128xf32>
      %18 = tpu.matmul %15, %17, %cst_16 {dimension_numbers = #tpu.dot_dimension_numbers<[1], [0], [0], [1], [0, 0, 1, 1], [], []>} : vector<11x128xf32>, vector<128x128xf32>, vector<11x128xf32> -> vector<11x128xf32>
      %19 = arith.addf %11, %18 : vector<11x128xf32>
      %c0_i32_17 = arith.constant 0 : i32
      %20 = arith.addi %2, %c0_i32_17 : i32
      %c0_18 = arith.constant 0 : index
      %21 = arith.index_cast %20 : i32 to index
      %c2 = arith.constant 2 : index
      %c0_19 = arith.constant 0 : index
      %22 = vector.load %arg1[%c0_18, %21, %c2, %c0_19] : memref<1x13x13x128xf32, #tpu.memory_space<vmem>>, vector<1x1x11x128xf32>
      %23 = vector.shape_cast %22 : vector<1x1x11x128xf32> to vector<11x128xf32>
      %c2_20 = arith.constant 2 : index
      %c0_21 = arith.constant 0 : index
      %c0_22 = arith.constant 0 : index
      %24 = vector.load %arg2[%c2_20, %c0_21, %c0_22] : memref<9x128x128xf32, #tpu.memory_space<vmem>>, vector<1x128x128xf32>
      %25 = vector.shape_cast %24 : vector<1x128x128xf32> to vector<128x128xf32>
      %cst_23 = arith.constant dense<0.000000e+00> : vector<11x128xf32>
      %26 = tpu.matmul %23, %25, %cst_23 {dimension_numbers = #tpu.dot_dimension_numbers<[1], [0], [0], [1], [0, 0, 1, 1], [], []>} : vector<11x128xf32>, vector<128x128xf32>, vector<11x128xf32> -> vector<11x128xf32>
      %27 = arith.addf %19, %26 : vector<11x128xf32>
      %c1_i32_24 = arith.constant 1 : i32
      %28 = arith.addi %2, %c1_i32_24 : i32
      %c0_25 = arith.constant 0 : index
      %29 = arith.index_cast %28 : i32 to index
      %c0_26 = arith.constant 0 : index
      %c0_27 = arith.constant 0 : index
      %30 = vector.load %arg1[%c0_25, %29, %c0_26, %c0_27] : memref<1x13x13x128xf32, #tpu.memory_space<vmem>>, vector<1x1x11x128xf32>
      %31 = vector.shape_cast %30 : vector<1x1x11x128xf32> to vector<11x128xf32>
      %c3 = arith.constant 3 : index
      %c0_28 = arith.constant 0 : index
      %c0_29 = arith.constant 0 : index
      %32 = vector.load %arg2[%c3, %c0_28, %c0_29] : memref<9x128x128xf32, #tpu.memory_space<vmem>>, vector<1x128x128xf32>
      %33 = vector.shape_cast %32 : vector<1x128x128xf32> to vector<128x128xf32>
      %cst_30 = arith.constant dense<0.000000e+00> : vector<11x128xf32>
      %34 = tpu.matmul %31, %33, %cst_30 {dimension_numbers = #tpu.dot_dimension_numbers<[1], [0], [0], [1], [0, 0, 1, 1], [], []>} : vector<11x128xf32>, vector<128x128xf32>, vector<11x128xf32> -> vector<11x128xf32>
      %35 = arith.addf %27, %34 : vector<11x128xf32>
      %c1_i32_31 = arith.constant 1 : i32
      %36 = arith.addi %2, %c1_i32_31 : i32
      %c0_32 = arith.constant 0 : index
      %37 = arith.index_cast %36 : i32 to index
      %c1_33 = arith.constant 1 : index
      %c0_34 = arith.constant 0 : index
      %38 = vector.load %arg1[%c0_32, %37, %c1_33, %c0_34] : memref<1x13x13x128xf32, #tpu.memory_space<vmem>>, vector<1x1x11x128xf32>
      %39 = vector.shape_cast %38 : vector<1x1x11x128xf32> to vector<11x128xf32>
      %c4 = arith.constant 4 : index
      %c0_35 = arith.constant 0 : index
      %c0_36 = arith.constant 0 : index
      %40 = vector.load %arg2[%c4, %c0_35, %c0_36] : memref<9x128x128xf32, #tpu.memory_space<vmem>>, vector<1x128x128xf32>
      %41 = vector.shape_cast %40 : vector<1x128x128xf32> to vector<128x128xf32>
      %cst_37 = arith.constant dense<0.000000e+00> : vector<11x128xf32>
      %42 = tpu.matmul %39, %41, %cst_37 {dimension_numbers = #tpu.dot_dimension_numbers<[1], [0], [0], [1], [0, 0, 1, 1], [], []>} : vector<11x128xf32>, vector<128x128xf32>, vector<11x128xf32> -> vector<11x128xf32>
      %43 = arith.addf %35, %42 : vector<11x128xf32>
      %c1_i32_38 = arith.constant 1 : i32
      %44 = arith.addi %2, %c1_i32_38 : i32
      %c0_39 = arith.constant 0 : index
      %45 = arith.index_cast %44 : i32 to index
      %c2_40 = arith.constant 2 : index
      %c0_41 = arith.constant 0 : index
      %46 = vector.load %arg1[%c0_39, %45, %c2_40, %c0_41] : memref<1x13x13x128xf32, #tpu.memory_space<vmem>>, vector<1x1x11x128xf32>
      %47 = vector.shape_cast %46 : vector<1x1x11x128xf32> to vector<11x128xf32>
      %c5 = arith.constant 5 : index
      %c0_42 = arith.constant 0 : index
      %c0_43 = arith.constant 0 : index
      %48 = vector.load %arg2[%c5, %c0_42, %c0_43] : memref<9x128x128xf32, #tpu.memory_space<vmem>>, vector<1x128x128xf32>
      %49 = vector.shape_cast %48 : vector<1x128x128xf32> to vector<128x128xf32>
      %cst_44 = arith.constant dense<0.000000e+00> : vector<11x128xf32>
      %50 = tpu.matmul %47, %49, %cst_44 {dimension_numbers = #tpu.dot_dimension_numbers<[1], [0], [0], [1], [0, 0, 1, 1], [], []>} : vector<11x128xf32>, vector<128x128xf32>, vector<11x128xf32> -> vector<11x128xf32>
      %51 = arith.addf %43, %50 : vector<11x128xf32>
      %c2_i32_45 = arith.constant 2 : i32
      %52 = arith.addi %2, %c2_i32_45 : i32
      %c0_46 = arith.constant 0 : index
      %53 = arith.index_cast %52 : i32 to index
      %c0_47 = arith.constant 0 : index
      %c0_48 = arith.constant 0 : index
      %54 = vector.load %arg1[%c0_46, %53, %c0_47, %c0_48] : memref<1x13x13x128xf32, #tpu.memory_space<vmem>>, vector<1x1x11x128xf32>
      %55 = vector.shape_cast %54 : vector<1x1x11x128xf32> to vector<11x128xf32>
      %c6 = arith.constant 6 : index
      %c0_49 = arith.constant 0 : index
      %c0_50 = arith.constant 0 : index
      %56 = vector.load %arg2[%c6, %c0_49, %c0_50] : memref<9x128x128xf32, #tpu.memory_space<vmem>>, vector<1x128x128xf32>
      %57 = vector.shape_cast %56 : vector<1x128x128xf32> to vector<128x128xf32>
      %cst_51 = arith.constant dense<0.000000e+00> : vector<11x128xf32>
      %58 = tpu.matmul %55, %57, %cst_51 {dimension_numbers = #tpu.dot_dimension_numbers<[1], [0], [0], [1], [0, 0, 1, 1], [], []>} : vector<11x128xf32>, vector<128x128xf32>, vector<11x128xf32> -> vector<11x128xf32>
      %59 = arith.addf %51, %58 : vector<11x128xf32>
      %c2_i32_52 = arith.constant 2 : i32
      %60 = arith.addi %2, %c2_i32_52 : i32
      %c0_53 = arith.constant 0 : index
      %61 = arith.index_cast %60 : i32 to index
      %c1_54 = arith.constant 1 : index
      %c0_55 = arith.constant 0 : index
      %62 = vector.load %arg1[%c0_53, %61, %c1_54, %c0_55] : memref<1x13x13x128xf32, #tpu.memory_space<vmem>>, vector<1x1x11x128xf32>
      %63 = vector.shape_cast %62 : vector<1x1x11x128xf32> to vector<11x128xf32>
      %c7 = arith.constant 7 : index
      %c0_56 = arith.constant 0 : index
      %c0_57 = arith.constant 0 : index
      %64 = vector.load %arg2[%c7, %c0_56, %c0_57] : memref<9x128x128xf32, #tpu.memory_space<vmem>>, vector<1x128x128xf32>
      %65 = vector.shape_cast %64 : vector<1x128x128xf32> to vector<128x128xf32>
      %cst_58 = arith.constant dense<0.000000e+00> : vector<11x128xf32>
      %66 = tpu.matmul %63, %65, %cst_58 {dimension_numbers = #tpu.dot_dimension_numbers<[1], [0], [0], [1], [0, 0, 1, 1], [], []>} : vector<11x128xf32>, vector<128x128xf32>, vector<11x128xf32> -> vector<11x128xf32>
      %67 = arith.addf %59, %66 : vector<11x128xf32>
      %c2_i32_59 = arith.constant 2 : i32
      %68 = arith.addi %2, %c2_i32_59 : i32
      %c0_60 = arith.constant 0 : index
      %69 = arith.index_cast %68 : i32 to index
      %c2_61 = arith.constant 2 : index
      %c0_62 = arith.constant 0 : index
      %70 = vector.load %arg1[%c0_60, %69, %c2_61, %c0_62] : memref<1x13x13x128xf32, #tpu.memory_space<vmem>>, vector<1x1x11x128xf32>
      %71 = vector.shape_cast %70 : vector<1x1x11x128xf32> to vector<11x128xf32>
      %c8 = arith.constant 8 : index
      %c0_63 = arith.constant 0 : index
      %c0_64 = arith.constant 0 : index
      %72 = vector.load %arg2[%c8, %c0_63, %c0_64] : memref<9x128x128xf32, #tpu.memory_space<vmem>>, vector<1x128x128xf32>
      %73 = vector.shape_cast %72 : vector<1x128x128xf32> to vector<128x128xf32>
      %cst_65 = arith.constant dense<0.000000e+00> : vector<11x128xf32>
      %74 = tpu.matmul %71, %73, %cst_65 {dimension_numbers = #tpu.dot_dimension_numbers<[1], [0], [0], [1], [0, 0, 1, 1], [], []>} : vector<11x128xf32>, vector<128x128xf32>, vector<11x128xf32> -> vector<11x128xf32>
      %75 = arith.addf %67, %74 : vector<11x128xf32>
      %76 = vector.broadcast %0 : vector<1x128xf32> to vector<11x128xf32>
      %77 = arith.addf %75, %76 : vector<11x128xf32>
      %cst_66 = arith.constant 0.000000e+00 : f32
      %78 = vector.broadcast %cst_66 : f32 to vector<11x128xf32>
      %79 = arith.maximumf %77, %78 : vector<11x128xf32>
      %c1_i32_67 = arith.constant 1 : i32
      %80 = arith.addi %2, %c1_i32_67 : i32
      %cst_68 = arith.constant 0.000000e+00 : f32
      %81 = vector.broadcast %cst_68 : f32 to vector<11x128xf32>
      %c0_i32_69 = arith.constant 0 : i32
      %82 = arith.addi %80, %c0_i32_69 : i32
      %c0_70 = arith.constant 0 : index
      %83 = arith.index_cast %82 : i32 to index
      %c0_71 = arith.constant 0 : index
      %c0_72 = arith.constant 0 : index
      %84 = vector.load %arg1[%c0_70, %83, %c0_71, %c0_72] : memref<1x13x13x128xf32, #tpu.memory_space<vmem>>, vector<1x1x11x128xf32>
      %85 = vector.shape_cast %84 : vector<1x1x11x128xf32> to vector<11x128xf32>
      %c0_73 = arith.constant 0 : index
      %c0_74 = arith.constant 0 : index
      %c0_75 = arith.constant 0 : index
      %86 = vector.load %arg2[%c0_73, %c0_74, %c0_75] : memref<9x128x128xf32, #tpu.memory_space<vmem>>, vector<1x128x128xf32>
      %87 = vector.shape_cast %86 : vector<1x128x128xf32> to vector<128x128xf32>
      %cst_76 = arith.constant dense<0.000000e+00> : vector<11x128xf32>
      %88 = tpu.matmul %85, %87, %cst_76 {dimension_numbers = #tpu.dot_dimension_numbers<[1], [0], [0], [1], [0, 0, 1, 1], [], []>} : vector<11x128xf32>, vector<128x128xf32>, vector<11x128xf32> -> vector<11x128xf32>
      %89 = arith.addf %81, %88 : vector<11x128xf32>
      %c0_i32_77 = arith.constant 0 : i32
      %90 = arith.addi %80, %c0_i32_77 : i32
      %c0_78 = arith.constant 0 : index
      %91 = arith.index_cast %90 : i32 to index
      %c1_79 = arith.constant 1 : index
      %c0_80 = arith.constant 0 : index
      %92 = vector.load %arg1[%c0_78, %91, %c1_79, %c0_80] : memref<1x13x13x128xf32, #tpu.memory_space<vmem>>, vector<1x1x11x128xf32>
      %93 = vector.shape_cast %92 : vector<1x1x11x128xf32> to vector<11x128xf32>
      %c1_81 = arith.constant 1 : index
      %c0_82 = arith.constant 0 : index
      %c0_83 = arith.constant 0 : index
      %94 = vector.load %arg2[%c1_81, %c0_82, %c0_83] : memref<9x128x128xf32, #tpu.memory_space<vmem>>, vector<1x128x128xf32>
      %95 = vector.shape_cast %94 : vector<1x128x128xf32> to vector<128x128xf32>
      %cst_84 = arith.constant dense<0.000000e+00> : vector<11x128xf32>
      %96 = tpu.matmul %93, %95, %cst_84 {dimension_numbers = #tpu.dot_dimension_numbers<[1], [0], [0], [1], [0, 0, 1, 1], [], []>} : vector<11x128xf32>, vector<128x128xf32>, vector<11x128xf32> -> vector<11x128xf32>
      %97 = arith.addf %89, %96 : vector<11x128xf32>
      %c0_i32_85 = arith.constant 0 : i32
      %98 = arith.addi %80, %c0_i32_85 : i32
      %c0_86 = arith.constant 0 : index
      %99 = arith.index_cast %98 : i32 to index
      %c2_87 = arith.constant 2 : index
      %c0_88 = arith.constant 0 : index
      %100 = vector.load %arg1[%c0_86, %99, %c2_87, %c0_88] : memref<1x13x13x128xf32, #tpu.memory_space<vmem>>, vector<1x1x11x128xf32>
      %101 = vector.shape_cast %100 : vector<1x1x11x128xf32> to vector<11x128xf32>
      %c2_89 = arith.constant 2 : index
      %c0_90 = arith.constant 0 : index
      %c0_91 = arith.constant 0 : index
      %102 = vector.load %arg2[%c2_89, %c0_90, %c0_91] : memref<9x128x128xf32, #tpu.memory_space<vmem>>, vector<1x128x128xf32>
      %103 = vector.shape_cast %102 : vector<1x128x128xf32> to vector<128x128xf32>
      %cst_92 = arith.constant dense<0.000000e+00> : vector<11x128xf32>
      %104 = tpu.matmul %101, %103, %cst_92 {dimension_numbers = #tpu.dot_dimension_numbers<[1], [0], [0], [1], [0, 0, 1, 1], [], []>} : vector<11x128xf32>, vector<128x128xf32>, vector<11x128xf32> -> vector<11x128xf32>
      %105 = arith.addf %97, %104 : vector<11x128xf32>
      %c1_i32_93 = arith.constant 1 : i32
      %106 = arith.addi %80, %c1_i32_93 : i32
      %c0_94 = arith.constant 0 : index
      %107 = arith.index_cast %106 : i32 to index
      %c0_95 = arith.constant 0 : index
      %c0_96 = arith.constant 0 : index
      %108 = vector.load %arg1[%c0_94, %107, %c0_95, %c0_96] : memref<1x13x13x128xf32, #tpu.memory_space<vmem>>, vector<1x1x11x128xf32>
      %109 = vector.shape_cast %108 : vector<1x1x11x128xf32> to vector<11x128xf32>
      %c3_97 = arith.constant 3 : index
      %c0_98 = arith.constant 0 : index
      %c0_99 = arith.constant 0 : index
      %110 = vector.load %arg2[%c3_97, %c0_98, %c0_99] : memref<9x128x128xf32, #tpu.memory_space<vmem>>, vector<1x128x128xf32>
      %111 = vector.shape_cast %110 : vector<1x128x128xf32> to vector<128x128xf32>
      %cst_100 = arith.constant dense<0.000000e+00> : vector<11x128xf32>
      %112 = tpu.matmul %109, %111, %cst_100 {dimension_numbers = #tpu.dot_dimension_numbers<[1], [0], [0], [1], [0, 0, 1, 1], [], []>} : vector<11x128xf32>, vector<128x128xf32>, vector<11x128xf32> -> vector<11x128xf32>
      %113 = arith.addf %105, %112 : vector<11x128xf32>
      %c1_i32_101 = arith.constant 1 : i32
      %114 = arith.addi %80, %c1_i32_101 : i32
      %c0_102 = arith.constant 0 : index
      %115 = arith.index_cast %114 : i32 to index
      %c1_103 = arith.constant 1 : index
      %c0_104 = arith.constant 0 : index
      %116 = vector.load %arg1[%c0_102, %115, %c1_103, %c0_104] : memref<1x13x13x128xf32, #tpu.memory_space<vmem>>, vector<1x1x11x128xf32>
      %117 = vector.shape_cast %116 : vector<1x1x11x128xf32> to vector<11x128xf32>
      %c4_105 = arith.constant 4 : index
      %c0_106 = arith.constant 0 : index
      %c0_107 = arith.constant 0 : index
      %118 = vector.load %arg2[%c4_105, %c0_106, %c0_107] : memref<9x128x128xf32, #tpu.memory_space<vmem>>, vector<1x128x128xf32>
      %119 = vector.shape_cast %118 : vector<1x128x128xf32> to vector<128x128xf32>
      %cst_108 = arith.constant dense<0.000000e+00> : vector<11x128xf32>
      %120 = tpu.matmul %117, %119, %cst_108 {dimension_numbers = #tpu.dot_dimension_numbers<[1], [0], [0], [1], [0, 0, 1, 1], [], []>} : vector<11x128xf32>, vector<128x128xf32>, vector<11x128xf32> -> vector<11x128xf32>
      %121 = arith.addf %113, %120 : vector<11x128xf32>
      %c1_i32_109 = arith.constant 1 : i32
      %122 = arith.addi %80, %c1_i32_109 : i32
      %c0_110 = arith.constant 0 : index
      %123 = arith.index_cast %122 : i32 to index
      %c2_111 = arith.constant 2 : index
      %c0_112 = arith.constant 0 : index
      %124 = vector.load %arg1[%c0_110, %123, %c2_111, %c0_112] : memref<1x13x13x128xf32, #tpu.memory_space<vmem>>, vector<1x1x11x128xf32>
      %125 = vector.shape_cast %124 : vector<1x1x11x128xf32> to vector<11x128xf32>
      %c5_113 = arith.constant 5 : index
      %c0_114 = arith.constant 0 : index
      %c0_115 = arith.constant 0 : index
      %126 = vector.load %arg2[%c5_113, %c0_114, %c0_115] : memref<9x128x128xf32, #tpu.memory_space<vmem>>, vector<1x128x128xf32>
      %127 = vector.shape_cast %126 : vector<1x128x128xf32> to vector<128x128xf32>
      %cst_116 = arith.constant dense<0.000000e+00> : vector<11x128xf32>
      %128 = tpu.matmul %125, %127, %cst_116 {dimension_numbers = #tpu.dot_dimension_numbers<[1], [0], [0], [1], [0, 0, 1, 1], [], []>} : vector<11x128xf32>, vector<128x128xf32>, vector<11x128xf32> -> vector<11x128xf32>
      %129 = arith.addf %121, %128 : vector<11x128xf32>
      %c2_i32_117 = arith.constant 2 : i32
      %130 = arith.addi %80, %c2_i32_117 : i32
      %c0_118 = arith.constant 0 : index
      %131 = arith.index_cast %130 : i32 to index
      %c0_119 = arith.constant 0 : index
      %c0_120 = arith.constant 0 : index
      %132 = vector.load %arg1[%c0_118, %131, %c0_119, %c0_120] : memref<1x13x13x128xf32, #tpu.memory_space<vmem>>, vector<1x1x11x128xf32>
      %133 = vector.shape_cast %132 : vector<1x1x11x128xf32> to vector<11x128xf32>
      %c6_121 = arith.constant 6 : index
      %c0_122 = arith.constant 0 : index
      %c0_123 = arith.constant 0 : index
      %134 = vector.load %arg2[%c6_121, %c0_122, %c0_123] : memref<9x128x128xf32, #tpu.memory_space<vmem>>, vector<1x128x128xf32>
      %135 = vector.shape_cast %134 : vector<1x128x128xf32> to vector<128x128xf32>
      %cst_124 = arith.constant dense<0.000000e+00> : vector<11x128xf32>
      %136 = tpu.matmul %133, %135, %cst_124 {dimension_numbers = #tpu.dot_dimension_numbers<[1], [0], [0], [1], [0, 0, 1, 1], [], []>} : vector<11x128xf32>, vector<128x128xf32>, vector<11x128xf32> -> vector<11x128xf32>
      %137 = arith.addf %129, %136 : vector<11x128xf32>
      %c2_i32_125 = arith.constant 2 : i32
      %138 = arith.addi %80, %c2_i32_125 : i32
      %c0_126 = arith.constant 0 : index
      %139 = arith.index_cast %138 : i32 to index
      %c1_127 = arith.constant 1 : index
      %c0_128 = arith.constant 0 : index
      %140 = vector.load %arg1[%c0_126, %139, %c1_127, %c0_128] : memref<1x13x13x128xf32, #tpu.memory_space<vmem>>, vector<1x1x11x128xf32>
      %141 = vector.shape_cast %140 : vector<1x1x11x128xf32> to vector<11x128xf32>
      %c7_129 = arith.constant 7 : index
      %c0_130 = arith.constant 0 : index
      %c0_131 = arith.constant 0 : index
      %142 = vector.load %arg2[%c7_129, %c0_130, %c0_131] : memref<9x128x128xf32, #tpu.memory_space<vmem>>, vector<1x128x128xf32>
      %143 = vector.shape_cast %142 : vector<1x128x128xf32> to vector<128x128xf32>
      %cst_132 = arith.constant dense<0.000000e+00> : vector<11x128xf32>
      %144 = tpu.matmul %141, %143, %cst_132 {dimension_numbers = #tpu.dot_dimension_numbers<[1], [0], [0], [1], [0, 0, 1, 1], [], []>} : vector<11x128xf32>, vector<128x128xf32>, vector<11x128xf32> -> vector<11x128xf32>
      %145 = arith.addf %137, %144 : vector<11x128xf32>
      %c2_i32_133 = arith.constant 2 : i32
      %146 = arith.addi %80, %c2_i32_133 : i32
      %c0_134 = arith.constant 0 : index
      %147 = arith.index_cast %146 : i32 to index
      %c2_135 = arith.constant 2 : index
      %c0_136 = arith.constant 0 : index
      %148 = vector.load %arg1[%c0_134, %147, %c2_135, %c0_136] : memref<1x13x13x128xf32, #tpu.memory_space<vmem>>, vector<1x1x11x128xf32>
      %149 = vector.shape_cast %148 : vector<1x1x11x128xf32> to vector<11x128xf32>
      %c8_137 = arith.constant 8 : index
      %c0_138 = arith.constant 0 : index
      %c0_139 = arith.constant 0 : index
      %150 = vector.load %arg2[%c8_137, %c0_138, %c0_139] : memref<9x128x128xf32, #tpu.memory_space<vmem>>, vector<1x128x128xf32>
      %151 = vector.shape_cast %150 : vector<1x128x128xf32> to vector<128x128xf32>
      %cst_140 = arith.constant dense<0.000000e+00> : vector<11x128xf32>
      %152 = tpu.matmul %149, %151, %cst_140 {dimension_numbers = #tpu.dot_dimension_numbers<[1], [0], [0], [1], [0, 0, 1, 1], [], []>} : vector<11x128xf32>, vector<128x128xf32>, vector<11x128xf32> -> vector<11x128xf32>
      %153 = arith.addf %145, %152 : vector<11x128xf32>
      %154 = vector.broadcast %0 : vector<1x128xf32> to vector<11x128xf32>
      %155 = arith.addf %153, %154 : vector<11x128xf32>
      %cst_141 = arith.constant 0.000000e+00 : f32
      %156 = vector.broadcast %cst_141 : f32 to vector<11x128xf32>
      %157 = arith.maximumf %155, %156 : vector<11x128xf32>
      %158 = arith.maximumf %79, %157 : vector<11x128xf32>
      %c0_142 = arith.constant 0 : index
      %c0_143 = arith.constant 0 : index
      %159 = vector.load %arg5[%c0_142, %c0_143] : memref<11x128xf32, #tpu.memory_space<vmem>>, vector<11x128xf32>
      tpu.vector_store %arg5[%c0_142, %c0_143], %158 {strides = array<i32>} : memref<11x128xf32, #tpu.memory_space<vmem>>, vector<11x128xf32>,
      %c0_144 = arith.constant 0 : index
      %c0_145 = arith.constant 0 : index
      %160 = tpu.strided_load %arg5[%c0_144, %c0_145] {strides = array<i32: 2, 1>} : memref<11x128xf32, #tpu.memory_space<vmem>>, vector<5x128xf32>
      %c1_146 = arith.constant 1 : index
      %c0_147 = arith.constant 0 : index
      %161 = tpu.strided_load %arg5[%c1_146, %c0_147] {strides = array<i32: 2, 1>} : memref<11x128xf32, #tpu.memory_space<vmem>>, vector<5x128xf32>
      %162 = arith.maximumf %160, %161 : vector<5x128xf32>
      %c0_148 = arith.constant 0 : index
      %163 = arith.index_cast %arg6 : i32 to index
      %c0_149 = arith.constant 0 : index
      %c0_150 = arith.constant 0 : index
      %164 = vector.load %arg4[%c0_148, %163, %c0_149, %c0_150] : memref<1x5x5x128xf32, #tpu.memory_space<vmem>>, vector<1x1x5x128xf32>
      %165 = vector.shape_cast %164 : vector<1x1x5x128xf32> to vector<5x128xf32>
      %166 = vector.shape_cast %162 : vector<5x128xf32> to vector<1x1x5x128xf32>
      tpu.vector_store %arg4[%c0_148, %163, %c0_149, %c0_150], %166 {strides = array<i32>} : memref<1x5x5x128xf32, #tpu.memory_space<vmem>>, vector<1x1x5x128xf32>,
    }
    %c5_i32_1 = arith.constant 5 : i32
    return
  }
  func.func @transform_0(%arg0: i32) -> (i32, i32, i32, i32) {
    %c0_i32 = arith.constant 0 : i32
    %c0_i32_0 = arith.constant 0 : i32
    %c0_i32_1 = arith.constant 0 : i32
    %c0_i32_2 = arith.constant 0 : i32
    return %arg0, %c0_i32, %c0_i32_0, %c0_i32_1 : i32, i32, i32, i32
  }
  func.func @transform_1(%arg0: i32) -> (i32, i32, i32) {
    %c0_i32 = arith.constant 0 : i32
    %c0_i32_0 = arith.constant 0 : i32
    %c0_i32_1 = arith.constant 0 : i32
    %c0_i32_2 = arith.constant 0 : i32
    return %c0_i32, %c0_i32_0, %c0_i32_1 : i32, i32, i32
  }
  func.func @transform_2(%arg0: i32) -> (i32, i32) {
    %c0_i32 = arith.constant 0 : i32
    %c0_i32_0 = arith.constant 0 : i32
    %c0_i32_1 = arith.constant 0 : i32
    return %c0_i32, %c0_i32_0 : i32, i32
  }
  func.func @transform_3(%arg0: i32) -> (i32, i32, i32, i32) {
    %c0_i32 = arith.constant 0 : i32
    %c0_i32_0 = arith.constant 0 : i32
    %c0_i32_1 = arith.constant 0 : i32
    %c0_i32_2 = arith.constant 0 : i32
    return %arg0, %c0_i32, %c0_i32_0, %c0_i32_1 : i32, i32, i32, i32
  }
}

module attributes {stable_mosaic.version = 11 : i64} {
  func.func @_conv3x3_relu_kernel(%arg0: i32, %arg1: memref<1x5x5x128xf32, #tpu.memory_space<vmem>>, %arg2: memref<9x128x128xf32, #tpu.memory_space<vmem>>, %arg3: memref<1x128xf32, #tpu.memory_space<vmem>>, %arg4: memref<1x3x3x128xf32, #tpu.memory_space<vmem>>) attributes {dimension_semantics = [#tpu.dimension_semantics<parallel>], iteration_bounds = array<i64: 2>, scalar_prefetch = 0 : i64, scratch_operands = 0 : i64, tpu.core_type = #tpu.core_type<tc>, window_params = [{transform_indices = @transform_0, window_bounds = array<i64: 1, 5, 5, 128>}, {pipeline_mode = #tpu.pipeline_mode<synchronous>, transform_indices = @transform_1, window_bounds = array<i64: 9, 128, 128>}, {pipeline_mode = #tpu.pipeline_mode<synchronous>, transform_indices = @transform_2, window_bounds = array<i64: 1, 128>}, {transform_indices = @transform_3, window_bounds = array<i64: 1, 3, 3, 128>}]} {
    %c0 = arith.constant 0 : index
    %c0_0 = arith.constant 0 : index
    %0 = vector.load %arg3[%c0, %c0_0] : memref<1x128xf32, #tpu.memory_space<vmem>>, vector<1x128xf32>
    %cst = arith.constant 0.000000e+00 : f32
    %1 = vector.broadcast %cst : f32 to vector<3x128xf32>
    %c0_1 = arith.constant 0 : index
    %c0_2 = arith.constant 0 : index
    %c0_3 = arith.constant 0 : index
    %c0_4 = arith.constant 0 : index
    %2 = vector.load %arg1[%c0_1, %c0_2, %c0_3, %c0_4] : memref<1x5x5x128xf32, #tpu.memory_space<vmem>>, vector<1x1x3x128xf32>
    %3 = vector.shape_cast %2 : vector<1x1x3x128xf32> to vector<3x128xf32>
    %c0_5 = arith.constant 0 : index
    %c0_6 = arith.constant 0 : index
    %c0_7 = arith.constant 0 : index
    %4 = vector.load %arg2[%c0_5, %c0_6, %c0_7] : memref<9x128x128xf32, #tpu.memory_space<vmem>>, vector<1x128x128xf32>
    %5 = vector.shape_cast %4 : vector<1x128x128xf32> to vector<128x128xf32>
    %cst_8 = arith.constant dense<0.000000e+00> : vector<3x128xf32>
    %6 = tpu.matmul %3, %5, %cst_8 {dimension_numbers = #tpu.dot_dimension_numbers<[1], [0], [0], [1], [0, 0, 1, 1], [], []>} : vector<3x128xf32>, vector<128x128xf32>, vector<3x128xf32> -> vector<3x128xf32>
    %7 = arith.addf %1, %6 : vector<3x128xf32>
    %c0_9 = arith.constant 0 : index
    %c0_10 = arith.constant 0 : index
    %c1 = arith.constant 1 : index
    %c0_11 = arith.constant 0 : index
    %8 = vector.load %arg1[%c0_9, %c0_10, %c1, %c0_11] : memref<1x5x5x128xf32, #tpu.memory_space<vmem>>, vector<1x1x3x128xf32>
    %9 = vector.shape_cast %8 : vector<1x1x3x128xf32> to vector<3x128xf32>
    %c1_12 = arith.constant 1 : index
    %c0_13 = arith.constant 0 : index
    %c0_14 = arith.constant 0 : index
    %10 = vector.load %arg2[%c1_12, %c0_13, %c0_14] : memref<9x128x128xf32, #tpu.memory_space<vmem>>, vector<1x128x128xf32>
    %11 = vector.shape_cast %10 : vector<1x128x128xf32> to vector<128x128xf32>
    %cst_15 = arith.constant dense<0.000000e+00> : vector<3x128xf32>
    %12 = tpu.matmul %9, %11, %cst_15 {dimension_numbers = #tpu.dot_dimension_numbers<[1], [0], [0], [1], [0, 0, 1, 1], [], []>} : vector<3x128xf32>, vector<128x128xf32>, vector<3x128xf32> -> vector<3x128xf32>
    %13 = arith.addf %7, %12 : vector<3x128xf32>
    %c0_16 = arith.constant 0 : index
    %c0_17 = arith.constant 0 : index
    %c2 = arith.constant 2 : index
    %c0_18 = arith.constant 0 : index
    %14 = vector.load %arg1[%c0_16, %c0_17, %c2, %c0_18] : memref<1x5x5x128xf32, #tpu.memory_space<vmem>>, vector<1x1x3x128xf32>
    %15 = vector.shape_cast %14 : vector<1x1x3x128xf32> to vector<3x128xf32>
    %c2_19 = arith.constant 2 : index
    %c0_20 = arith.constant 0 : index
    %c0_21 = arith.constant 0 : index
    %16 = vector.load %arg2[%c2_19, %c0_20, %c0_21] : memref<9x128x128xf32, #tpu.memory_space<vmem>>, vector<1x128x128xf32>
    %17 = vector.shape_cast %16 : vector<1x128x128xf32> to vector<128x128xf32>
    %cst_22 = arith.constant dense<0.000000e+00> : vector<3x128xf32>
    %18 = tpu.matmul %15, %17, %cst_22 {dimension_numbers = #tpu.dot_dimension_numbers<[1], [0], [0], [1], [0, 0, 1, 1], [], []>} : vector<3x128xf32>, vector<128x128xf32>, vector<3x128xf32> -> vector<3x128xf32>
    %19 = arith.addf %13, %18 : vector<3x128xf32>
    %c0_23 = arith.constant 0 : index
    %c1_24 = arith.constant 1 : index
    %c0_25 = arith.constant 0 : index
    %c0_26 = arith.constant 0 : index
    %20 = vector.load %arg1[%c0_23, %c1_24, %c0_25, %c0_26] : memref<1x5x5x128xf32, #tpu.memory_space<vmem>>, vector<1x1x3x128xf32>
    %21 = vector.shape_cast %20 : vector<1x1x3x128xf32> to vector<3x128xf32>
    %c3 = arith.constant 3 : index
    %c0_27 = arith.constant 0 : index
    %c0_28 = arith.constant 0 : index
    %22 = vector.load %arg2[%c3, %c0_27, %c0_28] : memref<9x128x128xf32, #tpu.memory_space<vmem>>, vector<1x128x128xf32>
    %23 = vector.shape_cast %22 : vector<1x128x128xf32> to vector<128x128xf32>
    %cst_29 = arith.constant dense<0.000000e+00> : vector<3x128xf32>
    %24 = tpu.matmul %21, %23, %cst_29 {dimension_numbers = #tpu.dot_dimension_numbers<[1], [0], [0], [1], [0, 0, 1, 1], [], []>} : vector<3x128xf32>, vector<128x128xf32>, vector<3x128xf32> -> vector<3x128xf32>
    %25 = arith.addf %19, %24 : vector<3x128xf32>
    %c0_30 = arith.constant 0 : index
    %c1_31 = arith.constant 1 : index
    %c1_32 = arith.constant 1 : index
    %c0_33 = arith.constant 0 : index
    %26 = vector.load %arg1[%c0_30, %c1_31, %c1_32, %c0_33] : memref<1x5x5x128xf32, #tpu.memory_space<vmem>>, vector<1x1x3x128xf32>
    %27 = vector.shape_cast %26 : vector<1x1x3x128xf32> to vector<3x128xf32>
    %c4 = arith.constant 4 : index
    %c0_34 = arith.constant 0 : index
    %c0_35 = arith.constant 0 : index
    %28 = vector.load %arg2[%c4, %c0_34, %c0_35] : memref<9x128x128xf32, #tpu.memory_space<vmem>>, vector<1x128x128xf32>
    %29 = vector.shape_cast %28 : vector<1x128x128xf32> to vector<128x128xf32>
    %cst_36 = arith.constant dense<0.000000e+00> : vector<3x128xf32>
    %30 = tpu.matmul %27, %29, %cst_36 {dimension_numbers = #tpu.dot_dimension_numbers<[1], [0], [0], [1], [0, 0, 1, 1], [], []>} : vector<3x128xf32>, vector<128x128xf32>, vector<3x128xf32> -> vector<3x128xf32>
    %31 = arith.addf %25, %30 : vector<3x128xf32>
    %c0_37 = arith.constant 0 : index
    %c1_38 = arith.constant 1 : index
    %c2_39 = arith.constant 2 : index
    %c0_40 = arith.constant 0 : index
    %32 = vector.load %arg1[%c0_37, %c1_38, %c2_39, %c0_40] : memref<1x5x5x128xf32, #tpu.memory_space<vmem>>, vector<1x1x3x128xf32>
    %33 = vector.shape_cast %32 : vector<1x1x3x128xf32> to vector<3x128xf32>
    %c5 = arith.constant 5 : index
    %c0_41 = arith.constant 0 : index
    %c0_42 = arith.constant 0 : index
    %34 = vector.load %arg2[%c5, %c0_41, %c0_42] : memref<9x128x128xf32, #tpu.memory_space<vmem>>, vector<1x128x128xf32>
    %35 = vector.shape_cast %34 : vector<1x128x128xf32> to vector<128x128xf32>
    %cst_43 = arith.constant dense<0.000000e+00> : vector<3x128xf32>
    %36 = tpu.matmul %33, %35, %cst_43 {dimension_numbers = #tpu.dot_dimension_numbers<[1], [0], [0], [1], [0, 0, 1, 1], [], []>} : vector<3x128xf32>, vector<128x128xf32>, vector<3x128xf32> -> vector<3x128xf32>
    %37 = arith.addf %31, %36 : vector<3x128xf32>
    %c0_44 = arith.constant 0 : index
    %c2_45 = arith.constant 2 : index
    %c0_46 = arith.constant 0 : index
    %c0_47 = arith.constant 0 : index
    %38 = vector.load %arg1[%c0_44, %c2_45, %c0_46, %c0_47] : memref<1x5x5x128xf32, #tpu.memory_space<vmem>>, vector<1x1x3x128xf32>
    %39 = vector.shape_cast %38 : vector<1x1x3x128xf32> to vector<3x128xf32>
    %c6 = arith.constant 6 : index
    %c0_48 = arith.constant 0 : index
    %c0_49 = arith.constant 0 : index
    %40 = vector.load %arg2[%c6, %c0_48, %c0_49] : memref<9x128x128xf32, #tpu.memory_space<vmem>>, vector<1x128x128xf32>
    %41 = vector.shape_cast %40 : vector<1x128x128xf32> to vector<128x128xf32>
    %cst_50 = arith.constant dense<0.000000e+00> : vector<3x128xf32>
    %42 = tpu.matmul %39, %41, %cst_50 {dimension_numbers = #tpu.dot_dimension_numbers<[1], [0], [0], [1], [0, 0, 1, 1], [], []>} : vector<3x128xf32>, vector<128x128xf32>, vector<3x128xf32> -> vector<3x128xf32>
    %43 = arith.addf %37, %42 : vector<3x128xf32>
    %c0_51 = arith.constant 0 : index
    %c2_52 = arith.constant 2 : index
    %c1_53 = arith.constant 1 : index
    %c0_54 = arith.constant 0 : index
    %44 = vector.load %arg1[%c0_51, %c2_52, %c1_53, %c0_54] : memref<1x5x5x128xf32, #tpu.memory_space<vmem>>, vector<1x1x3x128xf32>
    %45 = vector.shape_cast %44 : vector<1x1x3x128xf32> to vector<3x128xf32>
    %c7 = arith.constant 7 : index
    %c0_55 = arith.constant 0 : index
    %c0_56 = arith.constant 0 : index
    %46 = vector.load %arg2[%c7, %c0_55, %c0_56] : memref<9x128x128xf32, #tpu.memory_space<vmem>>, vector<1x128x128xf32>
    %47 = vector.shape_cast %46 : vector<1x128x128xf32> to vector<128x128xf32>
    %cst_57 = arith.constant dense<0.000000e+00> : vector<3x128xf32>
    %48 = tpu.matmul %45, %47, %cst_57 {dimension_numbers = #tpu.dot_dimension_numbers<[1], [0], [0], [1], [0, 0, 1, 1], [], []>} : vector<3x128xf32>, vector<128x128xf32>, vector<3x128xf32> -> vector<3x128xf32>
    %49 = arith.addf %43, %48 : vector<3x128xf32>
    %c0_58 = arith.constant 0 : index
    %c2_59 = arith.constant 2 : index
    %c2_60 = arith.constant 2 : index
    %c0_61 = arith.constant 0 : index
    %50 = vector.load %arg1[%c0_58, %c2_59, %c2_60, %c0_61] : memref<1x5x5x128xf32, #tpu.memory_space<vmem>>, vector<1x1x3x128xf32>
    %51 = vector.shape_cast %50 : vector<1x1x3x128xf32> to vector<3x128xf32>
    %c8 = arith.constant 8 : index
    %c0_62 = arith.constant 0 : index
    %c0_63 = arith.constant 0 : index
    %52 = vector.load %arg2[%c8, %c0_62, %c0_63] : memref<9x128x128xf32, #tpu.memory_space<vmem>>, vector<1x128x128xf32>
    %53 = vector.shape_cast %52 : vector<1x128x128xf32> to vector<128x128xf32>
    %cst_64 = arith.constant dense<0.000000e+00> : vector<3x128xf32>
    %54 = tpu.matmul %51, %53, %cst_64 {dimension_numbers = #tpu.dot_dimension_numbers<[1], [0], [0], [1], [0, 0, 1, 1], [], []>} : vector<3x128xf32>, vector<128x128xf32>, vector<3x128xf32> -> vector<3x128xf32>
    %55 = arith.addf %49, %54 : vector<3x128xf32>
    %56 = vector.broadcast %0 : vector<1x128xf32> to vector<3x128xf32>
    %57 = arith.addf %55, %56 : vector<3x128xf32>
    %cst_65 = arith.constant 0.000000e+00 : f32
    %58 = vector.broadcast %cst_65 : f32 to vector<3x128xf32>
    %59 = arith.maximumf %57, %58 : vector<3x128xf32>
    %c0_66 = arith.constant 0 : index
    %c0_67 = arith.constant 0 : index
    %c0_68 = arith.constant 0 : index
    %c0_69 = arith.constant 0 : index
    %60 = vector.load %arg4[%c0_66, %c0_67, %c0_68, %c0_69] : memref<1x3x3x128xf32, #tpu.memory_space<vmem>>, vector<1x1x3x128xf32>
    %61 = vector.shape_cast %60 : vector<1x1x3x128xf32> to vector<3x128xf32>
    %62 = vector.shape_cast %59 : vector<3x128xf32> to vector<1x1x3x128xf32>
    tpu.vector_store %arg4[%c0_66, %c0_67, %c0_68, %c0_69], %62 {strides = array<i32>} : memref<1x3x3x128xf32, #tpu.memory_space<vmem>>, vector<1x1x3x128xf32>,
    %cst_70 = arith.constant 0.000000e+00 : f32
    %63 = vector.broadcast %cst_70 : f32 to vector<3x128xf32>
    %c0_71 = arith.constant 0 : index
    %c1_72 = arith.constant 1 : index
    %c0_73 = arith.constant 0 : index
    %c0_74 = arith.constant 0 : index
    %64 = vector.load %arg1[%c0_71, %c1_72, %c0_73, %c0_74] : memref<1x5x5x128xf32, #tpu.memory_space<vmem>>, vector<1x1x3x128xf32>
    %65 = vector.shape_cast %64 : vector<1x1x3x128xf32> to vector<3x128xf32>
    %c0_75 = arith.constant 0 : index
    %c0_76 = arith.constant 0 : index
    %c0_77 = arith.constant 0 : index
    %66 = vector.load %arg2[%c0_75, %c0_76, %c0_77] : memref<9x128x128xf32, #tpu.memory_space<vmem>>, vector<1x128x128xf32>
    %67 = vector.shape_cast %66 : vector<1x128x128xf32> to vector<128x128xf32>
    %cst_78 = arith.constant dense<0.000000e+00> : vector<3x128xf32>
    %68 = tpu.matmul %65, %67, %cst_78 {dimension_numbers = #tpu.dot_dimension_numbers<[1], [0], [0], [1], [0, 0, 1, 1], [], []>} : vector<3x128xf32>, vector<128x128xf32>, vector<3x128xf32> -> vector<3x128xf32>
    %69 = arith.addf %63, %68 : vector<3x128xf32>
    %c0_79 = arith.constant 0 : index
    %c1_80 = arith.constant 1 : index
    %c1_81 = arith.constant 1 : index
    %c0_82 = arith.constant 0 : index
    %70 = vector.load %arg1[%c0_79, %c1_80, %c1_81, %c0_82] : memref<1x5x5x128xf32, #tpu.memory_space<vmem>>, vector<1x1x3x128xf32>
    %71 = vector.shape_cast %70 : vector<1x1x3x128xf32> to vector<3x128xf32>
    %c1_83 = arith.constant 1 : index
    %c0_84 = arith.constant 0 : index
    %c0_85 = arith.constant 0 : index
    %72 = vector.load %arg2[%c1_83, %c0_84, %c0_85] : memref<9x128x128xf32, #tpu.memory_space<vmem>>, vector<1x128x128xf32>
    %73 = vector.shape_cast %72 : vector<1x128x128xf32> to vector<128x128xf32>
    %cst_86 = arith.constant dense<0.000000e+00> : vector<3x128xf32>
    %74 = tpu.matmul %71, %73, %cst_86 {dimension_numbers = #tpu.dot_dimension_numbers<[1], [0], [0], [1], [0, 0, 1, 1], [], []>} : vector<3x128xf32>, vector<128x128xf32>, vector<3x128xf32> -> vector<3x128xf32>
    %75 = arith.addf %69, %74 : vector<3x128xf32>
    %c0_87 = arith.constant 0 : index
    %c1_88 = arith.constant 1 : index
    %c2_89 = arith.constant 2 : index
    %c0_90 = arith.constant 0 : index
    %76 = vector.load %arg1[%c0_87, %c1_88, %c2_89, %c0_90] : memref<1x5x5x128xf32, #tpu.memory_space<vmem>>, vector<1x1x3x128xf32>
    %77 = vector.shape_cast %76 : vector<1x1x3x128xf32> to vector<3x128xf32>
    %c2_91 = arith.constant 2 : index
    %c0_92 = arith.constant 0 : index
    %c0_93 = arith.constant 0 : index
    %78 = vector.load %arg2[%c2_91, %c0_92, %c0_93] : memref<9x128x128xf32, #tpu.memory_space<vmem>>, vector<1x128x128xf32>
    %79 = vector.shape_cast %78 : vector<1x128x128xf32> to vector<128x128xf32>
    %cst_94 = arith.constant dense<0.000000e+00> : vector<3x128xf32>
    %80 = tpu.matmul %77, %79, %cst_94 {dimension_numbers = #tpu.dot_dimension_numbers<[1], [0], [0], [1], [0, 0, 1, 1], [], []>} : vector<3x128xf32>, vector<128x128xf32>, vector<3x128xf32> -> vector<3x128xf32>
    %81 = arith.addf %75, %80 : vector<3x128xf32>
    %c0_95 = arith.constant 0 : index
    %c2_96 = arith.constant 2 : index
    %c0_97 = arith.constant 0 : index
    %c0_98 = arith.constant 0 : index
    %82 = vector.load %arg1[%c0_95, %c2_96, %c0_97, %c0_98] : memref<1x5x5x128xf32, #tpu.memory_space<vmem>>, vector<1x1x3x128xf32>
    %83 = vector.shape_cast %82 : vector<1x1x3x128xf32> to vector<3x128xf32>
    %c3_99 = arith.constant 3 : index
    %c0_100 = arith.constant 0 : index
    %c0_101 = arith.constant 0 : index
    %84 = vector.load %arg2[%c3_99, %c0_100, %c0_101] : memref<9x128x128xf32, #tpu.memory_space<vmem>>, vector<1x128x128xf32>
    %85 = vector.shape_cast %84 : vector<1x128x128xf32> to vector<128x128xf32>
    %cst_102 = arith.constant dense<0.000000e+00> : vector<3x128xf32>
    %86 = tpu.matmul %83, %85, %cst_102 {dimension_numbers = #tpu.dot_dimension_numbers<[1], [0], [0], [1], [0, 0, 1, 1], [], []>} : vector<3x128xf32>, vector<128x128xf32>, vector<3x128xf32> -> vector<3x128xf32>
    %87 = arith.addf %81, %86 : vector<3x128xf32>
    %c0_103 = arith.constant 0 : index
    %c2_104 = arith.constant 2 : index
    %c1_105 = arith.constant 1 : index
    %c0_106 = arith.constant 0 : index
    %88 = vector.load %arg1[%c0_103, %c2_104, %c1_105, %c0_106] : memref<1x5x5x128xf32, #tpu.memory_space<vmem>>, vector<1x1x3x128xf32>
    %89 = vector.shape_cast %88 : vector<1x1x3x128xf32> to vector<3x128xf32>
    %c4_107 = arith.constant 4 : index
    %c0_108 = arith.constant 0 : index
    %c0_109 = arith.constant 0 : index
    %90 = vector.load %arg2[%c4_107, %c0_108, %c0_109] : memref<9x128x128xf32, #tpu.memory_space<vmem>>, vector<1x128x128xf32>
    %91 = vector.shape_cast %90 : vector<1x128x128xf32> to vector<128x128xf32>
    %cst_110 = arith.constant dense<0.000000e+00> : vector<3x128xf32>
    %92 = tpu.matmul %89, %91, %cst_110 {dimension_numbers = #tpu.dot_dimension_numbers<[1], [0], [0], [1], [0, 0, 1, 1], [], []>} : vector<3x128xf32>, vector<128x128xf32>, vector<3x128xf32> -> vector<3x128xf32>
    %93 = arith.addf %87, %92 : vector<3x128xf32>
    %c0_111 = arith.constant 0 : index
    %c2_112 = arith.constant 2 : index
    %c2_113 = arith.constant 2 : index
    %c0_114 = arith.constant 0 : index
    %94 = vector.load %arg1[%c0_111, %c2_112, %c2_113, %c0_114] : memref<1x5x5x128xf32, #tpu.memory_space<vmem>>, vector<1x1x3x128xf32>
    %95 = vector.shape_cast %94 : vector<1x1x3x128xf32> to vector<3x128xf32>
    %c5_115 = arith.constant 5 : index
    %c0_116 = arith.constant 0 : index
    %c0_117 = arith.constant 0 : index
    %96 = vector.load %arg2[%c5_115, %c0_116, %c0_117] : memref<9x128x128xf32, #tpu.memory_space<vmem>>, vector<1x128x128xf32>
    %97 = vector.shape_cast %96 : vector<1x128x128xf32> to vector<128x128xf32>
    %cst_118 = arith.constant dense<0.000000e+00> : vector<3x128xf32>
    %98 = tpu.matmul %95, %97, %cst_118 {dimension_numbers = #tpu.dot_dimension_numbers<[1], [0], [0], [1], [0, 0, 1, 1], [], []>} : vector<3x128xf32>, vector<128x128xf32>, vector<3x128xf32> -> vector<3x128xf32>
    %99 = arith.addf %93, %98 : vector<3x128xf32>
    %c0_119 = arith.constant 0 : index
    %c3_120 = arith.constant 3 : index
    %c0_121 = arith.constant 0 : index
    %c0_122 = arith.constant 0 : index
    %100 = vector.load %arg1[%c0_119, %c3_120, %c0_121, %c0_122] : memref<1x5x5x128xf32, #tpu.memory_space<vmem>>, vector<1x1x3x128xf32>
    %101 = vector.shape_cast %100 : vector<1x1x3x128xf32> to vector<3x128xf32>
    %c6_123 = arith.constant 6 : index
    %c0_124 = arith.constant 0 : index
    %c0_125 = arith.constant 0 : index
    %102 = vector.load %arg2[%c6_123, %c0_124, %c0_125] : memref<9x128x128xf32, #tpu.memory_space<vmem>>, vector<1x128x128xf32>
    %103 = vector.shape_cast %102 : vector<1x128x128xf32> to vector<128x128xf32>
    %cst_126 = arith.constant dense<0.000000e+00> : vector<3x128xf32>
    %104 = tpu.matmul %101, %103, %cst_126 {dimension_numbers = #tpu.dot_dimension_numbers<[1], [0], [0], [1], [0, 0, 1, 1], [], []>} : vector<3x128xf32>, vector<128x128xf32>, vector<3x128xf32> -> vector<3x128xf32>
    %105 = arith.addf %99, %104 : vector<3x128xf32>
    %c0_127 = arith.constant 0 : index
    %c3_128 = arith.constant 3 : index
    %c1_129 = arith.constant 1 : index
    %c0_130 = arith.constant 0 : index
    %106 = vector.load %arg1[%c0_127, %c3_128, %c1_129, %c0_130] : memref<1x5x5x128xf32, #tpu.memory_space<vmem>>, vector<1x1x3x128xf32>
    %107 = vector.shape_cast %106 : vector<1x1x3x128xf32> to vector<3x128xf32>
    %c7_131 = arith.constant 7 : index
    %c0_132 = arith.constant 0 : index
    %c0_133 = arith.constant 0 : index
    %108 = vector.load %arg2[%c7_131, %c0_132, %c0_133] : memref<9x128x128xf32, #tpu.memory_space<vmem>>, vector<1x128x128xf32>
    %109 = vector.shape_cast %108 : vector<1x128x128xf32> to vector<128x128xf32>
    %cst_134 = arith.constant dense<0.000000e+00> : vector<3x128xf32>
    %110 = tpu.matmul %107, %109, %cst_134 {dimension_numbers = #tpu.dot_dimension_numbers<[1], [0], [0], [1], [0, 0, 1, 1], [], []>} : vector<3x128xf32>, vector<128x128xf32>, vector<3x128xf32> -> vector<3x128xf32>
    %111 = arith.addf %105, %110 : vector<3x128xf32>
    %c0_135 = arith.constant 0 : index
    %c3_136 = arith.constant 3 : index
    %c2_137 = arith.constant 2 : index
    %c0_138 = arith.constant 0 : index
    %112 = vector.load %arg1[%c0_135, %c3_136, %c2_137, %c0_138] : memref<1x5x5x128xf32, #tpu.memory_space<vmem>>, vector<1x1x3x128xf32>
    %113 = vector.shape_cast %112 : vector<1x1x3x128xf32> to vector<3x128xf32>
    %c8_139 = arith.constant 8 : index
    %c0_140 = arith.constant 0 : index
    %c0_141 = arith.constant 0 : index
    %114 = vector.load %arg2[%c8_139, %c0_140, %c0_141] : memref<9x128x128xf32, #tpu.memory_space<vmem>>, vector<1x128x128xf32>
    %115 = vector.shape_cast %114 : vector<1x128x128xf32> to vector<128x128xf32>
    %cst_142 = arith.constant dense<0.000000e+00> : vector<3x128xf32>
    %116 = tpu.matmul %113, %115, %cst_142 {dimension_numbers = #tpu.dot_dimension_numbers<[1], [0], [0], [1], [0, 0, 1, 1], [], []>} : vector<3x128xf32>, vector<128x128xf32>, vector<3x128xf32> -> vector<3x128xf32>
    %117 = arith.addf %111, %116 : vector<3x128xf32>
    %118 = vector.broadcast %0 : vector<1x128xf32> to vector<3x128xf32>
    %119 = arith.addf %117, %118 : vector<3x128xf32>
    %cst_143 = arith.constant 0.000000e+00 : f32
    %120 = vector.broadcast %cst_143 : f32 to vector<3x128xf32>
    %121 = arith.maximumf %119, %120 : vector<3x128xf32>
    %c0_144 = arith.constant 0 : index
    %c1_145 = arith.constant 1 : index
    %c0_146 = arith.constant 0 : index
    %c0_147 = arith.constant 0 : index
    %122 = vector.load %arg4[%c0_144, %c1_145, %c0_146, %c0_147] : memref<1x3x3x128xf32, #tpu.memory_space<vmem>>, vector<1x1x3x128xf32>
    %123 = vector.shape_cast %122 : vector<1x1x3x128xf32> to vector<3x128xf32>
    %124 = vector.shape_cast %121 : vector<3x128xf32> to vector<1x1x3x128xf32>
    tpu.vector_store %arg4[%c0_144, %c1_145, %c0_146, %c0_147], %124 {strides = array<i32>} : memref<1x3x3x128xf32, #tpu.memory_space<vmem>>, vector<1x1x3x128xf32>,
    %cst_148 = arith.constant 0.000000e+00 : f32
    %125 = vector.broadcast %cst_148 : f32 to vector<3x128xf32>
    %c0_149 = arith.constant 0 : index
    %c2_150 = arith.constant 2 : index
    %c0_151 = arith.constant 0 : index
    %c0_152 = arith.constant 0 : index
    %126 = vector.load %arg1[%c0_149, %c2_150, %c0_151, %c0_152] : memref<1x5x5x128xf32, #tpu.memory_space<vmem>>, vector<1x1x3x128xf32>
    %127 = vector.shape_cast %126 : vector<1x1x3x128xf32> to vector<3x128xf32>
    %c0_153 = arith.constant 0 : index
    %c0_154 = arith.constant 0 : index
    %c0_155 = arith.constant 0 : index
    %128 = vector.load %arg2[%c0_153, %c0_154, %c0_155] : memref<9x128x128xf32, #tpu.memory_space<vmem>>, vector<1x128x128xf32>
    %129 = vector.shape_cast %128 : vector<1x128x128xf32> to vector<128x128xf32>
    %cst_156 = arith.constant dense<0.000000e+00> : vector<3x128xf32>
    %130 = tpu.matmul %127, %129, %cst_156 {dimension_numbers = #tpu.dot_dimension_numbers<[1], [0], [0], [1], [0, 0, 1, 1], [], []>} : vector<3x128xf32>, vector<128x128xf32>, vector<3x128xf32> -> vector<3x128xf32>
    %131 = arith.addf %125, %130 : vector<3x128xf32>
    %c0_157 = arith.constant 0 : index
    %c2_158 = arith.constant 2 : index
    %c1_159 = arith.constant 1 : index
    %c0_160 = arith.constant 0 : index
    %132 = vector.load %arg1[%c0_157, %c2_158, %c1_159, %c0_160] : memref<1x5x5x128xf32, #tpu.memory_space<vmem>>, vector<1x1x3x128xf32>
    %133 = vector.shape_cast %132 : vector<1x1x3x128xf32> to vector<3x128xf32>
    %c1_161 = arith.constant 1 : index
    %c0_162 = arith.constant 0 : index
    %c0_163 = arith.constant 0 : index
    %134 = vector.load %arg2[%c1_161, %c0_162, %c0_163] : memref<9x128x128xf32, #tpu.memory_space<vmem>>, vector<1x128x128xf32>
    %135 = vector.shape_cast %134 : vector<1x128x128xf32> to vector<128x128xf32>
    %cst_164 = arith.constant dense<0.000000e+00> : vector<3x128xf32>
    %136 = tpu.matmul %133, %135, %cst_164 {dimension_numbers = #tpu.dot_dimension_numbers<[1], [0], [0], [1], [0, 0, 1, 1], [], []>} : vector<3x128xf32>, vector<128x128xf32>, vector<3x128xf32> -> vector<3x128xf32>
    %137 = arith.addf %131, %136 : vector<3x128xf32>
    %c0_165 = arith.constant 0 : index
    %c2_166 = arith.constant 2 : index
    %c2_167 = arith.constant 2 : index
    %c0_168 = arith.constant 0 : index
    %138 = vector.load %arg1[%c0_165, %c2_166, %c2_167, %c0_168] : memref<1x5x5x128xf32, #tpu.memory_space<vmem>>, vector<1x1x3x128xf32>
    %139 = vector.shape_cast %138 : vector<1x1x3x128xf32> to vector<3x128xf32>
    %c2_169 = arith.constant 2 : index
    %c0_170 = arith.constant 0 : index
    %c0_171 = arith.constant 0 : index
    %140 = vector.load %arg2[%c2_169, %c0_170, %c0_171] : memref<9x128x128xf32, #tpu.memory_space<vmem>>, vector<1x128x128xf32>
    %141 = vector.shape_cast %140 : vector<1x128x128xf32> to vector<128x128xf32>
    %cst_172 = arith.constant dense<0.000000e+00> : vector<3x128xf32>
    %142 = tpu.matmul %139, %141, %cst_172 {dimension_numbers = #tpu.dot_dimension_numbers<[1], [0], [0], [1], [0, 0, 1, 1], [], []>} : vector<3x128xf32>, vector<128x128xf32>, vector<3x128xf32> -> vector<3x128xf32>
    %143 = arith.addf %137, %142 : vector<3x128xf32>
    %c0_173 = arith.constant 0 : index
    %c3_174 = arith.constant 3 : index
    %c0_175 = arith.constant 0 : index
    %c0_176 = arith.constant 0 : index
    %144 = vector.load %arg1[%c0_173, %c3_174, %c0_175, %c0_176] : memref<1x5x5x128xf32, #tpu.memory_space<vmem>>, vector<1x1x3x128xf32>
    %145 = vector.shape_cast %144 : vector<1x1x3x128xf32> to vector<3x128xf32>
    %c3_177 = arith.constant 3 : index
    %c0_178 = arith.constant 0 : index
    %c0_179 = arith.constant 0 : index
    %146 = vector.load %arg2[%c3_177, %c0_178, %c0_179] : memref<9x128x128xf32, #tpu.memory_space<vmem>>, vector<1x128x128xf32>
    %147 = vector.shape_cast %146 : vector<1x128x128xf32> to vector<128x128xf32>
    %cst_180 = arith.constant dense<0.000000e+00> : vector<3x128xf32>
    %148 = tpu.matmul %145, %147, %cst_180 {dimension_numbers = #tpu.dot_dimension_numbers<[1], [0], [0], [1], [0, 0, 1, 1], [], []>} : vector<3x128xf32>, vector<128x128xf32>, vector<3x128xf32> -> vector<3x128xf32>
    %149 = arith.addf %143, %148 : vector<3x128xf32>
    %c0_181 = arith.constant 0 : index
    %c3_182 = arith.constant 3 : index
    %c1_183 = arith.constant 1 : index
    %c0_184 = arith.constant 0 : index
    %150 = vector.load %arg1[%c0_181, %c3_182, %c1_183, %c0_184] : memref<1x5x5x128xf32, #tpu.memory_space<vmem>>, vector<1x1x3x128xf32>
    %151 = vector.shape_cast %150 : vector<1x1x3x128xf32> to vector<3x128xf32>
    %c4_185 = arith.constant 4 : index
    %c0_186 = arith.constant 0 : index
    %c0_187 = arith.constant 0 : index
    %152 = vector.load %arg2[%c4_185, %c0_186, %c0_187] : memref<9x128x128xf32, #tpu.memory_space<vmem>>, vector<1x128x128xf32>
    %153 = vector.shape_cast %152 : vector<1x128x128xf32> to vector<128x128xf32>
    %cst_188 = arith.constant dense<0.000000e+00> : vector<3x128xf32>
    %154 = tpu.matmul %151, %153, %cst_188 {dimension_numbers = #tpu.dot_dimension_numbers<[1], [0], [0], [1], [0, 0, 1, 1], [], []>} : vector<3x128xf32>, vector<128x128xf32>, vector<3x128xf32> -> vector<3x128xf32>
    %155 = arith.addf %149, %154 : vector<3x128xf32>
    %c0_189 = arith.constant 0 : index
    %c3_190 = arith.constant 3 : index
    %c2_191 = arith.constant 2 : index
    %c0_192 = arith.constant 0 : index
    %156 = vector.load %arg1[%c0_189, %c3_190, %c2_191, %c0_192] : memref<1x5x5x128xf32, #tpu.memory_space<vmem>>, vector<1x1x3x128xf32>
    %157 = vector.shape_cast %156 : vector<1x1x3x128xf32> to vector<3x128xf32>
    %c5_193 = arith.constant 5 : index
    %c0_194 = arith.constant 0 : index
    %c0_195 = arith.constant 0 : index
    %158 = vector.load %arg2[%c5_193, %c0_194, %c0_195] : memref<9x128x128xf32, #tpu.memory_space<vmem>>, vector<1x128x128xf32>
    %159 = vector.shape_cast %158 : vector<1x128x128xf32> to vector<128x128xf32>
    %cst_196 = arith.constant dense<0.000000e+00> : vector<3x128xf32>
    %160 = tpu.matmul %157, %159, %cst_196 {dimension_numbers = #tpu.dot_dimension_numbers<[1], [0], [0], [1], [0, 0, 1, 1], [], []>} : vector<3x128xf32>, vector<128x128xf32>, vector<3x128xf32> -> vector<3x128xf32>
    %161 = arith.addf %155, %160 : vector<3x128xf32>
    %c0_197 = arith.constant 0 : index
    %c4_198 = arith.constant 4 : index
    %c0_199 = arith.constant 0 : index
    %c0_200 = arith.constant 0 : index
    %162 = vector.load %arg1[%c0_197, %c4_198, %c0_199, %c0_200] : memref<1x5x5x128xf32, #tpu.memory_space<vmem>>, vector<1x1x3x128xf32>
    %163 = vector.shape_cast %162 : vector<1x1x3x128xf32> to vector<3x128xf32>
    %c6_201 = arith.constant 6 : index
    %c0_202 = arith.constant 0 : index
    %c0_203 = arith.constant 0 : index
    %164 = vector.load %arg2[%c6_201, %c0_202, %c0_203] : memref<9x128x128xf32, #tpu.memory_space<vmem>>, vector<1x128x128xf32>
    %165 = vector.shape_cast %164 : vector<1x128x128xf32> to vector<128x128xf32>
    %cst_204 = arith.constant dense<0.000000e+00> : vector<3x128xf32>
    %166 = tpu.matmul %163, %165, %cst_204 {dimension_numbers = #tpu.dot_dimension_numbers<[1], [0], [0], [1], [0, 0, 1, 1], [], []>} : vector<3x128xf32>, vector<128x128xf32>, vector<3x128xf32> -> vector<3x128xf32>
    %167 = arith.addf %161, %166 : vector<3x128xf32>
    %c0_205 = arith.constant 0 : index
    %c4_206 = arith.constant 4 : index
    %c1_207 = arith.constant 1 : index
    %c0_208 = arith.constant 0 : index
    %168 = vector.load %arg1[%c0_205, %c4_206, %c1_207, %c0_208] : memref<1x5x5x128xf32, #tpu.memory_space<vmem>>, vector<1x1x3x128xf32>
    %169 = vector.shape_cast %168 : vector<1x1x3x128xf32> to vector<3x128xf32>
    %c7_209 = arith.constant 7 : index
    %c0_210 = arith.constant 0 : index
    %c0_211 = arith.constant 0 : index
    %170 = vector.load %arg2[%c7_209, %c0_210, %c0_211] : memref<9x128x128xf32, #tpu.memory_space<vmem>>, vector<1x128x128xf32>
    %171 = vector.shape_cast %170 : vector<1x128x128xf32> to vector<128x128xf32>
    %cst_212 = arith.constant dense<0.000000e+00> : vector<3x128xf32>
    %172 = tpu.matmul %169, %171, %cst_212 {dimension_numbers = #tpu.dot_dimension_numbers<[1], [0], [0], [1], [0, 0, 1, 1], [], []>} : vector<3x128xf32>, vector<128x128xf32>, vector<3x128xf32> -> vector<3x128xf32>
    %173 = arith.addf %167, %172 : vector<3x128xf32>
    %c0_213 = arith.constant 0 : index
    %c4_214 = arith.constant 4 : index
    %c2_215 = arith.constant 2 : index
    %c0_216 = arith.constant 0 : index
    %174 = vector.load %arg1[%c0_213, %c4_214, %c2_215, %c0_216] : memref<1x5x5x128xf32, #tpu.memory_space<vmem>>, vector<1x1x3x128xf32>
    %175 = vector.shape_cast %174 : vector<1x1x3x128xf32> to vector<3x128xf32>
    %c8_217 = arith.constant 8 : index
    %c0_218 = arith.constant 0 : index
    %c0_219 = arith.constant 0 : index
    %176 = vector.load %arg2[%c8_217, %c0_218, %c0_219] : memref<9x128x128xf32, #tpu.memory_space<vmem>>, vector<1x128x128xf32>
    %177 = vector.shape_cast %176 : vector<1x128x128xf32> to vector<128x128xf32>
    %cst_220 = arith.constant dense<0.000000e+00> : vector<3x128xf32>
    %178 = tpu.matmul %175, %177, %cst_220 {dimension_numbers = #tpu.dot_dimension_numbers<[1], [0], [0], [1], [0, 0, 1, 1], [], []>} : vector<3x128xf32>, vector<128x128xf32>, vector<3x128xf32> -> vector<3x128xf32>
    %179 = arith.addf %173, %178 : vector<3x128xf32>
    %180 = vector.broadcast %0 : vector<1x128xf32> to vector<3x128xf32>
    %181 = arith.addf %179, %180 : vector<3x128xf32>
    %cst_221 = arith.constant 0.000000e+00 : f32
    %182 = vector.broadcast %cst_221 : f32 to vector<3x128xf32>
    %183 = arith.maximumf %181, %182 : vector<3x128xf32>
    %c0_222 = arith.constant 0 : index
    %c2_223 = arith.constant 2 : index
    %c0_224 = arith.constant 0 : index
    %c0_225 = arith.constant 0 : index
    %184 = vector.load %arg4[%c0_222, %c2_223, %c0_224, %c0_225] : memref<1x3x3x128xf32, #tpu.memory_space<vmem>>, vector<1x1x3x128xf32>
    %185 = vector.shape_cast %184 : vector<1x1x3x128xf32> to vector<3x128xf32>
    %186 = vector.shape_cast %183 : vector<3x128xf32> to vector<1x1x3x128xf32>
    tpu.vector_store %arg4[%c0_222, %c2_223, %c0_224, %c0_225], %186 {strides = array<i32>} : memref<1x3x3x128xf32, #tpu.memory_space<vmem>>, vector<1x1x3x128xf32>,
    return
  }
  func.func @transform_0(%arg0: i32) -> (i32, i32, i32, i32) {
    %c0_i32 = arith.constant 0 : i32
    %c0_i32_0 = arith.constant 0 : i32
    %c0_i32_1 = arith.constant 0 : i32
    %c0_i32_2 = arith.constant 0 : i32
    return %arg0, %c0_i32, %c0_i32_0, %c0_i32_1 : i32, i32, i32, i32
  }
  func.func @transform_1(%arg0: i32) -> (i32, i32, i32) {
    %c0_i32 = arith.constant 0 : i32
    %c0_i32_0 = arith.constant 0 : i32
    %c0_i32_1 = arith.constant 0 : i32
    %c0_i32_2 = arith.constant 0 : i32
    return %c0_i32, %c0_i32_0, %c0_i32_1 : i32, i32, i32
  }
  func.func @transform_2(%arg0: i32) -> (i32, i32) {
    %c0_i32 = arith.constant 0 : i32
    %c0_i32_0 = arith.constant 0 : i32
    %c0_i32_1 = arith.constant 0 : i32
    return %c0_i32, %c0_i32_0 : i32, i32
  }
  func.func @transform_3(%arg0: i32) -> (i32, i32, i32, i32) {
    %c0_i32 = arith.constant 0 : i32
    %c0_i32_0 = arith.constant 0 : i32
    %c0_i32_1 = arith.constant 0 : i32
    %c0_i32_2 = arith.constant 0 : i32
    return %arg0, %c0_i32, %c0_i32_0, %c0_i32_1 : i32, i32, i32, i32
  }
}

module attributes {stable_mosaic.version = 11 : i64} {
  func.func @_fc_fused_kernel(%arg0: i32, %arg1: memref<8x1152xf32, #tpu.memory_space<vmem>>, %arg2: memref<1152x128xf32, #tpu.memory_space<vmem>>, %arg3: memref<1x128xf32, #tpu.memory_space<vmem>>, %arg4: memref<128x128xf32, #tpu.memory_space<vmem>>, %arg5: memref<1x128xf32, #tpu.memory_space<vmem>>, %arg6: memref<8x128xf32, #tpu.memory_space<vmem>>) attributes {dimension_semantics = [#tpu.dimension_semantics<parallel>], iteration_bounds = array<i64: 1>, scalar_prefetch = 0 : i64, scratch_operands = 0 : i64, tpu.core_type = #tpu.core_type<tc>, window_params = [{transform_indices = @transform_0, window_bounds = array<i64: 8, 1152>}, {pipeline_mode = #tpu.pipeline_mode<synchronous>, transform_indices = @transform_1, window_bounds = array<i64: 1152, 128>}, {pipeline_mode = #tpu.pipeline_mode<synchronous>, transform_indices = @transform_2, window_bounds = array<i64: 1, 128>}, {pipeline_mode = #tpu.pipeline_mode<synchronous>, transform_indices = @transform_3, window_bounds = array<i64: 128, 128>}, {pipeline_mode = #tpu.pipeline_mode<synchronous>, transform_indices = @transform_4, window_bounds = array<i64: 1, 128>}, {transform_indices = @transform_5, window_bounds = array<i64: 8, 128>}]} {
    %c0 = arith.constant 0 : index
    %c0_0 = arith.constant 0 : index
    %0 = vector.load %arg1[%c0, %c0_0] : memref<8x1152xf32, #tpu.memory_space<vmem>>, vector<8x1152xf32>
    %c0_1 = arith.constant 0 : index
    %c0_2 = arith.constant 0 : index
    %1 = vector.load %arg2[%c0_1, %c0_2] : memref<1152x128xf32, #tpu.memory_space<vmem>>, vector<1152x128xf32>
    %cst = arith.constant dense<0.000000e+00> : vector<8x128xf32>
    %2 = tpu.matmul %0, %1, %cst {dimension_numbers = #tpu.dot_dimension_numbers<[1], [0], [0], [1], [0, 0, 1, 1], [], []>} : vector<8x1152xf32>, vector<1152x128xf32>, vector<8x128xf32> -> vector<8x128xf32>
    %c0_3 = arith.constant 0 : index
    %c0_4 = arith.constant 0 : index
    %3 = vector.load %arg3[%c0_3, %c0_4] : memref<1x128xf32, #tpu.memory_space<vmem>>, vector<1x128xf32>
    %4 = vector.broadcast %3 : vector<1x128xf32> to vector<8x128xf32>
    %5 = arith.addf %2, %4 : vector<8x128xf32>
    %cst_5 = arith.constant 0.000000e+00 : f32
    %6 = vector.broadcast %cst_5 : f32 to vector<8x128xf32>
    %7 = arith.maximumf %5, %6 : vector<8x128xf32>
    %c0_6 = arith.constant 0 : index
    %c0_7 = arith.constant 0 : index
    %8 = vector.load %arg4[%c0_6, %c0_7] : memref<128x128xf32, #tpu.memory_space<vmem>>, vector<128x128xf32>
    %cst_8 = arith.constant dense<0.000000e+00> : vector<8x128xf32>
    %9 = tpu.matmul %7, %8, %cst_8 {dimension_numbers = #tpu.dot_dimension_numbers<[1], [0], [0], [1], [0, 0, 1, 1], [], []>} : vector<8x128xf32>, vector<128x128xf32>, vector<8x128xf32> -> vector<8x128xf32>
    %c0_9 = arith.constant 0 : index
    %c0_10 = arith.constant 0 : index
    %10 = vector.load %arg5[%c0_9, %c0_10] : memref<1x128xf32, #tpu.memory_space<vmem>>, vector<1x128xf32>
    %11 = vector.broadcast %10 : vector<1x128xf32> to vector<8x128xf32>
    %12 = arith.addf %9, %11 : vector<8x128xf32>
    %c0_11 = arith.constant 0 : index
    %c0_12 = arith.constant 0 : index
    %13 = vector.load %arg6[%c0_11, %c0_12] : memref<8x128xf32, #tpu.memory_space<vmem>>, vector<8x128xf32>
    tpu.vector_store %arg6[%c0_11, %c0_12], %12 {strides = array<i32>} : memref<8x128xf32, #tpu.memory_space<vmem>>, vector<8x128xf32>,
    return
  }
  func.func @transform_0(%arg0: i32) -> (i32, i32) {
    %c0_i32 = arith.constant 0 : i32
    %c0_i32_0 = arith.constant 0 : i32
    return %arg0, %c0_i32 : i32, i32
  }
  func.func @transform_1(%arg0: i32) -> (i32, i32) {
    %c0_i32 = arith.constant 0 : i32
    %c0_i32_0 = arith.constant 0 : i32
    %c0_i32_1 = arith.constant 0 : i32
    return %c0_i32, %c0_i32_0 : i32, i32
  }
  func.func @transform_2(%arg0: i32) -> (i32, i32) {
    %c0_i32 = arith.constant 0 : i32
    %c0_i32_0 = arith.constant 0 : i32
    %c0_i32_1 = arith.constant 0 : i32
    return %c0_i32, %c0_i32_0 : i32, i32
  }
  func.func @transform_3(%arg0: i32) -> (i32, i32) {
    %c0_i32 = arith.constant 0 : i32
    %c0_i32_0 = arith.constant 0 : i32
    %c0_i32_1 = arith.constant 0 : i32
    return %c0_i32, %c0_i32_0 : i32, i32
  }
  func.func @transform_4(%arg0: i32) -> (i32, i32) {
    %c0_i32 = arith.constant 0 : i32
    %c0_i32_0 = arith.constant 0 : i32
    %c0_i32_1 = arith.constant 0 : i32
    return %c0_i32, %c0_i32_0 : i32, i32
  }
  func.func @transform_5(%arg0: i32) -> (i32, i32) {
    %c0_i32 = arith.constant 0 : i32
    %c0_i32_0 = arith.constant 0 : i32
    return %arg0, %c0_i32 : i32, i32
  }
}

</mosaic_0001>

<bundles_post_ra>
// kernel: mnist_cnn_forward.4
= control target key start
LH: loop header
LB: loop body
LE: loop exit
PB: predicated region body
PF: predicated region fallthrough
CT: control target
= control target key end

     0   :  { %s1288_s12 = smov 0   ;;  %s1512_s0 = inlined_call_operand.vmem [shape: f32[2,28,28,8], index: 0, kind: input, shape index: {}]   ;;  %s1513_s1 = inlined_call_operand.vmem [shape: f32[9,8,128], index: 1, kind: input, shape index: {}]   ;;  %s1514_s2 = inlined_call_operand.vmem [shape: f32[1,128], index: 2, kind: input, shape index: {}]   ;;  %s1515_s3 = inlined_call_operand.vmem [shape: f32[2,13,13,128], index: 3, kind: output, shape index: {}]  }
   0x1 LB: > { %s1094_s13 = sadd.s32 4294967295, %s1262_s12   ;;  %p1098_p0 = scmp.ge.s32.totalorder %s1262_s12, 1  ;;  %s1262_s12 = sphi %s1288_s12, %s13_s12  }
   0x2   : > { %p137_p1 = scmp.lt.s32.totalorder %s1262_s12, 3 }
   0x4   : > { %p138_p2 = pnand %p1098_p0, %p137_p1 }
   0x5   : > { %p161_p3 = scmp.lt.s32.totalorder (!%p138_p2), %s1094_s13, 1  ;;  %s1311_s24 = smov (!%p138_p2), 0  }
   0x6   : > { %141 = sbr.rel (%p138_p2) target bundleno = 314 (0x13a), region = 32 }
   0xb   : > { %v1299_v0 = vld [vmem:[%s1514_s2] sm:$0x1]  ;;  %s1517_s13 = smov (!%p161_p3, %s1094_s13), 1 }
   0xc   : > { %s1234_s16 = smul.u32 896, %s1517_s13 }
   0xd   : > { %s1235_s17 = smul.u32 208, %s1517_s13 }
   0xe   : > { %s1304_s20 = scalar_lea.vmem %s1512_s0, %s1234_s16 }
   0xf   : > { %s1309_s23 = scalar_lea.vmem %s1515_s3, %s1235_s17 }
  0x10 LB: >> { %v1103_v1 = vld [vmem:[%s1513_s1 + $0x8] sm:$0xff]  ;;  %v185_v2 = vld [vmem:[%s1513_s1] sm:$0xff]  ;;  %v1112_v3 = vld [vmem:[%s1513_s1 + $0x10] sm:$0xff]  ;;  %s1228_s10 = sshll.u32 %s1266_s24, 6  ;;  %vm192_vm0 = vcmask 64512   ;;  %s1225_s19 = sshll.u32 %s1266_s24, 4  ;;  %s1266_s24 = sphi %s1311_s24, %s177_s24  }
  0x11   : >> { %1232 = vmatpush.msra.mxu2 %v1103_v1  ;;  %1233 = vmatpush.msra.mxu3 %v185_v2  ;;  %v1123_v4 = vld [vmem:[%s1513_s1 + $0x18] sm:$0xff]  ;;  %v1132_v5 = vld [vmem:[%s1513_s1 + $0x20] sm:$0xff]  ;;  %v1334_v6 = vld [vmem:[%s1513_s1 + $0x28] sm:$0xff]  ;;  %s1338_s11 = scalar_lea.vmem %s1304_s20, %s1228_s10  ;;  %s1015_s21 = scalar_lea.vmem %s1309_s23, %s1225_s19 }
  0x12   : >> { %220 = vmatpush.msra.mxu0 %v1103_v1  ;;  %261 = vmatpush.msra.mxu1 %v185_v2  ;;  %v1343_v7 = vld [vmem:[%s1513_s1 + $0x30] sm:$0xff]  ;;  %v1351_v10 = vld [vmem:[%s1513_s1 + $0x38] sm:$0xff]  ;;  %v186_v11 = vld [vmem:[%s1338_s11 + $0x1] sm:$0xff]  ;;  %s177_s24 = sadd.s32 1, %s1266_s24  }
  0x13   : >> { %308 = vmatpush.msrb.mxu2 %v1112_v3  ;;  %362 = vmatpush.msrb.mxu3 %v1123_v4  ;;  %v188_v8 = vld [vmem:[%s1338_s11 + $0x11] sm:$0xff]  ;;  %v181_v12 = vld [vmem:[%s1338_s11] sm:$0xff]  ;;  %v189_v14 = vld [vmem:[%s1338_s11 + $0x19] sm:$0x3]  ;;  %p174_p4 = scmp.ge.s32.totalorder %s177_s24, 13  }
  0x14   : >> { %v183_v9 = vld [vmem:[%s1338_s11 + $0x10] sm:$0xff]  ;;  %413 = vmatpush.msrb.mxu0 %v1132_v5  ;;  %464 = vmatpush.msrb.mxu1 %v1334_v6  ;;  %v1170_v13 = vld [vmem:[%s1513_s1 + $0x40] sm:$0xff]  ;;  %v184_v15 = vld [vmem:[%s1338_s11 + $0x18] sm:$0x3] }
  0x15   : >> { %1106 = vmatmul.msk.f32.vlgmr.msra.gmra.mxu2 %vm192_vm0, %v188_v8  ;;  %1110 = vmatmul.msk.f32.vlgmr.msra.gmra.mxu3 %vm192_vm0, %v183_v9  ;;  %v187_v16 = vld [vmem:[%s1338_s11 + $0x9] sm:$0xff]  ;;  %v1374_v19 = vld [vmem:[%s1338_s11 + $0x20] sm:$0xff]  ;;  %v277_v26 = vld [vmem:[%s1338_s11 + $0x12] sm:$0xff] }
  0x16   : >> { %1104 = vmatmul.msk.f32.vlgmr.msra.gmra.mxu0 %vm192_vm0, %v186_v11  ;;  %1108 = vmatmul.msk.f32.vlgmr.msra.gmra.mxu1 %vm192_vm0, %v181_v12  ;;  %v182_v17 = vld [vmem:[%s1338_s11 + $0x8] sm:$0xff]  ;;  %v1121_v27 = vld [vmem:[%s1338_s11 + $0x30] sm:$0xff]  ;;  %v278_v30 = vld [vmem:[%s1338_s11 + $0x1a] sm:$0x3] }
  0x17   : >> { %518 = vmatpush.msra.mxu2 %v1343_v7  ;;  %569 = vmatpush.msra.mxu3 %v1351_v10  ;;  %v275_v18 = vld [vmem:[%s1338_s11 + $0x2] sm:$0xff]  ;;  %v276_v22 = vld [vmem:[%s1338_s11 + $0xa] sm:$0xff]  ;;  %v1139_v29 = vld [vmem:[%s1338_s11 + $0x32] sm:$0xff] }
  0x18   : >> { %620 = vmatpush.msra.mxu0 %v1170_v13  ;;  %664 = vmatpush.msra.mxu1 %v1103_v1  ;;  %v1128_v20 = vld [vmem:[%s1338_s11 + $0x21] sm:$0xff]  ;;  %v1129_v24 = vld [vmem:[%s1338_s11 + $0x29] sm:$0xff]  ;;  %v1130_v28 = vld [vmem:[%s1338_s11 + $0x31] sm:$0xff] }
  0x19   : >> { %v1378_v21 = vld [vmem:[%s1338_s11 + $0x22] sm:$0xff]  ;;  %v1138_v25 = vld [vmem:[%s1338_s11 + $0x2a] sm:$0xff]  ;;  %v1122_v31 = vld [vmem:[%s1338_s11 + $0x38] sm:$0x3] }
  0x1a   : >> { %v1120_v23 = vld [vmem:[%s1338_s11 + $0x28] sm:$0xff]  ;;  %v1131_v32 = vld [vmem:[%s1338_s11 + $0x39] sm:$0x3]  ;;  %v1148_v34 = vld [vmem:[%s1338_s11 + $0x40] sm:$0xff] }
  0x1b   : >> { %v1140_v33 = vld [vmem:[%s1338_s11 + $0x3a] sm:$0x3]  ;;  %v1157_v35 = vld [vmem:[%s1338_s11 + $0x41] sm:$0xff]  ;;  %v1158_v38 = vld [vmem:[%s1338_s11 + $0x49] sm:$0xff] }
  0x1c   : >> { %v1166_v36 = vld [vmem:[%s1338_s11 + $0x42] sm:$0xff]  ;;  %v1167_v39 = vld [vmem:[%s1338_s11 + $0x4a] sm:$0xff]  ;;  %v1168_v42 = vld [vmem:[%s1338_s11 + $0x52] sm:$0xff] }
  0x1d   : >> { %1107 = vmatmul.msk.f32.gmra.mxu2 %vm192_vm0, %v189_v14  ;;  %1111 = vmatmul.msk.f32.gmra.mxu3 %vm192_vm0, %v184_v15  ;;  %v1149_v37 = vld [vmem:[%s1338_s11 + $0x48] sm:$0xff]  ;;  %v1150_v40 = vld [vmem:[%s1338_s11 + $0x50] sm:$0xff]  ;;  %v1151_v43 = vld [vmem:[%s1338_s11 + $0x58] sm:$0x3] }
  0x1e   : >> { %1105 = vmatmul.msk.f32.gmra.mxu0 %vm192_vm0, %v187_v16  ;;  %1109 = vmatmul.msk.f32.gmra.mxu1 %vm192_vm0, %v182_v17  ;;  %v1159_v41 = vld [vmem:[%s1338_s11 + $0x51] sm:$0xff]  ;;  %v1160_v44 = vld [vmem:[%s1338_s11 + $0x59] sm:$0x3]  ;;  %v1201_v46 = vld [vmem:[%s1338_s11 + $0x60] sm:$0xff] }
  0x1f   : >> { %v1169_v45 = vld [vmem:[%s1338_s11 + $0x5a] sm:$0x3]  ;;  %v1209_v47 = vld [vmem:[%s1338_s11 + $0x61] sm:$0xff]  ;;  %v1210_v50 = vld [vmem:[%s1338_s11 + $0x69] sm:$0xff] }
  0x20   : >> { %v1217_v48 = vld [vmem:[%s1338_s11 + $0x62] sm:$0xff]  ;;  %v1218_v51 = vld [vmem:[%s1338_s11 + $0x6a] sm:$0xff]  ;;  %v1219_v56 = vld [vmem:[%s1338_s11 + $0x72] sm:$0xff] }
  0x21   : >> { %v1202_v49 = vld [vmem:[%s1338_s11 + $0x68] sm:$0xff]  ;;  %v1203_v52 = vld [vmem:[%s1338_s11 + $0x70] sm:$0xff]  ;;  %v1204_v61 = vld [vmem:[%s1338_s11 + $0x78] sm:$0x3] }
  0x22   : >> { %v1211_v55 = vld [vmem:[%s1338_s11 + $0x71] sm:$0xff]  ;;  %v1212_v1 = vld [vmem:[%s1338_s11 + $0x79] sm:$0x3] }
  0x25   : >> { %1113 = vmatmul.msk.f32.vlgmr.msrb.gmra.mxu2 %vm192_vm0, %v275_v18  ;;  %1124 = vmatmul.msk.f32.vlgmr.msrb.gmra.mxu3 %vm192_vm0, %v1374_v19 }
  0x26   : >> { %1133 = vmatmul.msk.f32.vlgmr.msrb.gmra.mxu0 %vm192_vm0, %v1128_v20  ;;  %1142 = vmatmul.msk.f32.vlgmr.msrb.gmra.mxu1 %vm192_vm0, %v1378_v21 }
  0x27   : >> { %693 = vmatpush.msrb.mxu2 %v185_v2  ;;  %722 = vmatpush.msrb.mxu3 %v1112_v3  ;;  %v1220_v2 = vld [vmem:[%s1338_s11 + $0x7a] sm:$0x3] }
  0x28   : >> { %755 = vmatpush.msrb.mxu0 %v1123_v4  ;;  %788 = vmatpush.msrb.mxu1 %v1132_v5 }
  0x2d   : >> { %1114 = vmatmul.msk.f32.gmra.mxu2 %vm192_vm0, %v276_v22  ;;  %1125 = vmatmul.msk.f32.gmra.mxu3 %vm192_vm0, %v1120_v23 }
  0x2e   : >> { %1134 = vmatmul.msk.f32.gmra.mxu0 %vm192_vm0, %v1129_v24  ;;  %1143 = vmatmul.msk.f32.gmra.mxu1 %vm192_vm0, %v1138_v25 }
  0x35   : >> { %1115 = vmatmul.msk.f32.gmra.mxu2 %vm192_vm0, %v277_v26  ;;  %1126 = vmatmul.msk.f32.gmra.mxu3 %vm192_vm0, %v1121_v27 }
  0x36   : >> { %1135 = vmatmul.msk.f32.gmra.mxu0 %vm192_vm0, %v1130_v28  ;;  %1144 = vmatmul.msk.f32.gmra.mxu1 %vm192_vm0, %v1139_v29 }
  0x3d   : >> { %1116 = vmatmul.msk.f32.gmra.mxu2 %vm192_vm0, %v278_v30  ;;  %1127 = vmatmul.msk.f32.gmra.mxu3 %vm192_vm0, %v1122_v31 }
  0x3e   : >> { %1136 = vmatmul.msk.f32.gmra.mxu0 %vm192_vm0, %v1131_v32  ;;  %1145 = vmatmul.msk.f32.gmra.mxu1 %vm192_vm0, %v1140_v33 }
  0x45   : >> { %1153 = vmatmul.msk.f32.vlgmr.msra.gmra.mxu2 %vm192_vm0, %v1148_v34  ;;  %1162 = vmatmul.msk.f32.vlgmr.msra.gmra.mxu3 %vm192_vm0, %v1157_v35 }
  0x46   : >> { %1171 = vmatmul.msk.f32.vlgmr.msra.gmra.mxu0 %vm192_vm0, %v1166_v36  ;;  %1175 = vmatmul.msk.f32.vlgmr.msra.gmra.mxu1 %vm192_vm0, %v1128_v20 }
  0x47   : >> { %821 = vmatpush.msra.mxu2 %v1334_v6  ;;  %873 = vmatpush.msra.mxu3 %v1343_v7 }
  0x48   : >> { %922 = vmatpush.msra.mxu0 %v1351_v10  ;;  %971 = vmatpush.msra.mxu1 %v1170_v13 }
  0x4d   : >> { %1154 = vmatmul.msk.f32.gmra.mxu2 %vm192_vm0, %v1149_v37  ;;  %1163 = vmatmul.msk.f32.gmra.mxu3 %vm192_vm0, %v1158_v38 }
  0x4e   : >> { %1172 = vmatmul.msk.f32.gmra.mxu0 %vm192_vm0, %v1167_v39  ;;  %1176 = vmatmul.msk.f32.gmra.mxu1 %vm192_vm0, %v1129_v24 }
  0x55   : >> { %1155 = vmatmul.msk.f32.gmra.mxu2 %vm192_vm0, %v1150_v40  ;;  %1164 = vmatmul.msk.f32.gmra.mxu3 %vm192_vm0, %v1159_v41 }
  0x56   : >> { %1173 = vmatmul.msk.f32.gmra.mxu0 %vm192_vm0, %v1168_v42  ;;  %1177 = vmatmul.msk.f32.gmra.mxu1 %vm192_vm0, %v1130_v28 }
  0x5d   : >> { %1156 = vmatmul.msk.f32.gmra.mxu2 %vm192_vm0, %v1151_v43  ;;  %1165 = vmatmul.msk.f32.gmra.mxu3 %vm192_vm0, %v1160_v44 }
  0x5e   : >> { %1174 = vmatmul.msk.f32.gmra.mxu0 %vm192_vm0, %v1169_v45  ;;  %1178 = vmatmul.msk.f32.gmra.mxu1 %vm192_vm0, %v1131_v32 }
  0x65   : >> { %1179 = vmatmul.msk.f32.vlgmr.msrb.gmra.mxu2 %vm192_vm0, %v1374_v19  ;;  %1183 = vmatmul.msk.f32.vlgmr.msrb.gmra.mxu3 %vm192_vm0, %v1378_v21 }
  0x66   : >> { %1187 = vmatmul.msk.f32.vlgmr.msrb.gmra.mxu0 %vm192_vm0, %v1148_v34  ;;  %1191 = vmatmul.msk.f32.vlgmr.msrb.gmra.mxu1 %vm192_vm0, %v1157_v35 }
  0x6d   : >> { %1180 = vmatmul.msk.f32.gmra.mxu2 %vm192_vm0, %v1120_v23  ;;  %1184 = vmatmul.msk.f32.gmra.mxu3 %vm192_vm0, %v1138_v25 }
  0x6e   : >> { %1188 = vmatmul.msk.f32.gmra.mxu0 %vm192_vm0, %v1149_v37  ;;  %1192 = vmatmul.msk.f32.gmra.mxu1 %vm192_vm0, %v1158_v38 }
  0x75   : >> { %1181 = vmatmul.msk.f32.gmra.mxu2 %vm192_vm0, %v1121_v27  ;;  %1185 = vmatmul.msk.f32.gmra.mxu3 %vm192_vm0, %v1139_v29 }
  0x76   : >> { %1189 = vmatmul.msk.f32.gmra.mxu0 %vm192_vm0, %v1150_v40  ;;  %1193 = vmatmul.msk.f32.gmra.mxu1 %vm192_vm0, %v1159_v41 }
  0x7d   : >> { %1182 = vmatmul.msk.f32.gmra.mxu2 %vm192_vm0, %v1122_v31  ;;  %1186 = vmatmul.msk.f32.gmra.mxu3 %vm192_vm0, %v1140_v33 }
  0x7e   : >> { %1190 = vmatmul.msk.f32.gmra.mxu0 %vm192_vm0, %v1151_v43  ;;  %1194 = vmatmul.msk.f32.gmra.mxu1 %vm192_vm0, %v1160_v44 }
  0x85   : >> { %1195 = vmatmul.msk.f32.vlgmr.msra.gmra.mxu2 %vm192_vm0, %v1166_v36  ;;  %1205 = vmatmul.msk.f32.vlgmr.msra.gmra.mxu3 %vm192_vm0, %v1201_v46 }
  0x86   : >> { %1213 = vmatmul.msk.f32.vlgmr.msra.gmra.mxu0 %vm192_vm0, %v1209_v47  ;;  %1221 = vmatmul.msk.f32.vlgmr.msra.gmra.mxu1 %vm192_vm0, %v1217_v48 }
  0x8d   : >> { %1196 = vmatmul.msk.f32.gmra.mxu2 %vm192_vm0, %v1167_v39  ;;  %1206 = vmatmul.msk.f32.gmra.mxu3 %vm192_vm0, %v1202_v49 }
  0x8e   : >> { %1214 = vmatmul.msk.f32.gmra.mxu0 %vm192_vm0, %v1210_v50  ;;  %1222 = vmatmul.msk.f32.gmra.mxu1 %vm192_vm0, %v1218_v51 }
  0x93   : >> { %v222_v53 = vpop.f32.mrf.mxu0  ;;  %v263_v54 = vpop.f32.mrf.mxu1 }
  0x94   : >> { %v264_v57 = vadd.f32 %v263_v54, %v222_v53 }
  0x95   : >> { %1197 = vmatmul.msk.f32.gmra.mxu2 %vm192_vm0, %v1168_v42  ;;  %1207 = vmatmul.msk.f32.gmra.mxu3 %vm192_vm0, %v1203_v52 }
  0x96   : >> { %1215 = vmatmul.msk.f32.gmra.mxu0 %vm192_vm0, %v1211_v55  ;;  %1223 = vmatmul.msk.f32.gmra.mxu1 %vm192_vm0, %v1219_v56 }
  0x98   : >> { %v228_v58 = vpop.f32.mrf.mxu2  ;;  %v269_v59 = vpop.f32.mrf.mxu3 }
  0x99   : >> { %v270_v60 = vadd.f32 %v269_v59, %v228_v58 }
  0x9b   : >> { %v225_v62 = vpop.f32.mrf.mxu0  ;;  %v266_v63 = vpop.f32.mrf.mxu1 }
  0x9c   : >> { %v267_v3 = vadd.f32 %v266_v63, %v225_v62 }
  0x9d   : >> { %1198 = vmatmul.msk.f32.gmra.mxu2 %vm192_vm0, %v1169_v45  ;;  %1208 = vmatmul.msk.f32.gmra.mxu3 %vm192_vm0, %v1204_v61 }
  0x9e   : >> { %1216 = vmatmul.msk.f32.gmra.mxu0 %vm192_vm0, %v1212_v1  ;;  %1224 = vmatmul.msk.f32.gmra.mxu1 %vm192_vm0, %v1220_v2 }
  0xa0   : >> { %v231_v4 = vpop.f32.mrf.mxu2  ;;  %v272_v5 = vpop.f32.mrf.mxu3 }
  0xa1   : >> { %v273_v6 = vadd.f32 %v272_v5, %v231_v4 }
  0xa3   : >> { %v415_v7 = vpop.f32.mrf.mxu0  ;;  %v466_v8 = vpop.f32.mrf.mxu1 }
  0xa8   : >> { %v310_v9 = vpop.f32.mrf.mxu2  ;;  %v364_v10 = vpop.f32.mrf.mxu3 }
  0xa9   : >> { %v322_v11 = vadd.f32 %v310_v9, %v264_v57 }
  0xab   : >> { %v376_v12 = vadd.f32 %v364_v10, %v322_v11  ;;  %v418_v13 = vpop.f32.mrf.mxu0  ;;  %v469_v14 = vpop.f32.mrf.mxu1 }
  0xad   : >> { %v427_v15 = vadd.f32 %v415_v7, %v376_v12 }
  0xaf   : >> { %v478_v16 = vadd.f32 %v466_v8, %v427_v15 }
  0xb0   : >> { %v313_v17 = vpop.f32.mrf.mxu2  ;;  %v367_v18 = vpop.f32.mrf.mxu3 }
  0xb1   : >> { %v323_v19 = vadd.f32 %v313_v17, %v267_v3 }
  0xb3   : >> { %v377_v20 = vadd.f32 %v367_v18, %v323_v19  ;;  %v421_v21 = vpop.f32.mrf.mxu0  ;;  %v472_v22 = vpop.f32.mrf.mxu1 }
  0xb5   : >> { %v428_v23 = vadd.f32 %v418_v13, %v377_v20 }
  0xb7   : >> { %v479_v24 = vadd.f32 %v469_v14, %v428_v23 }
  0xb8   : >> { %v316_v25 = vpop.f32.mrf.mxu2  ;;  %v370_v26 = vpop.f32.mrf.mxu3 }
  0xb9   : >> { %v324_v27 = vadd.f32 %v316_v25, %v270_v60 }
  0xbb   : >> { %v378_v28 = vadd.f32 %v370_v26, %v324_v27  ;;  %v424_v29 = vpop.f32.mrf.mxu0  ;;  %v475_v30 = vpop.f32.mrf.mxu1 }
  0xbd   : >> { %v429_v31 = vadd.f32 %v421_v21, %v378_v28 }
  0xbf   : >> { %v480_v32 = vadd.f32 %v472_v22, %v429_v31  ;;  %v1492_v31 = vperm.slane %v1299_v0, 0 }
  0xc0   : >> { %v319_v33 = vpop.f32.mrf.mxu2  ;;  %v373_v34 = vpop.f32.mrf.mxu3 }
  0xc1   : >> { %v325_v35 = vadd.f32 %v319_v33, %v273_v6 }
  0xc3   : >> { %v379_v36 = vadd.f32 %v373_v34, %v325_v35  ;;  %v622_v37 = vpop.f32.mrf.mxu0  ;;  %v666_v38 = vpop.f32.mrf.mxu1 }
  0xc5   : >> { %v430_v39 = vadd.f32 %v424_v29, %v379_v36 }
  0xc7   : >> { %v481_v40 = vadd.f32 %v475_v30, %v430_v39 }
  0xc8   : >> { %v520_v41 = vpop.f32.mrf.mxu2  ;;  %v571_v42 = vpop.f32.mrf.mxu3 }
  0xc9   : >> { %v532_v43 = vadd.f32 %v520_v41, %v478_v16 }
  0xcb   : >> { %v583_v44 = vadd.f32 %v571_v42, %v532_v43  ;;  %v625_v45 = vpop.f32.mrf.mxu0  ;;  %v669_v46 = vpop.f32.mrf.mxu1 }
  0xcd   : >> { %v634_v47 = vadd.f32 %v622_v37, %v583_v44 }
  0xcf   : >> { %v641_v37 = vadd.f32 %v1492_v31, %v634_v47 }
  0xd0   : >> { %v523_v48 = vpop.f32.mrf.mxu2  ;;  %v574_v49 = vpop.f32.mrf.mxu3 }
  0xd1   : >> { %v533_v50 = vadd.f32 %v523_v48, %v479_v24 }
  0xd3   : >> { %v584_v51 = vadd.f32 %v574_v49, %v533_v50  ;;  %v628_v52 = vpop.f32.mrf.mxu0  ;;  %v672_v53 = vpop.f32.mrf.mxu1 }
  0xd5   : >> { %v635_v54 = vadd.f32 %v625_v45, %v584_v51 }
  0xd8   : >> { %v526_v55 = vpop.f32.mrf.mxu2  ;;  %v577_v56 = vpop.f32.mrf.mxu3 }
  0xd9   : >> { %v534_v57 = vadd.f32 %v526_v55, %v480_v32  ;;  %v642_v55 = vadd.f32 %v1492_v31, %v635_v54 }
  0xdb   : >> { %v585_v58 = vadd.f32 %v577_v56, %v534_v57  ;;  %v631_v59 = vpop.f32.mrf.mxu0  ;;  %v675_v60 = vpop.f32.mrf.mxu1 }
  0xdd   : >> { %v1487_v61 = vadd.f32 %v628_v52, %v585_v58 }
  0xdf   : >> { %v643_v54 = vadd.f32 %v1492_v31, %v1487_v61 }
  0xe0   : >> { %v529_v62 = vpop.f32.mrf.mxu2  ;;  %v580_v63 = vpop.f32.mrf.mxu3 }
  0xe1   : >> { %v535_v1 = vadd.f32 %v529_v62, %v481_v40 }
  0xe3   : >> { %v586_v2 = vadd.f32 %v580_v63, %v535_v1  ;;  %v757_v3 = vpop.f32.mrf.mxu0  ;;  %v790_v4 = vpop.f32.mrf.mxu1 }
  0xe5   : >> { %v1489_v5 = vadd.f32 %v631_v59, %v586_v2 }
  0xe7   : >> { %v644_v61 = vadd.f32 %v1492_v31, %v1489_v5 }
  0xe8   : >> { %v695_v6 = vpop.f32.mrf.mxu2  ;;  %v724_v7 = vpop.f32.mrf.mxu3 }
  0xe9   : >> { %v696_v16 = vadd.f32 %v695_v6, %v666_v38 }
  0xeb   : >> { %v760_v8 = vpop.f32.mrf.mxu0  ;;  %v793_v9 = vpop.f32.mrf.mxu1  ;;  %v736_v19 = vadd.f32 %v724_v7, %v696_v16  ;;  %v647_v16 = vmax.f32 %v643_v54, 0.0 }
  0xed   : >> { %v769_v22 = vadd.f32 %v757_v3, %v736_v19  ;;  %v646_v3 = vmax.f32 %v642_v55, 0.0 }
  0xef   : >> { %v802_v26 = vadd.f32 %v790_v4, %v769_v22 }
  0xf0   : >> { %v698_v10 = vpop.f32.mrf.mxu2  ;;  %v727_v11 = vpop.f32.mrf.mxu3 }
  0xf1   : >> { %v699_v23 = vadd.f32 %v698_v10, %v669_v46  ;;  %v645_v46 = vmax.f32 %v641_v37, 0.0 }
  0xf3   : >> { %v763_v12 = vpop.f32.mrf.mxu0  ;;  %v796_v13 = vpop.f32.mrf.mxu1  ;;  %v737_v27 = vadd.f32 %v727_v11, %v699_v23 }
  0xf5   : >> { %v770_v32 = vadd.f32 %v760_v8, %v737_v27  ;;  %v648_v27 = vmax.f32 %v644_v61, 0.0 }
  0xf7   : >> { %v803_v38 = vadd.f32 %v793_v9, %v770_v32 }
  0xf8   : >> { %v701_v14 = vpop.f32.mrf.mxu2  ;;  %v730_v15 = vpop.f32.mrf.mxu3 }
  0xf9   : >> { %v702_v33 = vadd.f32 %v701_v14, %v672_v53 }
  0xfb   : >> { %v766_v17 = vpop.f32.mrf.mxu0  ;;  %v799_v18 = vpop.f32.mrf.mxu1  ;;  %v738_v39 = vadd.f32 %v730_v15, %v702_v33 }
  0xfd   : >> { %v771_v48 = vadd.f32 %v763_v12, %v738_v39 }
  0xff   : >> { %v804_v56 = vadd.f32 %v796_v13, %v771_v48 }
 0x100   : >> { %v704_v20 = vpop.f32.mrf.mxu2  ;;  %v733_v21 = vpop.f32.mrf.mxu3 }
 0x101   : >> { %v705_v49 = vadd.f32 %v704_v20, %v675_v60 }
 0x103   : >> { %v924_v24 = vpop.f32.mrf.mxu0  ;;  %v973_v25 = vpop.f32.mrf.mxu1  ;;  %v739_v47 = vadd.f32 %v733_v21, %v705_v49 }
 0x105   : >> { %v772_v60 = vadd.f32 %v766_v17, %v739_v47 }
 0x107   : >> { %v805_v9 = vadd.f32 %v799_v18, %v772_v60 }
 0x108   : >> { %v823_v28 = vpop.f32.mrf.mxu2  ;;  %v875_v29 = vpop.f32.mrf.mxu3 }
 0x109   : >> { %v835_v30 = vadd.f32 %v823_v28, %v802_v26 }
 0x10b   : >> { %v887_v34 = vadd.f32 %v875_v29, %v835_v30  ;;  %v927_v36 = vpop.f32.mrf.mxu0  ;;  %v976_v41 = vpop.f32.mrf.mxu1 }
 0x10d   : >> { %v936_v35 = vadd.f32 %v924_v24, %v887_v34 }
 0x10f   : >> { %v985_v40 = vadd.f32 %v973_v25, %v936_v35 }
 0x110   : >> { %v826_v42 = vpop.f32.mrf.mxu2  ;;  %v878_v43 = vpop.f32.mrf.mxu3 }
 0x111   : >> { %v989_v44 = vadd.f32 %v985_v40, %v1492_v31  ;;  %v836_v45 = vadd.f32 %v826_v42, %v803_v38 }
 0x113   : >> { %v993_v50 = vmax.f32 %v989_v44, 0.0  ;;  %v888_v51 = vadd.f32 %v878_v43, %v836_v45  ;;  %v930_v58 = vpop.f32.mrf.mxu0  ;;  %v979_v2 = vpop.f32.mrf.mxu1 }
 0x115   : >> { %v997_v52 = vmax.f32 %v645_v46, %v993_v50  ;;  %v937_v53 = vadd.f32 %v927_v36, %v888_v51 }
 0x117   : >> { %1001 = vst [vmem:[#allocation2] sm:$0xff] %v997_v52  ;;  %v986_v57 = vadd.f32 %v976_v41, %v937_v53 }
 0x118   : >> { %v829_v59 = vpop.f32.mrf.mxu2  ;;  %v881_v62 = vpop.f32.mrf.mxu3 }
 0x119   : >> { %v990_v63 = vadd.f32 %v986_v57, %v1492_v31  ;;  %v837_v1 = vadd.f32 %v829_v59, %v804_v56 }
 0x11b   : >> { %v994_v4 = vmax.f32 %v990_v63, 0.0  ;;  %v889_v6 = vadd.f32 %v881_v62, %v837_v1  ;;  %v933_v15 = vpop.f32.mrf.mxu0  ;;  %v982_v20 = vpop.f32.mrf.mxu1 }
 0x11d   : >> { %v998_v7 = vmax.f32 %v646_v3, %v994_v4  ;;  %v938_v8 = vadd.f32 %v930_v58, %v889_v6 }
 0x11f   : >> { %1002 = vst [vmem:[#allocation2 + $0x8] sm:$0xff] %v998_v7  ;;  %v987_v10 = vadd.f32 %v979_v2, %v938_v8 }
 0x120   : >> { %v832_v11 = vpop.f32.mrf.mxu2  ;;  %v884_v12 = vpop.f32.mrf.mxu3 }
 0x121   : >> { %v991_v13 = vadd.f32 %v987_v10, %v1492_v31  ;;  %v838_v14 = vadd.f32 %v832_v11, %v805_v9 }
 0x123   : >> { %v995_v17 = vmax.f32 %v991_v13, 0.0  ;;  %v890_v19 = vadd.f32 %v884_v12, %v838_v14 }
 0x125   : >> { %v999_v21 = vmax.f32 %v647_v16, %v995_v17  ;;  %v939_v22 = vadd.f32 %v933_v15, %v890_v19 }
 0x126   : >> { %v1005_v23 = vld [vmem:[#allocation2] ss:$2 sm:$0xff]  ;;  %v1009_v24 = vld [vmem:[#allocation2 + $0x1] ss:$2 sm:$0xff] }
 0x127   : >> { %v1012_v18 = vmax.f32 %v1005_v23, %v1009_v24  ;;  %1003 = vst [vmem:[#allocation2 + $0x10] sm:$0xff] %v999_v21  ;;  %v988_v25 = vadd.f32 %v982_v20, %v939_v22 }
 0x129   : >> { %1016 = vst [vmem:[%s1015_s21] sm:$0xff] %v1012_v18  ;;  %v992_v26 = vadd.f32 %v988_v25, %v1492_v31 }
 0x12b   : >> { %v996_v28 = vmax.f32 %v992_v26, 0.0 }
 0x12d   : >> { %v1000_v29 = vmax.f32 %v648_v27, %v996_v28 }
 0x12f   : >> { %1004 = vst [vmem:[#allocation2 + $0x18] sm:$0x3] %v1000_v29 }
 0x135   : > { %176 = sbr.rel (!%p174_p4) target bundleno = 16 (0x10), region = 85 }
 0x136   : >> { %v1007_v30 = vld [vmem:[#allocation2 + $0x10] ss:$2 sm:$0x1f]  ;;  %v1011_v32 = vld [vmem:[#allocation2 + $0x11] ss:$2 sm:$0x1f] }
 0x137   : >> { %v1013_v33 = vmax.f32 %v1007_v30, %v1011_v32 }
 0x139   : >> { %1017 = vst [vmem:[%s1015_s21 + $0x8] sm:$0x1f] %v1013_v33 }
 0x13a PF: > { %s13_s12 = sadd.s32 1, %s1262_s12  }
 0x13b   : > { %p10_p5 = scmp.ge.s32.totalorder %s13_s12, 4  }
 0x13d   :  { %12 = sbr.rel (!%p10_p5) target bundleno = 1 (0x1), region = 96 }

// kernel: mnist_cnn_forward.5
= control target key start
LH: loop header
LB: loop body
LE: loop exit
PB: predicated region body
PF: predicated region fallthrough
CT: control target
= control target key end

     0   :  { %s1160_s12 = smov 0   ;;  %s2313_s0 = inlined_call_operand.vmem [shape: f32[2,13,13,128], index: 0, kind: input, shape index: {}]   ;;  %s2314_s1 = inlined_call_operand.vmem [shape: f32[9,128,128], index: 1, kind: input, shape index: {}]   ;;  %s2315_s2 = inlined_call_operand.vmem [shape: f32[1,128], index: 2, kind: input, shape index: {}]   ;;  %s2316_s3 = inlined_call_operand.vmem [shape: f32[2,5,5,128], index: 3, kind: output, shape index: {}]  }
   0x1 LB: > { %s906_s13 = sadd.s32 4294967295, %s1134_s12   ;;  %p910_p0 = scmp.ge.s32.totalorder %s1134_s12, 1  ;;  %s1134_s12 = sphi %s1160_s12, %s13_s12  }
   0x2   : > { %p137_p1 = scmp.lt.s32.totalorder %s1134_s12, 3 }
   0x4   : > { %p138_p2 = pnand %p910_p0, %p137_p1 }
   0x5   : > { %p161_p3 = scmp.lt.s32.totalorder (!%p138_p2), %s906_s13, 1  ;;  %s1183_s24 = smov (!%p138_p2), 0  }
   0x6   : > { %141 = sbr.rel (%p138_p2) target bundleno = 357 (0x165), region = 32 }
   0xb   : > { %v1171_v0 = vld [vmem:[%s2315_s2] sm:$0x1]  ;;  %s2548_s13 = smov (!%p161_p3, %s906_s13), 1 }
   0xc   : > { %2403 = vst [vmem:[#allocation3_spill] sm:$0xff] %v1171_v0  ;;  %s1106_s16 = smul.u32 208, %s2548_s13 }
   0xd   : > { %s1107_s17 = smul.u32 40, %s2548_s13 }
   0xe   : > { %s1176_s20 = scalar_lea.vmem %s2313_s0, %s1106_s16 }
   0xf   : > { %s1181_s23 = scalar_lea.vmem %s2316_s3, %s1107_s17 }
  0x10 LB: >> { %v1191_v1 = vld [vmem:[%s2314_s1 + $0xf8] sm:$0xff]  ;;  %v1201_v3 = vld [vmem:[%s2314_s1 + $0xf0] sm:$0xff]  ;;  %v1225_v7 = vld [vmem:[%s2314_s1 + $0xe8] sm:$0xff]  ;;  %s1070_s15 = sshll.u32 %s1138_s24, 5  ;;  %s1138_s24 = sphi %s1183_s24, %s177_s24  }
  0x11   : >> { %v1196_v2 = vld [vmem:[%s2314_s1 + $0x178] sm:$0xff]  ;;  %218 = vmatpush.msra.mxu0 %v1191_v1  ;;  %v1213_v5 = vld [vmem:[%s2314_s1 + $0x170] sm:$0xff]  ;;  %v1235_v9 = vld [vmem:[%s2314_s1 + $0x168] sm:$0xff]  ;;  %s1820_s4 = scalar_lea.vmem %s1176_s20, %s1070_s15 }
  0x12   : >> { %283 = vmatpush.msra.mxu2 %v1196_v2  ;;  %v1208_v4 = vld [vmem:[%s2314_s1 + $0x78] sm:$0xff]  ;;  %v1230_v8 = vld [vmem:[%s2314_s1 + $0x70] sm:$0xff]  ;;  %v1247_v11 = vld [vmem:[%s2314_s1 + $0x68] sm:$0xff] }
  0x13   : >> { %v1218_v6 = vld [vmem:[%s2314_s1 + $0x1f8] sm:$0xff]  ;;  %241 = vmatpush.msra.mxu1 %v1208_v4  ;;  %219 = vmatpush.msra.mxu0 %v1201_v3  ;;  %v1242_v10 = vld [vmem:[%s2314_s1 + $0x1f0] sm:$0xff]  ;;  %v1254_v12 = vld [vmem:[%s2314_s1 + $0xe0] sm:$0xff] }
  0x14   : >> { %330 = vmatpush.msra.mxu3 %v1218_v6  ;;  %284 = vmatpush.msra.mxu2 %v1213_v5  ;;  %v1259_v13 = vld [vmem:[%s2314_s1 + $0x160] sm:$0xff]  ;;  %v1264_v14 = vld [vmem:[%s2314_s1 + $0x1e8] sm:$0xff]  ;;  %v1283_v17 = vld [vmem:[%s2314_s1 + $0xd8] sm:$0xff] }
  0x15   : >> { %242 = vmatpush.msra.mxu1 %v1230_v8  ;;  %2404 = vst [vmem:[#allocation4_spill] sm:$0xff] %v1264_v14  ;;  %220 = vmatpush.msra.mxu0 %v1225_v7  ;;  %v1271_v15 = vld [vmem:[%s2314_s1 + $0x60] sm:$0xff]  ;;  %v1288_v18 = vld [vmem:[%s2314_s1 + $0x158] sm:$0xff]  ;;  %v1307_v21 = vld [vmem:[%s2314_s1 + $0xd0] sm:$0xff] }
  0x16   : >> { %331 = vmatpush.msra.mxu3 %v1242_v10  ;;  %285 = vmatpush.msra.mxu2 %v1235_v9  ;;  %v1276_v16 = vld [vmem:[%s2314_s1 + $0x1e0] sm:$0xff]  ;;  %v1295_v19 = vld [vmem:[%s2314_s1 + $0x58] sm:$0xff]  ;;  %v1312_v22 = vld [vmem:[%s2314_s1 + $0x150] sm:$0xff] }
  0x17   : >> { %2405 = vst [vmem:[#allocation5_spill] sm:$0xff] %v1276_v16  ;;  %243 = vmatpush.msra.mxu1 %v1247_v11  ;;  %221 = vmatpush.msra.mxu0 %v1254_v12  ;;  %v1300_v20 = vld [vmem:[%s2314_s1 + $0x1d8] sm:$0xff]  ;;  %v1319_v23 = vld [vmem:[%s2314_s1 + $0x50] sm:$0xff]  ;;  %v1331_v25 = vld [vmem:[%s2314_s1 + $0xc8] sm:$0xff] }
  0x18   : >> { %332 = vmatpush.msra.mxu3 %v1264_v14  ;;  %286 = vmatpush.msra.mxu2 %v1259_v13  ;;  %2406 = vst [vmem:[#allocation6_spill] sm:$0xff] %v1300_v20  ;;  %v1324_v24 = vld [vmem:[%s2314_s1 + $0x1d0] sm:$0xff]  ;;  %v1336_v26 = vld [vmem:[%s2314_s1 + $0x148] sm:$0xff]  ;;  %v1355_v29 = vld [vmem:[%s2314_s1 + $0xc0] sm:$0xff] }
  0x19   : >> { %244 = vmatpush.msra.mxu1 %v1271_v15  ;;  %222 = vmatpush.msra.mxu0 %v1283_v17  ;;  %2407 = vst [vmem:[#allocation7_spill] sm:$0xff] %v1324_v24  ;;  %v1343_v27 = vld [vmem:[%s2314_s1 + $0x48] sm:$0xff]  ;;  %v1360_v30 = vld [vmem:[%s2314_s1 + $0x140] sm:$0xff]  ;;  %v1379_v33 = vld [vmem:[%s2314_s1 + $0xb8] sm:$0xff] }
  0x1a   : >> { %333 = vmatpush.msra.mxu3 %v1276_v16  ;;  %287 = vmatpush.msra.mxu2 %v1288_v18  ;;  %v1348_v28 = vld [vmem:[%s2314_s1 + $0x1c8] sm:$0xff]  ;;  %v1367_v31 = vld [vmem:[%s2314_s1 + $0x40] sm:$0xff]  ;;  %v1384_v34 = vld [vmem:[%s2314_s1 + $0x138] sm:$0xff] }
  0x1b   : >> { %245 = vmatpush.msra.mxu1 %v1295_v19  ;;  %223 = vmatpush.msra.mxu0 %v1307_v21  ;;  %2408 = vst [vmem:[#allocation8_spill] sm:$0xff] %v1348_v28  ;;  %v1372_v32 = vld [vmem:[%s2314_s1 + $0x1c0] sm:$0xff]  ;;  %v1391_v35 = vld [vmem:[%s2314_s1 + $0x38] sm:$0xff]  ;;  %v1403_v37 = vld [vmem:[%s2314_s1 + $0xb0] sm:$0xff] }
  0x1c   : >> { %334 = vmatpush.msra.mxu3 %v1300_v20  ;;  %288 = vmatpush.msra.mxu2 %v1312_v22  ;;  %2409 = vst [vmem:[#allocation9_spill] sm:$0xff] %v1372_v32  ;;  %v1396_v36 = vld [vmem:[%s2314_s1 + $0x1b8] sm:$0xff]  ;;  %v1408_v38 = vld [vmem:[%s2314_s1 + $0x130] sm:$0xff]  ;;  %v1427_v41 = vld [vmem:[%s2314_s1 + $0xa8] sm:$0xff] }
  0x1d   : >> { %246 = vmatpush.msra.mxu1 %v1319_v23  ;;  %224 = vmatpush.msra.mxu0 %v1331_v25  ;;  %2410 = vst [vmem:[#allocation10_spill] sm:$0xff] %v1396_v36  ;;  %v1415_v39 = vld [vmem:[%s2314_s1 + $0x30] sm:$0xff]  ;;  %v1432_v42 = vld [vmem:[%s2314_s1 + $0x128] sm:$0xff]  ;;  %v1451_v45 = vld [vmem:[%s2314_s1 + $0xa0] sm:$0xff] }
  0x1e   : >> { %335 = vmatpush.msra.mxu3 %v1324_v24  ;;  %289 = vmatpush.msra.mxu2 %v1336_v26  ;;  %v1420_v40 = vld [vmem:[%s2314_s1 + $0x1b0] sm:$0xff]  ;;  %v1439_v43 = vld [vmem:[%s2314_s1 + $0x28] sm:$0xff]  ;;  %v1456_v46 = vld [vmem:[%s2314_s1 + $0x120] sm:$0xff] }
  0x1f   : >> { %247 = vmatpush.msra.mxu1 %v1343_v27  ;;  %225 = vmatpush.msra.mxu0 %v1355_v29  ;;  %2411 = vst [vmem:[#allocation11_spill] sm:$0xff] %v1420_v40  ;;  %v1444_v44 = vld [vmem:[%s2314_s1 + $0x1a8] sm:$0xff]  ;;  %v1463_v47 = vld [vmem:[%s2314_s1 + $0x20] sm:$0xff]  ;;  %v1475_v49 = vld [vmem:[%s2314_s1 + $0x98] sm:$0xff] }
  0x20   : >> { %336 = vmatpush.msra.mxu3 %v1348_v28  ;;  %290 = vmatpush.msra.mxu2 %v1360_v30  ;;  %2412 = vst [vmem:[#allocation12_spill] sm:$0xff] %v1444_v44  ;;  %v1468_v48 = vld [vmem:[%s2314_s1 + $0x1a0] sm:$0xff]  ;;  %v1480_v50 = vld [vmem:[%s2314_s1 + $0x118] sm:$0xff]  ;;  %v1499_v53 = vld [vmem:[%s2314_s1 + $0x90] sm:$0xff] }
  0x21   : >> { %248 = vmatpush.msra.mxu1 %v1367_v31  ;;  %226 = vmatpush.msra.mxu0 %v1379_v33  ;;  %2413 = vst [vmem:[#allocation13_spill] sm:$0xff] %v1468_v48  ;;  %v1487_v51 = vld [vmem:[%s2314_s1 + $0x18] sm:$0xff]  ;;  %v1504_v54 = vld [vmem:[%s2314_s1 + $0x110] sm:$0xff]  ;;  %v1523_v57 = vld [vmem:[%s2314_s1 + $0x88] sm:$0xff] }
  0x22   : >> { %337 = vmatpush.msra.mxu3 %v1372_v32  ;;  %291 = vmatpush.msra.mxu2 %v1384_v34  ;;  %v1492_v52 = vld [vmem:[%s2314_s1 + $0x198] sm:$0xff]  ;;  %v1511_v55 = vld [vmem:[%s2314_s1 + $0x10] sm:$0xff]  ;;  %v1528_v58 = vld [vmem:[%s2314_s1 + $0x108] sm:$0xff] }
  0x23   : >> { %249 = vmatpush.msra.mxu1 %v1391_v35  ;;  %227 = vmatpush.msra.mxu0 %v1403_v37  ;;  %2414 = vst [vmem:[#allocation14_spill] sm:$0xff] %v1492_v52  ;;  %v1516_v56 = vld [vmem:[%s2314_s1 + $0x190] sm:$0xff]  ;;  %v1535_v59 = vld [vmem:[%s2314_s1 + $0x8] sm:$0xff]  ;;  %v1547_v61 = vld [vmem:[%s2314_s1 + $0x80] sm:$0xff] }
  0x24   : >> { %338 = vmatpush.msra.mxu3 %v1396_v36  ;;  %292 = vmatpush.msra.mxu2 %v1408_v38  ;;  %2415 = vst [vmem:[#allocation15_spill] sm:$0xff] %v1516_v56  ;;  %v1540_v60 = vld [vmem:[%s2314_s1 + $0x188] sm:$0xff]  ;;  %v1552_v62 = vld [vmem:[%s2314_s1 + $0x100] sm:$0xff]  ;;  %v1559_v63 = vld [vmem:[%s2314_s1 + $0x278] sm:$0xff] }
  0x25   : >> { %250 = vmatpush.msra.mxu1 %v1415_v39  ;;  %228 = vmatpush.msra.mxu0 %v1427_v41  ;;  %2416 = vst [vmem:[#allocation16_spill] sm:$0xff] %v1540_v60  ;;  %v1564_v0 = vld [vmem:[%s2314_s1 + $0x378] sm:$0xff]  ;;  %v1607_v36 = vld [vmem:[%s2314_s1 + $0x268] sm:$0xff]  ;;  %v1612_v32 = vld [vmem:[%s2314_s1 + $0x2f0] sm:$0xff] }
  0x26   : >> { %339 = vmatpush.msra.mxu3 %v1420_v40  ;;  %293 = vmatpush.msra.mxu2 %v1432_v42  ;;  %v1600_v40 = vld [vmem:[%s2314_s1 + $0x3f8] sm:$0xff]  ;;  %2421 = vst [vmem:[#allocation21_spill] sm:$0xff] %v1607_v36  ;;  %v1619_v28 = vld [vmem:[%s2314_s1 + $0x368] sm:$0xff]  ;;  %v1631_v24 = vld [vmem:[%s2314_s1 + $0x260] sm:$0xff] }
  0x27   : >> { %251 = vmatpush.msra.mxu1 %v1439_v43  ;;  %229 = vmatpush.msra.mxu0 %v1451_v45  ;;  %2420 = vst [vmem:[#allocation20_spill] sm:$0xff] %v1600_v40  ;;  %v1636_v20 = vld [vmem:[%s2314_s1 + $0x2e8] sm:$0xff]  ;;  %v1643_v16 = vld [vmem:[%s2314_s1 + $0x360] sm:$0xff]  ;;  %v1881_v14 = vld [vmem:[%s2314_s1 + $0x210] sm:$0xff] }
  0x28   : >> { %340 = vmatpush.msra.mxu3 %v1444_v44  ;;  %294 = vmatpush.msra.mxu2 %v1456_v46  ;;  %v1595_v44 = vld [vmem:[%s2314_s1 + $0x370] sm:$0xff]  ;;  %2422 = vst [vmem:[#allocation22_spill] sm:$0xff] %v1619_v28 }
  0x29   : >> { %252 = vmatpush.msra.mxu1 %v1463_v47  ;;  %230 = vmatpush.msra.mxu0 %v1475_v49  ;;  %2419 = vst [vmem:[#allocation19_spill] sm:$0xff] %v1595_v44 }
  0x2a   : >> { %341 = vmatpush.msra.mxu3 %v1468_v48  ;;  %295 = vmatpush.msra.mxu2 %v1480_v50  ;;  %v1583_v48 = vld [vmem:[%s2314_s1 + $0x270] sm:$0xff]  ;;  %2424 = vst [vmem:[#allocation24_spill] sm:$0xff] %v1631_v24 }
  0x2b   : >> { %253 = vmatpush.msra.mxu1 %v1487_v51  ;;  %231 = vmatpush.msra.mxu0 %v1499_v53  ;;  %2418 = vst [vmem:[#allocation18_spill] sm:$0xff] %v1583_v48 }
  0x2c   : >> { %342 = vmatpush.msra.mxu3 %v1492_v52  ;;  %296 = vmatpush.msra.mxu2 %v1504_v54  ;;  %v1576_v52 = vld [vmem:[%s2314_s1 + $0x180] sm:$0xff]  ;;  %2425 = vst [vmem:[#allocation25_spill] sm:$0xff] %v1636_v20 }
  0x2d   : >> { %254 = vmatpush.msra.mxu1 %v1511_v55  ;;  %232 = vmatpush.msra.mxu0 %v1523_v57  ;;  %2417 = vst [vmem:[#allocation17_spill] sm:$0xff] %v1576_v52 }
  0x2e   : >> { %343 = vmatpush.msra.mxu3 %v1516_v56  ;;  %297 = vmatpush.msra.mxu2 %v1528_v58  ;;  %v1571_v56 = vld [vmem:[%s2314_s1] sm:$0xff]  ;;  %2426 = vst [vmem:[#allocation26_spill] sm:$0xff] %v1643_v16 }
  0x2f   : >> { %255 = vmatpush.msra.mxu1 %v1535_v59  ;;  %233 = vmatpush.msra.mxu0 %v1547_v61  ;;  %2464 = vst [vmem:[#allocation64_spill] sm:$0xff] %v1881_v14 }
  0x30   : >> { %344 = vmatpush.msra.mxu3 %v1540_v60  ;;  %298 = vmatpush.msra.mxu2 %v1552_v62  ;;  %v1588_v60 = vld [vmem:[%s2314_s1 + $0x2f8] sm:$0xff] }
  0x31   : >> { %374 = vmatpush.msrb.mxu0 %v1559_v63  ;;  %256 = vmatpush.msra.mxu1 %v1571_v56 }
  0x32   : >> { %465 = vmatpush.msrb.mxu2 %v1564_v0  ;;  %345 = vmatpush.msra.mxu3 %v1576_v52  ;;  %v1624_v52 = vld [vmem:[%s2314_s1 + $0x3f0] sm:$0xff] }
  0x33   : >> { %375 = vmatpush.msrb.mxu0 %v1583_v48  ;;  %418 = vmatpush.msrb.mxu1 %v1588_v60  ;;  %2423 = vst [vmem:[#allocation23_spill] sm:$0xff] %v1624_v52  ;;  %v264_v48 = vld [vmem:[%s1820_s4 + $0x2] sm:$0xff] }
  0x34   : >> { %466 = vmatpush.msrb.mxu2 %v1595_v44  ;;  %509 = vmatpush.msrb.mxu3 %v1600_v40  ;;  %v1648_v40 = vld [vmem:[%s2314_s1 + $0x3e8] sm:$0xff]  ;;  %v1660_v44 = vld [vmem:[%s2314_s1 + $0x2e0] sm:$0xff] }
  0x35   : >> { %376 = vmatpush.msrb.mxu0 %v1607_v36  ;;  %419 = vmatpush.msrb.mxu1 %v1612_v32  ;;  %2427 = vst [vmem:[#allocation27_spill] sm:$0xff] %v1648_v40  ;;  %v1655_v36 = vld [vmem:[%s2314_s1 + $0x258] sm:$0xff] }
  0x36   : >> { %467 = vmatpush.msrb.mxu2 %v1619_v28  ;;  %510 = vmatpush.msrb.mxu3 %v1624_v52  ;;  %2428 = vst [vmem:[#allocation28_spill] sm:$0xff] %v1655_v36  ;;  %v1667_v28 = vld [vmem:[%s2314_s1 + $0x358] sm:$0xff]  ;;  %v1672_v52 = vld [vmem:[%s2314_s1 + $0x3e0] sm:$0xff] }
  0x37   : >> { %2429 = vst [vmem:[#allocation29_spill] sm:$0xff] %v1660_v44  ;;  %377 = vmatpush.msrb.mxu0 %v1631_v24  ;;  %420 = vmatpush.msrb.mxu1 %v1636_v20  ;;  %v1679_v24 = vld [vmem:[%s2314_s1 + $0x250] sm:$0xff]  ;;  %v1684_v20 = vld [vmem:[%s2314_s1 + $0x2d8] sm:$0xff] }
  0x38   : >> { %2430 = vst [vmem:[#allocation30_spill] sm:$0xff] %v1667_v28  ;;  %468 = vmatpush.msrb.mxu2 %v1643_v16  ;;  %511 = vmatpush.msrb.mxu3 %v1648_v40  ;;  %v1691_v16 = vld [vmem:[%s2314_s1 + $0x350] sm:$0xff]  ;;  %v1696_v40 = vld [vmem:[%s2314_s1 + $0x3d8] sm:$0xff] }
  0x39   : >> { %2431 = vst [vmem:[#allocation31_spill] sm:$0xff] %v1672_v52  ;;  %378 = vmatpush.msrb.mxu0 %v1655_v36  ;;  %421 = vmatpush.msrb.mxu1 %v1660_v44  ;;  %v1703_v36 = vld [vmem:[%s2314_s1 + $0x248] sm:$0xff]  ;;  %v1708_v44 = vld [vmem:[%s2314_s1 + $0x2d0] sm:$0xff] }
  0x3a   : >> { %2432 = vst [vmem:[#allocation32_spill] sm:$0xff] %v1679_v24  ;;  %469 = vmatpush.msrb.mxu2 %v1667_v28  ;;  %512 = vmatpush.msrb.mxu3 %v1672_v52  ;;  %v1715_v28 = vld [vmem:[%s2314_s1 + $0x348] sm:$0xff]  ;;  %v1720_v52 = vld [vmem:[%s2314_s1 + $0x3d0] sm:$0xff] }
  0x3b   : >> { %2433 = vst [vmem:[#allocation33_spill] sm:$0xff] %v1684_v20  ;;  %379 = vmatpush.msrb.mxu0 %v1679_v24  ;;  %422 = vmatpush.msrb.mxu1 %v1684_v20  ;;  %v1727_v24 = vld [vmem:[%s2314_s1 + $0x240] sm:$0xff]  ;;  %v1732_v20 = vld [vmem:[%s2314_s1 + $0x2c8] sm:$0xff] }
  0x3c   : >> { %2434 = vst [vmem:[#allocation34_spill] sm:$0xff] %v1691_v16  ;;  %470 = vmatpush.msrb.mxu2 %v1691_v16  ;;  %513 = vmatpush.msrb.mxu3 %v1696_v40  ;;  %v1739_v16 = vld [vmem:[%s2314_s1 + $0x340] sm:$0xff] }
  0x3d   : >> { %2435 = vst [vmem:[#allocation35_spill] sm:$0xff] %v1696_v40  ;;  %380 = vmatpush.msrb.mxu0 %v1703_v36  ;;  %423 = vmatpush.msrb.mxu1 %v1708_v44  ;;  %v1744_v40 = vld [vmem:[%s2314_s1 + $0x3c8] sm:$0xff] }
  0x3e   : >> { %2436 = vst [vmem:[#allocation36_spill] sm:$0xff] %v1703_v36  ;;  %471 = vmatpush.msrb.mxu2 %v1715_v28  ;;  %514 = vmatpush.msrb.mxu3 %v1720_v52  ;;  %v1751_v36 = vld [vmem:[%s2314_s1 + $0x238] sm:$0xff] }
  0x3f   : >> { %2437 = vst [vmem:[#allocation37_spill] sm:$0xff] %v1708_v44  ;;  %v1756_v44 = vld [vmem:[%s2314_s1 + $0x2c0] sm:$0xff]  ;;  %381 = vmatpush.msrb.mxu0 %v1727_v24  ;;  %424 = vmatpush.msrb.mxu1 %v1732_v20 }
  0x40   : >> { %2438 = vst [vmem:[#allocation38_spill] sm:$0xff] %v1715_v28  ;;  %v1763_v28 = vld [vmem:[%s2314_s1 + $0x338] sm:$0xff]  ;;  %472 = vmatpush.msrb.mxu2 %v1739_v16  ;;  %515 = vmatpush.msrb.mxu3 %v1744_v40 }
  0x41   : >> { %2439 = vst [vmem:[#allocation39_spill] sm:$0xff] %v1720_v52  ;;  %v1768_v52 = vld [vmem:[%s2314_s1 + $0x3c0] sm:$0xff]  ;;  %382 = vmatpush.msrb.mxu0 %v1751_v36  ;;  %425 = vmatpush.msrb.mxu1 %v1756_v44 }
  0x42   : >> { %2440 = vst [vmem:[#allocation40_spill] sm:$0xff] %v1727_v24  ;;  %v1775_v24 = vld [vmem:[%s2314_s1 + $0x230] sm:$0xff]  ;;  %473 = vmatpush.msrb.mxu2 %v1763_v28  ;;  %516 = vmatpush.msrb.mxu3 %v1768_v52 }
  0x43   : >> { %2441 = vst [vmem:[#allocation41_spill] sm:$0xff] %v1732_v20  ;;  %v1780_v20 = vld [vmem:[%s2314_s1 + $0x2b8] sm:$0xff]  ;;  %383 = vmatpush.msrb.mxu0 %v1775_v24  ;;  %299 = vmatmul.f32.vlgmr.msra.gmra.mxu2 %v264_v48  ;;  %v1893_v48 = vld [vmem:[%s2314_s1 + $0x310] sm:$0xff] }
  0x44   : >> { %2442 = vst [vmem:[#allocation42_spill] sm:$0xff] %v1739_v16  ;;  %v1793_v16 = vld [vmem:[%s2314_s1 + $0x3b8] sm:$0xff]  ;;  %426 = vmatpush.msrb.mxu1 %v1780_v20 }
  0x45   : >> { %2443 = vst [vmem:[#allocation43_spill] sm:$0xff] %v1744_v40  ;;  %v1788_v40 = vld [vmem:[%s2314_s1 + $0x330] sm:$0xff]  ;;  %517 = vmatpush.msrb.mxu3 %v1793_v16 }
  0x46   : >> { %2444 = vst [vmem:[#allocation44_spill] sm:$0xff] %v1751_v36  ;;  %v1800_v36 = vld [vmem:[%s2314_s1 + $0x228] sm:$0xff]  ;;  %474 = vmatpush.msrb.mxu2 %v1788_v40 }
  0x47   : >> { %2445 = vst [vmem:[#allocation45_spill] sm:$0xff] %v1756_v44  ;;  %v1805_v44 = vld [vmem:[%s2314_s1 + $0x2b0] sm:$0xff]  ;;  %384 = vmatpush.msrb.mxu0 %v1800_v36 }
  0x48   : >> { %2446 = vst [vmem:[#allocation46_spill] sm:$0xff] %v1763_v28  ;;  %v1812_v28 = vld [vmem:[%s2314_s1 + $0x328] sm:$0xff]  ;;  %427 = vmatpush.msrb.mxu1 %v1805_v44 }
  0x49   : >> { %2447 = vst [vmem:[#allocation47_spill] sm:$0xff] %v1768_v52  ;;  %v1817_v52 = vld [vmem:[%s2314_s1 + $0x3b0] sm:$0xff]  ;;  %475 = vmatpush.msrb.mxu2 %v1812_v28 }
  0x4a   : >> { %2448 = vst [vmem:[#allocation48_spill] sm:$0xff] %v1775_v24  ;;  %v1827_v24 = vld [vmem:[%s2314_s1 + $0x220] sm:$0xff]  ;;  %518 = vmatpush.msrb.mxu3 %v1817_v52 }
  0x4b   : >> { %2449 = vst [vmem:[#allocation49_spill] sm:$0xff] %v1780_v20  ;;  %v1832_v20 = vld [vmem:[%s2314_s1 + $0x2a8] sm:$0xff]  ;;  %385 = vmatpush.msrb.mxu0 %v1827_v24 }
  0x4c   : >> { %2450 = vst [vmem:[#allocation50_spill] sm:$0xff] %v1788_v40  ;;  %v1839_v40 = vld [vmem:[%s2314_s1 + $0x320] sm:$0xff]  ;;  %428 = vmatpush.msrb.mxu1 %v1832_v20 }
  0x4d   : >> { %2451 = vst [vmem:[#allocation51_spill] sm:$0xff] %v1793_v16  ;;  %v1844_v16 = vld [vmem:[%s2314_s1 + $0x3a8] sm:$0xff]  ;;  %476 = vmatpush.msrb.mxu2 %v1839_v40 }
  0x4e   : >> { %2452 = vst [vmem:[#allocation52_spill] sm:$0xff] %v1800_v36  ;;  %v1852_v36 = vld [vmem:[%s2314_s1 + $0x218] sm:$0xff]  ;;  %519 = vmatpush.msrb.mxu3 %v1844_v16 }
  0x4f   : >> { %2453 = vst [vmem:[#allocation53_spill] sm:$0xff] %v1805_v44  ;;  %v1859_v44 = vld [vmem:[%s2314_s1 + $0x2a0] sm:$0xff]  ;;  %386 = vmatpush.msrb.mxu0 %v1852_v36 }
  0x50   : >> { %2454 = vst [vmem:[#allocation54_spill] sm:$0xff] %v1812_v28  ;;  %v1864_v28 = vld [vmem:[%s2314_s1 + $0x318] sm:$0xff]  ;;  %429 = vmatpush.msrb.mxu1 %v1859_v44 }
  0x51   : >> { %2455 = vst [vmem:[#allocation55_spill] sm:$0xff] %v1817_v52  ;;  %v1871_v52 = vld [vmem:[%s2314_s1 + $0x3a0] sm:$0xff]  ;;  %477 = vmatpush.msrb.mxu2 %v1864_v28  ;;  %387 = vmatpush.msrb.mxu0 %v1881_v14  ;;  %v1924_v14 = vld [vmem:[%s2314_s1 + $0x390] sm:$0xff] }
  0x52   : >> { %2456 = vst [vmem:[#allocation56_spill] sm:$0xff] %v1827_v24  ;;  %v199_v24 = vld [vmem:[%s1820_s4 + $0x1] sm:$0xff]  ;;  %520 = vmatpush.msrb.mxu3 %v1871_v52 }
  0x53   : >> { %2457 = vst [vmem:[#allocation57_spill] sm:$0xff] %v1832_v20  ;;  %v1876_v20 = vld [vmem:[%s1820_s4 + $0x10] sm:$0xff]  ;;  %234 = vmatmul.f32.vlgmr.msra.gmra.mxu0 %v199_v24  ;;  %478 = vmatpush.msrb.mxu2 %v1893_v48 }
  0x54   : >> { %2458 = vst [vmem:[#allocation58_spill] sm:$0xff] %v1839_v40  ;;  %v181_v40 = vld [vmem:[%s1820_s4] sm:$0xff]  ;;  %346 = vmatmul.f32.vlgmr.msra.gmra.mxu3 %v1876_v20  ;;  %v1912_v24 = vld [vmem:[%s2314_s1 + $0x290] sm:$0xff] }
  0x55   : >> { %2459 = vst [vmem:[#allocation59_spill] sm:$0xff] %v1844_v16  ;;  %v1888_v16 = vld [vmem:[%s2314_s1 + $0x298] sm:$0xff]  ;;  %257 = vmatmul.f32.vlgmr.msra.gmra.mxu1 %v181_v40  ;;  %v1942_v40 = vld [vmem:[%s2314_s1 + $0x300] sm:$0xff] }
  0x56   : >> { %2460 = vst [vmem:[#allocation60_spill] sm:$0xff] %v1852_v36  ;;  %v1899_v36 = vld [vmem:[%s2314_s1 + $0x398] sm:$0xff]  ;;  %430 = vmatpush.msrb.mxu1 %v1888_v16 }
  0x57   : >> { %2461 = vst [vmem:[#allocation61_spill] sm:$0xff] %v1859_v44  ;;  %521 = vmatpush.msrb.mxu3 %v1899_v36  ;;  %v1930_v44 = vld [vmem:[%s2314_s1 + $0x200] sm:$0xff] }
  0x58   : >> { %2462 = vst [vmem:[#allocation62_spill] sm:$0xff] %v1864_v28  ;;  %v1907_v28 = vld [vmem:[%s2314_s1 + $0x208] sm:$0xff]  ;;  %431 = vmatpush.msrb.mxu1 %v1912_v24 }
  0x59   : >> { %2463 = vst [vmem:[#allocation63_spill] sm:$0xff] %v1871_v52  ;;  %v1919_v52 = vld [vmem:[%s2314_s1 + $0x308] sm:$0xff]  ;;  %388 = vmatpush.msrb.mxu0 %v1907_v28  ;;  %522 = vmatpush.msrb.mxu3 %v1924_v14 }
  0x5a   : >> { %2465 = vst [vmem:[#allocation65_spill] sm:$0xff] %v1888_v16  ;;  %479 = vmatpush.msrb.mxu2 %v1919_v52  ;;  %v265_v16 = vld [vmem:[%s1820_s4 + $0xa] sm:$0x7] }
  0x5b   : >> { %2466 = vst [vmem:[#allocation66_spill] sm:$0xff] %v1893_v48  ;;  %v1935_v48 = vld [vmem:[%s2314_s1 + $0x288] sm:$0xff]  ;;  %389 = vmatpush.msrb.mxu0 %v1930_v44  ;;  %302 = vmatmul.f32.gmra.mxu2 %v265_v16 }
  0x5c   : >> { %2467 = vst [vmem:[#allocation67_spill] sm:$0xff] %v1899_v36  ;;  %v1947_v36 = vld [vmem:[%s2314_s1 + $0x388] sm:$0xff]  ;;  %432 = vmatpush.msrb.mxu1 %v1935_v48  ;;  %480 = vmatpush.msrb.mxu2 %v1942_v40 }
  0x5d   : >> { %2468 = vst [vmem:[#allocation68_spill] sm:$0xff] %v1907_v28  ;;  %v1955_v28 = vld [vmem:[%s2314_s1 + $0x478] sm:$0xff]  ;;  %523 = vmatpush.msrb.mxu3 %v1947_v36  ;;  %v1990_v16 = vld [vmem:[%s2314_s1 + $0x468] sm:$0xff] }
  0x5e   : >> { %2469 = vst [vmem:[#allocation69_spill] sm:$0xff] %v1912_v24  ;;  %v1962_v24 = vld [vmem:[%s2314_s1 + $0x280] sm:$0xff]  ;;  %553 = vmatpush.msra.mxu0 %v1955_v28  ;;  %608 = vmatpush.msra.mxu2 %v1208_v4 }
  0x5f   : >> { %2470 = vst [vmem:[#allocation70_spill] sm:$0xff] %v1919_v52  ;;  %v200_v52 = vld [vmem:[%s1820_s4 + $0x9] sm:$0x7]  ;;  %433 = vmatpush.msrb.mxu1 %v1962_v24  ;;  %v1998_v4 = vld [vmem:[%s2314_s1 + $0x460] sm:$0xff] }
  0x60   : >> { %2471 = vst [vmem:[#allocation71_spill] sm:$0xff] %v1924_v14  ;;  %v1969_v14 = vld [vmem:[%s2314_s1 + $0x380] sm:$0xff]  ;;  %237 = vmatmul.f32.gmra.mxu0 %v200_v52  ;;  %609 = vmatpush.msra.mxu2 %v1230_v8  ;;  %v2027_v8 = vld [vmem:[%s2314_s1 + $0x450] sm:$0xff]  ;;  %v2496_v52 = vld [vmem:[#allocation36_spill] sm:$0xff] }
  0x61   : >> { %2472 = vst [vmem:[#allocation72_spill] sm:$0xff] %v1930_v44  ;;  %v1974_v44 = vld [vmem:[%s1820_s4 + $0x18] sm:$0x7]  ;;  %524 = vmatpush.msrb.mxu3 %v1969_v14  ;;  %585 = vmatpush.msra.mxu1 %v1191_v1  ;;  %v2005_v1 = vld [vmem:[%s1820_s4 + $0x20] sm:$0xff] }
  0x62   : >> { %2473 = vst [vmem:[#allocation73_spill] sm:$0xff] %v1935_v48  ;;  %v1979_v48 = vld [vmem:[%s2314_s1 + $0x470] sm:$0xff]  ;;  %349 = vmatmul.f32.gmra.mxu3 %v1974_v44  ;;  %610 = vmatpush.msra.mxu2 %v1247_v11  ;;  %v2050_v11 = vld [vmem:[%s2314_s1 + $0x440] sm:$0xff] }
  0x63   : >> { %2474 = vst [vmem:[#allocation74_spill] sm:$0xff] %v1947_v36  ;;  %v182_v36 = vld [vmem:[%s1820_s4 + $0x8] sm:$0x7]  ;;  %554 = vmatpush.msra.mxu0 %v1979_v48  ;;  %631 = vmatpush.msra.mxu3 %v1196_v2  ;;  %v2010_v2 = vld [vmem:[%s2314_s1 + $0x458] sm:$0xff] }
  0x64   : >> { %260 = vmatmul.f32.gmra.mxu1 %v182_v36  ;;  %611 = vmatpush.msra.mxu2 %v1271_v15  ;;  %v2077_v15 = vld [vmem:[%s2314_s1 + $0x428] sm:$0xff]  ;;  %v2481_v36 = vld [vmem:[#allocation29_spill] sm:$0xff] }
  0x65   : >> { %555 = vmatpush.msra.mxu0 %v1990_v16  ;;  %586 = vmatpush.msra.mxu1 %v1201_v3  ;;  %v2017_v3 = vld [vmem:[%s1820_s4 + $0x11] sm:$0xff] }
  0x66   : >> { %632 = vmatpush.msra.mxu3 %v1213_v5  ;;  %481 = vmatmul.f32.vlgmr.msrb.gmra.mxu2 %v2005_v1  ;;  %v2022_v5 = vld [vmem:[%s1820_s4 + $0x21] sm:$0xff] }
  0x67   : >> { %556 = vmatpush.msra.mxu0 %v1998_v4  ;;  %587 = vmatpush.msra.mxu1 %v1225_v7  ;;  %v2034_v7 = vld [vmem:[%s1820_s4 + $0x12] sm:$0xff] }
  0x68   : >> { %633 = vmatpush.msra.mxu3 %v1235_v9  ;;  %612 = vmatpush.msra.mxu2 %v1295_v19  ;;  %v2041_v9 = vld [vmem:[%s2314_s1 + $0x448] sm:$0xff]  ;;  %v2100_v19 = vld [vmem:[%s2314_s1 + $0x418] sm:$0xff] }
  0x69   : >> { %557 = vmatpush.msra.mxu0 %v2010_v2  ;;  %588 = vmatpush.msra.mxu1 %v1254_v12  ;;  %v2059_v12 = vld [vmem:[%s2314_s1 + $0x438] sm:$0xff] }
  0x6a   : >> { %634 = vmatpush.msra.mxu3 %v1259_v13  ;;  %390 = vmatmul.f32.vlgmr.msrb.gmra.mxu0 %v2017_v3  ;;  %v2068_v13 = vld [vmem:[%s2314_s1 + $0x430] sm:$0xff] }
  0x6b   : >> { %525 = vmatmul.f32.vlgmr.msrb.gmra.mxu3 %v2022_v5  ;;  %558 = vmatpush.msra.mxu0 %v2027_v8 }
  0x6c   : >> { %589 = vmatpush.msra.mxu1 %v1283_v17  ;;  %613 = vmatpush.msra.mxu2 %v1319_v23  ;;  %v2086_v17 = vld [vmem:[%s2314_s1 + $0x420] sm:$0xff] }
  0x6d   : >> { %635 = vmatpush.msra.mxu3 %v1288_v18  ;;  %434 = vmatmul.f32.vlgmr.msrb.gmra.mxu1 %v2034_v7  ;;  %v2093_v18 = vld [vmem:[%s1820_s4 + $0x19] sm:$0x7]  ;;  %v2127_v23 = vld [vmem:[%s2314_s1 + $0x400] sm:$0xff] }
  0x6e   : >> { %559 = vmatpush.msra.mxu0 %v2041_v9  ;;  %590 = vmatpush.msra.mxu1 %v1307_v21  ;;  %v2109_v21 = vld [vmem:[%s2314_s1 + $0x410] sm:$0xff] }
  0x6f   : >> { %614 = vmatpush.msra.mxu2 %v1343_v27  ;;  %636 = vmatpush.msra.mxu3 %v1312_v22  ;;  %v2118_v22 = vld [vmem:[%s2314_s1 + $0x408] sm:$0xff] }
  0x70   : >> { %560 = vmatpush.msra.mxu0 %v2050_v11  ;;  %591 = vmatpush.msra.mxu1 %v1331_v25  ;;  %v2132_v25 = vld [vmem:[%s1820_s4 + $0x28] sm:$0x7] }
  0x71   : >> { %615 = vmatpush.msra.mxu2 %v1367_v31  ;;  %637 = vmatpush.msra.mxu3 %v1336_v26  ;;  %v2137_v26 = vld [vmem:[%s1820_s4 + $0x22] sm:$0xff] }
  0x72   : >> { %561 = vmatpush.msra.mxu0 %v2059_v12  ;;  %592 = vmatpush.msra.mxu1 %v1355_v29  ;;  %v2146_v27 = vld [vmem:[%s1820_s4 + $0x29] sm:$0x7]  ;;  %v2153_v29 = vld [vmem:[%s1820_s4 + $0x1a] sm:$0x7]  ;;  %v2477_v31 = vld [vmem:[#allocation25_spill] sm:$0xff] }
  0x73   : >> { %616 = vmatpush.msra.mxu2 %v1391_v35  ;;  %638 = vmatpush.msra.mxu3 %v1360_v30  ;;  %v2476_v30 = vld [vmem:[#allocation18_spill] sm:$0xff]  ;;  %v2480_v35 = vld [vmem:[#allocation21_spill] sm:$0xff] }
  0x74   : >> { %562 = vmatpush.msra.mxu0 %v2068_v13  ;;  %593 = vmatpush.msra.mxu1 %v1379_v33  ;;  %v2478_v33 = vld [vmem:[#allocation19_spill] sm:$0xff] }
  0x75   : >> { %617 = vmatpush.msra.mxu2 %v1415_v39  ;;  %639 = vmatpush.msra.mxu3 %v1384_v34  ;;  %v2479_v34 = vld [vmem:[#allocation5_spill] sm:$0xff]  ;;  %v2486_v39 = vld [vmem:[#allocation26_spill] sm:$0xff] }
  0x76   : >> { %563 = vmatpush.msra.mxu0 %v2077_v15  ;;  %594 = vmatpush.msra.mxu1 %v1403_v37  ;;  %v2484_v37 = vld [vmem:[#allocation24_spill] sm:$0xff] }
  0x77   : >> { %618 = vmatpush.msra.mxu2 %v1439_v43  ;;  %640 = vmatpush.msra.mxu3 %v1408_v38  ;;  %v2485_v38 = vld [vmem:[#allocation33_spill] sm:$0xff] }
  0x78   : >> { %564 = vmatpush.msra.mxu0 %v2086_v17  ;;  %595 = vmatpush.msra.mxu1 %v1427_v41  ;;  %v2487_v41 = vld [vmem:[#allocation7_spill] sm:$0xff]  ;;  %v2489_v43 = vld [vmem:[#allocation37_spill] sm:$0xff] }
  0x79   : >> { %619 = vmatpush.msra.mxu2 %v1463_v47  ;;  %641 = vmatpush.msra.mxu3 %v1432_v42  ;;  %v2488_v42 = vld [vmem:[#allocation28_spill] sm:$0xff] }
  0x7a   : >> { %393 = vmatmul.f32.gmra.mxu0 %v2093_v18  ;;  %596 = vmatpush.msra.mxu1 %v1451_v45  ;;  %v2490_v45 = vld [vmem:[#allocation30_spill] sm:$0xff]  ;;  %v2492_v47 = vld [vmem:[#allocation32_spill] sm:$0xff] }
  0x7b   : >> { %565 = vmatpush.msra.mxu0 %v2100_v19  ;;  %620 = vmatpush.msra.mxu2 %v1487_v51  ;;  %v2495_v51 = vld [vmem:[#allocation9_spill] sm:$0xff] }
  0x7c   : >> { %642 = vmatpush.msra.mxu3 %v1456_v46  ;;  %597 = vmatpush.msra.mxu1 %v1475_v49  ;;  %v2491_v46 = vld [vmem:[#allocation8_spill] sm:$0xff]  ;;  %v2493_v49 = vld [vmem:[#allocation41_spill] sm:$0xff] }
  0x7d   : >> { %566 = vmatpush.msra.mxu0 %v2109_v21  ;;  %621 = vmatpush.msra.mxu2 %v1511_v55  ;;  %v2499_v55 = vld [vmem:[#allocation10_spill] sm:$0xff] }
  0x7e   : >> { %643 = vmatpush.msra.mxu3 %v1480_v50  ;;  %598 = vmatpush.msra.mxu1 %v1499_v53  ;;  %v2494_v50 = vld [vmem:[#allocation34_spill] sm:$0xff]  ;;  %v2497_v53 = vld [vmem:[#allocation45_spill] sm:$0xff] }
  0x7f   : >> { %567 = vmatpush.msra.mxu0 %v2118_v22  ;;  %622 = vmatpush.msra.mxu2 %v1535_v59  ;;  %v2503_v59 = vld [vmem:[#allocation11_spill] sm:$0xff] }
  0x80   : >> { %644 = vmatpush.msra.mxu3 %v1504_v54  ;;  %599 = vmatpush.msra.mxu1 %v1523_v57  ;;  %v2498_v54 = vld [vmem:[#allocation38_spill] sm:$0xff]  ;;  %v2501_v57 = vld [vmem:[#allocation49_spill] sm:$0xff] }
  0x81   : >> { %568 = vmatpush.msra.mxu0 %v2127_v23  ;;  %623 = vmatpush.msra.mxu2 %v1571_v56  ;;  %v2500_v56 = vld [vmem:[#allocation40_spill] sm:$0xff] }
  0x82   : >> { %645 = vmatpush.msra.mxu3 %v1528_v58  ;;  %484 = vmatmul.f32.gmra.mxu2 %v2132_v25  ;;  %v2502_v58 = vld [vmem:[#allocation42_spill] sm:$0xff] }
  0x83   : >> { %569 = vmatmul.f32.vlgmr.msra.gmra.mxu0 %v2137_v26  ;;  %706 = vmatpush.msrb.mxu2 %v1588_v60  ;;  %v2504_v60 = vld [vmem:[#allocation44_spill] sm:$0xff] }
  0x84   : >> { %656 = vmatpush.msrb.mxu0 %v1218_v6  ;;  %600 = vmatpush.msra.mxu1 %v1547_v61  ;;  %v2475_v6 = vld [vmem:[#allocation4_spill] sm:$0xff]  ;;  %v2505_v61 = vld [vmem:[#allocation53_spill] sm:$0xff] }
  0x85   : >> { %646 = vmatpush.msra.mxu3 %v1552_v62  ;;  %707 = vmatpush.msrb.mxu2 %v1612_v32  ;;  %v2482_v32 = vld [vmem:[#allocation22_spill] sm:$0xff] }
  0x86   : >> { %681 = vmatpush.msrb.mxu1 %v1559_v63  ;;  %528 = vmatmul.f32.gmra.mxu3 %v2146_v27  ;;  %v2506_v62 = vld [vmem:[#allocation46_spill] sm:$0xff]  ;;  %v2507_v63 = vld [vmem:[#allocation12_spill] sm:$0xff] }
  0x87   : >> { %657 = vmatpush.msrb.mxu0 %v1242_v10  ;;  %736 = vmatpush.msrb.mxu3 %v1564_v0  ;;  %v2168_v10 = vld [vmem:[%s1820_s4 + $0x2a] sm:$0x7] }
  0x88   : >> { %437 = vmatmul.f32.gmra.mxu1 %v2153_v29  ;;  %708 = vmatpush.msrb.mxu2 %v2477_v31  ;;  %v2483_v0 = vld [vmem:[#allocation6_spill] sm:$0xff] }
  0x89   : >> { %658 = vmatpush.msrb.mxu0 %v2475_v6  ;;  %682 = vmatpush.msrb.mxu1 %v2476_v30  ;;  %v2508_v6 = vld [vmem:[#allocation48_spill] sm:$0xff]  ;;  %v2509_v30 = vld [vmem:[#allocation57_spill] sm:$0xff]  ;;  %v2510_v31 = vld [vmem:[#allocation50_spill] sm:$0xff] }
  0x8a   : >> { %737 = vmatpush.msrb.mxu3 %v2478_v33  ;;  %709 = vmatpush.msrb.mxu2 %v2481_v36  ;;  %v2511_v33 = vld [vmem:[#allocation13_spill] sm:$0xff]  ;;  %v2514_v36 = vld [vmem:[#allocation54_spill] sm:$0xff] }
  0x8b   : >> { %659 = vmatpush.msrb.mxu0 %v2479_v34  ;;  %683 = vmatpush.msrb.mxu1 %v2480_v35  ;;  %v2512_v34 = vld [vmem:[#allocation52_spill] sm:$0xff]  ;;  %v2513_v35 = vld [vmem:[#allocation61_spill] sm:$0xff] }
  0x8c   : >> { %738 = vmatpush.msrb.mxu3 %v2482_v32  ;;  %710 = vmatpush.msrb.mxu2 %v2485_v38  ;;  %v2515_v32 = vld [vmem:[#allocation14_spill] sm:$0xff] }
  0x8d   : >> { %660 = vmatpush.msrb.mxu0 %v2483_v0  ;;  %684 = vmatpush.msrb.mxu1 %v2484_v37  ;;  %v2516_v0 = vld [vmem:[#allocation56_spill] sm:$0xff]  ;;  %v2517_v37 = vld [vmem:[#allocation65_spill] sm:$0xff]  ;;  %v2518_v38 = vld [vmem:[#allocation58_spill] sm:$0xff] }
  0x8e   : >> { %739 = vmatpush.msrb.mxu3 %v2486_v39  ;;  %572 = vmatmul.f32.gmra.mxu0 %v2168_v10  ;;  %v2520_v39 = vld [vmem:[#allocation60_spill] sm:$0xff] }
  0x8f   : >> { %661 = vmatpush.msrb.mxu0 %v2487_v41  ;;  %685 = vmatpush.msrb.mxu1 %v2488_v42  ;;  %v2521_v41 = vld [vmem:[#allocation69_spill] sm:$0xff]  ;;  %v2522_v42 = vld [vmem:[#allocation62_spill] sm:$0xff] }
  0x90   : >> { %711 = vmatpush.msrb.mxu2 %v2489_v43  ;;  %740 = vmatpush.msrb.mxu3 %v2490_v45  ;;  %v2523_v43 = vld [vmem:[#allocation16_spill] sm:$0xff] }
  0x91   : >> { %662 = vmatpush.msrb.mxu0 %v2491_v46  ;;  %686 = vmatpush.msrb.mxu1 %v2492_v47  ;;  %v2524_v45 = vld [vmem:[#allocation64_spill] sm:$0xff]  ;;  %v2526_v46 = vld [vmem:[#allocation66_spill] sm:$0xff]  ;;  %v2527_v47 = vld [vmem:[#allocation17_spill] sm:$0xff] }
  0x92   : >> { %712 = vmatpush.msrb.mxu2 %v2493_v49  ;;  %741 = vmatpush.msrb.mxu3 %v2494_v50  ;;  %v2529_v49 = vld [vmem:[#allocation70_spill] sm:$0xff]  ;;  %v2530_v50 = vld [vmem:[#allocation20_spill] sm:$0xff] }
  0x93   : >> { %663 = vmatpush.msrb.mxu0 %v2495_v51  ;;  %687 = vmatpush.msrb.mxu1 %v2496_v52  ;;  %v2531_v51 = vld [vmem:[#allocation72_spill] sm:$0xff]  ;;  %v2532_v52 = vld [vmem:[#allocation23_spill] sm:$0xff] }
  0x94   : >> { %713 = vmatpush.msrb.mxu2 %v2497_v53  ;;  %742 = vmatpush.msrb.mxu3 %v2498_v54 }
  0x95   : >> { %664 = vmatpush.msrb.mxu0 %v2499_v55  ;;  %688 = vmatpush.msrb.mxu1 %v2500_v56 }
  0x96   : >> { %714 = vmatpush.msrb.mxu2 %v2501_v57  ;;  %743 = vmatpush.msrb.mxu3 %v2502_v58 }
  0x97   : >> { %665 = vmatpush.msrb.mxu0 %v2503_v59  ;;  %689 = vmatpush.msrb.mxu1 %v2504_v60 }
  0x98   : >> { %715 = vmatpush.msrb.mxu2 %v2505_v61  ;;  %744 = vmatpush.msrb.mxu3 %v2506_v62 }
  0x99   : >> { %666 = vmatpush.msrb.mxu0 %v2507_v63  ;;  %690 = vmatpush.msrb.mxu1 %v2508_v6 }
  0x9a   : >> { %716 = vmatpush.msrb.mxu2 %v2509_v30  ;;  %745 = vmatpush.msrb.mxu3 %v2510_v31 }
  0x9b   : >> { %624 = vmatmul.f32.vlgmr.msra.gmra.mxu2 %v1876_v20  ;;  %667 = vmatpush.msrb.mxu0 %v2511_v33  ;;  %v2519_v20 = vld [vmem:[#allocation15_spill] sm:$0xff] }
  0x9c   : >> { %691 = vmatpush.msrb.mxu1 %v2512_v34  ;;  %717 = vmatpush.msrb.mxu2 %v2513_v35 }
  0x9d   : >> { %746 = vmatpush.msrb.mxu3 %v2514_v36  ;;  %668 = vmatpush.msrb.mxu0 %v2515_v32 }
  0x9e   : >> { %647 = vmatmul.f32.vlgmr.msra.gmra.mxu3 %v2034_v7  ;;  %692 = vmatpush.msrb.mxu1 %v2516_v0  ;;  %v2525_v7 = vld [vmem:[#allocation73_spill] sm:$0xff] }
  0x9f   : >> { %718 = vmatpush.msrb.mxu2 %v2517_v37  ;;  %747 = vmatpush.msrb.mxu3 %v2518_v38 }
  0xa0   : >> { %601 = vmatmul.f32.vlgmr.msra.gmra.mxu1 %v2017_v3  ;;  %669 = vmatpush.msrb.mxu0 %v2519_v20  ;;  %v2528_v3 = vld [vmem:[#allocation68_spill] sm:$0xff] }
  0xa1   : >> { %693 = vmatpush.msrb.mxu1 %v2520_v39  ;;  %719 = vmatpush.msrb.mxu2 %v2521_v41 }
  0xa2   : >> { %748 = vmatpush.msrb.mxu3 %v2522_v42  ;;  %670 = vmatpush.msrb.mxu0 %v2523_v43 }
  0xa3   : >> { %694 = vmatpush.msrb.mxu1 %v2524_v45  ;;  %720 = vmatpush.msrb.mxu2 %v2525_v7 }
  0xa4   : >> { %749 = vmatpush.msrb.mxu3 %v2526_v46  ;;  %627 = vmatmul.f32.gmra.mxu2 %v1974_v44  ;;  %v2533_v44 = vld [vmem:[#allocation27_spill] sm:$0xff] }
  0xa5   : >> { %671 = vmatpush.msrb.mxu0 %v2527_v47  ;;  %695 = vmatpush.msrb.mxu1 %v2528_v3 }
  0xa6   : >> { %721 = vmatpush.msrb.mxu2 %v1962_v24  ;;  %750 = vmatpush.msrb.mxu3 %v2529_v49  ;;  %v2534_v24 = vld [vmem:[#allocation31_spill] sm:$0xff] }
  0xa7   : >> { %763 = vmatpush.msra.mxu0 %v2530_v50  ;;  %650 = vmatmul.f32.gmra.mxu3 %v2153_v29 }
  0xa8   : >> { %1074 = vmatpush.msra.mxu2 %v2530_v50  ;;  %696 = vmatpush.msrb.mxu1 %v2531_v51 }
  0xa9   : >> { %751 = vmatpush.msrb.mxu3 %v1942_v40  ;;  %764 = vmatpush.msra.mxu0 %v2532_v52  ;;  %v1061_v40 = vld [vmem:[%s1820_s4 + $0x30] sm:$0xff] }
  0xaa   : >> { %1075 = vmatpush.msra.mxu2 %v2532_v52  ;;  %790 = vmatpush.msra.mxu1 %v1955_v28 }
  0xab   : >> { %1090 = vmatpush.msra.mxu3 %v1955_v28  ;;  %604 = vmatmul.f32.gmra.mxu1 %v2093_v18  ;;  %v2535_v28 = vld [vmem:[#allocation35_spill] sm:$0xff]  ;;  %v1064_v18 = vld [vmem:[%s1820_s4 + $0x39] sm:$0x7] }
  0xac   : >> { %765 = vmatpush.msra.mxu0 %v2533_v44  ;;  %1076 = vmatpush.msra.mxu2 %v2533_v44 }
  0xad   : >> { %791 = vmatpush.msra.mxu1 %v1979_v48  ;;  %1091 = vmatpush.msra.mxu3 %v1979_v48  ;;  %v2536_v48 = vld [vmem:[#allocation39_spill] sm:$0xff] }
  0xae   : >> { %766 = vmatpush.msra.mxu0 %v2534_v24  ;;  %1077 = vmatpush.msra.mxu2 %v2534_v24 }
  0xaf   : >> { %792 = vmatpush.msra.mxu1 %v1990_v16  ;;  %1092 = vmatpush.msra.mxu3 %v1990_v16  ;;  %v2537_v16 = vld [vmem:[#allocation43_spill] sm:$0xff] }
  0xb0   : >> { %722 = vmatmul.f32.vlgmr.msrb.gmra.mxu2 %v2137_v26  ;;  %767 = vmatpush.msra.mxu0 %v2535_v28 }
  0xb1   : >> { %1078 = vmatpush.msra.mxu2 %v2535_v28  ;;  %793 = vmatpush.msra.mxu1 %v1998_v4 }
  0xb2   : >> { %1093 = vmatpush.msra.mxu3 %v1998_v4  ;;  %672 = vmatmul.f32.vlgmr.msrb.gmra.mxu0 %v2005_v1  ;;  %v2538_v4 = vld [vmem:[#allocation47_spill] sm:$0xff] }
  0xb3   : >> { %752 = vmatmul.f32.vlgmr.msrb.gmra.mxu3 %v1061_v40  ;;  %768 = vmatpush.msra.mxu0 %v2536_v48  ;;  %v2539_v1 = vld [vmem:[#allocation51_spill] sm:$0xff] }
  0xb4   : >> { %1079 = vmatpush.msra.mxu2 %v2536_v48  ;;  %794 = vmatpush.msra.mxu1 %v2010_v2 }
  0xb5   : >> { %1094 = vmatpush.msra.mxu3 %v2010_v2  ;;  %697 = vmatmul.f32.vlgmr.msrb.gmra.mxu1 %v2022_v5  ;;  %v1062_v2 = vld [vmem:[%s1820_s4 + $0x38] sm:$0x7]  ;;  %v2540_v5 = vld [vmem:[#allocation55_spill] sm:$0xff] }
  0xb6   : >> { %769 = vmatpush.msra.mxu0 %v2537_v16  ;;  %1080 = vmatpush.msra.mxu2 %v2537_v16 }
  0xb7   : >> { %795 = vmatpush.msra.mxu1 %v2027_v8  ;;  %1095 = vmatpush.msra.mxu3 %v2027_v8  ;;  %v2541_v8 = vld [vmem:[#allocation59_spill] sm:$0xff] }
  0xb8   : >> { %770 = vmatpush.msra.mxu0 %v2538_v4  ;;  %1081 = vmatpush.msra.mxu2 %v2538_v4 }
  0xb9   : >> { %796 = vmatpush.msra.mxu1 %v2041_v9  ;;  %1096 = vmatpush.msra.mxu3 %v2041_v9  ;;  %v2542_v9 = vld [vmem:[#allocation63_spill] sm:$0xff] }
  0xba   : >> { %725 = vmatmul.f32.gmra.mxu2 %v2168_v10  ;;  %771 = vmatpush.msra.mxu0 %v2539_v1 }
  0xbb   : >> { %1082 = vmatpush.msra.mxu2 %v2539_v1  ;;  %797 = vmatpush.msra.mxu1 %v2050_v11 }
  0xbc   : >> { %1097 = vmatpush.msra.mxu3 %v2050_v11  ;;  %675 = vmatmul.f32.gmra.mxu0 %v2132_v25  ;;  %v2543_v11 = vld [vmem:[#allocation67_spill] sm:$0xff] }
  0xbd   : >> { %755 = vmatmul.f32.gmra.mxu3 %v1062_v2  ;;  %772 = vmatpush.msra.mxu0 %v2540_v5 }
  0xbe   : >> { %1083 = vmatpush.msra.mxu2 %v2540_v5  ;;  %798 = vmatpush.msra.mxu1 %v2059_v12  ;;  %v2546_v5 = vld [vmem:[#allocation3_spill] sm:$0xff] }
  0xbf   : >> { %1098 = vmatpush.msra.mxu3 %v2059_v12  ;;  %700 = vmatmul.f32.gmra.mxu1 %v2146_v27  ;;  %v2544_v12 = vld [vmem:[#allocation71_spill] sm:$0xff] }
  0xc0   : >> { %773 = vmatpush.msra.mxu0 %v2541_v8  ;;  %1084 = vmatpush.msra.mxu2 %v2541_v8  ;;  %v579_v8 = vperm.slane %v2546_v5, 0 }
  0xc1   : >> { %799 = vmatpush.msra.mxu1 %v2068_v13  ;;  %1099 = vmatpush.msra.mxu3 %v2068_v13  ;;  %v2545_v13 = vld [vmem:[#allocation74_spill] sm:$0xff] }
  0xc2   : >> { %774 = vmatpush.msra.mxu0 %v2542_v9  ;;  %1085 = vmatpush.msra.mxu2 %v2542_v9 }
  0xc3   : >> { %800 = vmatpush.msra.mxu1 %v2077_v15  ;;  %1100 = vmatpush.msra.mxu3 %v2077_v15  ;;  %v1063_v15 = vld [vmem:[%s1820_s4 + $0x31] sm:$0xff] }
  0xc4   : >> { %775 = vmatpush.msra.mxu0 %v2543_v11  ;;  %1086 = vmatpush.msra.mxu2 %v2543_v11 }
  0xc5   : >> { %801 = vmatpush.msra.mxu1 %v2086_v17  ;;  %1101 = vmatpush.msra.mxu3 %v2086_v17  ;;  %v1065_v17 = vld [vmem:[%s1820_s4 + $0x32] sm:$0xff] }
  0xc6   : >> { %776 = vmatpush.msra.mxu0 %v2544_v12  ;;  %1087 = vmatpush.msra.mxu2 %v2544_v12  ;;  %v300_v26 = vpop.f32.mrf.mxu2 }
  0xc7   : >> { %802 = vmatpush.msra.mxu1 %v2100_v19  ;;  %1102 = vmatpush.msra.mxu3 %v2100_v19  ;;  %v1066_v19 = vld [vmem:[%s1820_s4 + $0x3a] sm:$0x7]  ;;  %s1067_s4 = sshll.u32 %s1138_s24, 3  ;;  %s177_s24 = sadd.s32 1, %s1138_s24  }
  0xc8   : >> { %777 = vmatpush.msra.mxu0 %v2545_v13  ;;  %1088 = vmatpush.msra.mxu2 %v2545_v13  ;;  %s828_s16 = scalar_lea.vmem %s1181_s23, %s1067_s4  ;;  %p174_p4 = scmp.ge.s32.totalorder %s177_s24, 5  }
  0xc9   : >> { %803 = vmatpush.msra.mxu1 %v2109_v21  ;;  %1103 = vmatpush.msra.mxu3 %v2109_v21 }
  0xca   : >> { %778 = vmatpush.msra.mxu0 %v1969_v14  ;;  %1089 = vmatpush.msra.mxu2 %v1969_v14 }
  0xcb   : >> { %804 = vmatpush.msra.mxu1 %v2118_v22  ;;  %1104 = vmatpush.msra.mxu3 %v2118_v22 }
  0xcc   : >> { %779 = vmatmul.f32.vlgmr.msra.gmra.mxu0 %v1063_v15  ;;  %782 = vmatmul.f32.vlgmr.msra.gmra.mxu2 %v1064_v18 }
  0xcd   : >> { %805 = vmatpush.msra.mxu1 %v2127_v23  ;;  %1105 = vmatpush.msra.mxu3 %v2127_v23 }
  0xce   : >> { %806 = vmatmul.f32.vlgmr.msra.gmra.mxu1 %v1065_v17  ;;  %809 = vmatmul.f32.vlgmr.msra.gmra.mxu3 %v1066_v19 }
  0xd0   : >> { %v235_v21 = vpop.f32.mrf.mxu0 }
  0xd2   : >> { %v258_v25 = vpop.f32.mrf.mxu1 }
  0xd3   : >> { %v259_v30 = vadd.f32 %v258_v25, %v235_v21 }
  0xd5   : >> { %v306_v33 = vadd.f32 %v300_v26, %v259_v30 }
  0xd7   : >> { %v347_v27 = vpop.f32.mrf.mxu3 }
  0xd8   : >> { %v353_v37 = vadd.f32 %v347_v27, %v306_v33 }
  0xdd   : >> { %v238_v29 = vpop.f32.mrf.mxu0 }
  0xde   : >> { %v303_v10 = vpop.f32.mrf.mxu2 }
  0xe1   : >> { %v261_v14 = vpop.f32.mrf.mxu1 }
  0xe2   : >> { %v262_v34 = vadd.f32 %v261_v14, %v238_v29 }
  0xe4   : >> { %v307_v38 = vadd.f32 %v303_v10, %v262_v34 }
  0xe5   : >> { %v350_v53 = vpop.f32.mrf.mxu3 }
  0xe6   : >> { %v354_v41 = vadd.f32 %v350_v53, %v307_v38 }
  0xe7   : >> { %v391_v54 = vpop.f32.mrf.mxu0 }
  0xe8   : >> { %v397_v42 = vadd.f32 %v391_v54, %v353_v37 }
  0xe9   : >> { %v482_v55 = vpop.f32.mrf.mxu2 }
  0xea   : >> { %v435_v22 = vpop.f32.mrf.mxu1 }
  0xeb   : >> { %v441_v46 = vadd.f32 %v435_v22, %v397_v42 }
  0xed   : >> { %v488_v52 = vadd.f32 %v482_v55, %v441_v46 }
  0xee   : >> { %v526_v56 = vpop.f32.mrf.mxu3 }
  0xef   : >> { %v532_v48 = vadd.f32 %v526_v56, %v488_v52 }
  0xf7   : >> { %v394_v57 = vpop.f32.mrf.mxu0 }
  0xf8   : >> { %v398_v47 = vadd.f32 %v394_v57, %v354_v41 }
 0x100   : >> { %v570_v61 = vpop.f32.mrf.mxu0 }
 0x101   : >> { %v576_v2 = vadd.f32 %v570_v61, %v532_v48 }
 0x103   : >> { %v581_v19 = vadd.f32 %v579_v8, %v576_v2 }
 0x105   : >> { %v438_v58 = vpop.f32.mrf.mxu1  ;;  %v485_v59 = vpop.f32.mrf.mxu2  ;;  %v583_v14 = vmax.f32 %v581_v19, 0.0 }
 0x106   : >> { %v442_v44 = vadd.f32 %v438_v58, %v398_v47 }
 0x108   : >> { %v489_v16 = vadd.f32 %v485_v59, %v442_v44 }
 0x109   : >> { %v529_v60 = vpop.f32.mrf.mxu3 }
 0x10a   : >> { %v533_v13 = vadd.f32 %v529_v60, %v489_v16 }
 0x10b   : >> { %v573_v6 = vpop.f32.mrf.mxu0 }
 0x10c   : >> { %v577_v25 = vadd.f32 %v573_v6, %v533_v13 }
 0x10e   : >> { %v582_v22 = vadd.f32 %v579_v8, %v577_v25 }
 0x110   : >> { %v584_v58 = vmax.f32 %v582_v22, 0.0 }
 0x11d   : >> { %v602_v23 = vpop.f32.mrf.mxu1 }
 0x11e   : >> { %v625_v62 = vpop.f32.mrf.mxu2 }
 0x11f   : >> { %v626_v36 = vadd.f32 %v625_v62, %v602_v23 }
 0x121   : >> { %v648_v63 = vpop.f32.mrf.mxu3 }
 0x122   : >> { %v654_v20 = vadd.f32 %v648_v63, %v626_v36 }
 0x127   : >> { %v628_v35 = vpop.f32.mrf.mxu2 }
 0x128   : >> { %v605_v31 = vpop.f32.mrf.mxu1 }
 0x129   : >> { %v629_v43 = vadd.f32 %v628_v35, %v605_v31 }
 0x12a   : >> { %v651_v32 = vpop.f32.mrf.mxu3 }
 0x12b   : >> { %v655_v3 = vadd.f32 %v651_v32, %v629_v43 }
 0x12f   : >> { %v673_v0 = vpop.f32.mrf.mxu0 }
 0x130   : >> { %v679_v45 = vadd.f32 %v673_v0, %v654_v20 }
 0x132   : >> { %v698_v39 = vpop.f32.mrf.mxu1 }
 0x133   : >> { %v723_v7 = vpop.f32.mrf.mxu2  ;;  %v704_v51 = vadd.f32 %v698_v39, %v679_v45 }
 0x135   : >> { %v729_v40 = vadd.f32 %v723_v7, %v704_v51 }
 0x136   : >> { %v753_v49 = vpop.f32.mrf.mxu3 }
 0x137   : >> { %v759_v9 = vadd.f32 %v753_v49, %v729_v40 }
 0x139   : >> { %v676_v50 = vpop.f32.mrf.mxu0 }
 0x13a   : >> { %v680_v24 = vadd.f32 %v676_v50, %v655_v3 }
 0x13c   : >> { %v701_v28 = vpop.f32.mrf.mxu1 }
 0x13d   : >> { %v705_v4 = vadd.f32 %v701_v28, %v680_v24  ;;  %v726_v1 = vpop.f32.mrf.mxu2 }
 0x13f   : >> { %v730_v15 = vadd.f32 %v726_v1, %v705_v4 }
 0x140   : >> { %v756_v11 = vpop.f32.mrf.mxu3 }
 0x141   : >> { %v760_v26 = vadd.f32 %v756_v11, %v730_v15 }
 0x149   : >> { %v780_v12 = vpop.f32.mrf.mxu0 }
 0x14a   : >> { %v786_v18 = vadd.f32 %v780_v12, %v759_v9 }
 0x14b   : >> { %v807_v17 = vpop.f32.mrf.mxu1 }
 0x14c   : >> { %v813_v21 = vadd.f32 %v807_v17, %v786_v18 }
 0x14e   : >> { %v815_v27 = vadd.f32 %v813_v21, %v579_v8 }
 0x14f   : >> { %v783_v29 = vpop.f32.mrf.mxu2 }
 0x150   : >> { %v817_v10 = vmax.f32 %v815_v27, 0.0  ;;  %v787_v53 = vadd.f32 %v783_v29, %v760_v26 }
 0x151   : >> { %v810_v54 = vpop.f32.mrf.mxu3 }
 0x152   : >> { %v819_v55 = vmax.f32 %v583_v14, %v817_v10  ;;  %v814_v56 = vadd.f32 %v810_v54, %v787_v53 }
 0x154   : >> { %821 = vst [vmem:[#allocation2] sm:$0xff] %v819_v55  ;;  %v816_v57 = vadd.f32 %v814_v56, %v579_v8 }
 0x156   : >> { %v818_v59 = vmax.f32 %v816_v57, 0.0 }
 0x158   : >> { %v820_v60 = vmax.f32 %v584_v58, %v818_v59 }
 0x15a   : >> { %822 = vst [vmem:[#allocation2 + $0x8] sm:$0x7] %v820_v60 }
 0x160   : > { %176 = sbr.rel (!%p174_p4) target bundleno = 16 (0x10), region = 83 }
 0x161   : >> { %v823_v61 = vld [vmem:[#allocation2] ss:$2 sm:$0x1f]  ;;  %v825_v23 = vld [vmem:[#allocation2 + $0x1] ss:$2 sm:$0x1f] }
 0x162   : >> { %v826_v62 = vmax.f32 %v823_v61, %v825_v23 }
 0x164   : >> { %829 = vst [vmem:[%s828_s16] sm:$0x1f] %v826_v62 }
 0x165 PF: > { %s13_s12 = sadd.s32 1, %s1134_s12  }
 0x166   : > { %p10_p5 = scmp.ge.s32.totalorder %s13_s12, 4  }
 0x168   :  { %12 = sbr.rel (!%p10_p5) target bundleno = 1 (0x1), region = 94 }

// kernel: mnist_cnn_forward.7
= control target key start
LH: loop header
LB: loop body
LE: loop exit
PB: predicated region body
PF: predicated region fallthrough
CT: control target
= control target key end

     0   :  { %s951_s1 = inlined_call_operand.vmem [shape: f32[1152,128], index: 1, kind: input, shape index: {}]   ;;  %s952_s2 = inlined_call_operand.vmem [shape: f32[1,128], index: 2, kind: input, shape index: {}]   ;;  %s953_s0 = inlined_call_operand.vmem [shape: f32[8,1152], index: 0, kind: input, shape index: {}]   ;;  %s954_s4 = inlined_call_operand.vmem [shape: f32[1,128], index: 4, kind: input, shape index: {}]   ;;  %s955_s3 = inlined_call_operand.vmem [shape: f32[128,128], index: 3, kind: input, shape index: {}]   ;;  %s956_s5 = inlined_call_operand.vmem [shape: f32[8,128], index: 5, kind: output, shape index: {}]  }
   0x1   :  { %v44_v0 = vld [vmem:[%s951_s1 + $0x78] sm:$0xff]  ;;  %v43_v1 = vld [vmem:[%s951_s1 + $0x70] sm:$0xff]  ;;  %v42_v3 = vld [vmem:[%s951_s1 + $0x68] sm:$0xff] }
   0x2   :  { %177 = vmatpush.msra.mxu0 %v44_v0  ;;  %v76_v2 = vld [vmem:[%s951_s1 + $0x178] sm:$0xff]  ;;  %v75_v4 = vld [vmem:[%s951_s1 + $0x170] sm:$0xff]  ;;  %v74_v7 = vld [vmem:[%s951_s1 + $0x168] sm:$0xff] }
   0x3   :  { %217 = vmatpush.msra.mxu2 %v76_v2  ;;  %v92_v5 = vld [vmem:[%s951_s1 + $0x1f8] sm:$0xff]  ;;  %v91_v8 = vld [vmem:[%s951_s1 + $0x1f0] sm:$0xff]  ;;  %v41_v9 = vld [vmem:[%s951_s1 + $0x60] sm:$0xff] }
   0x4   :  { %178 = vmatpush.msra.mxu0 %v43_v1  ;;  %237 = vmatpush.msra.mxu3 %v92_v5  ;;  %v60_v6 = vld [vmem:[%s951_s1 + $0xf8] sm:$0xff]  ;;  %v59_v10 = vld [vmem:[%s951_s1 + $0xf0] sm:$0xff]  ;;  %v73_v11 = vld [vmem:[%s951_s1 + $0x160] sm:$0xff] }
   0x5   :  { %218 = vmatpush.msra.mxu2 %v75_v4  ;;  %197 = vmatpush.msra.mxu1 %v60_v6  ;;  %v90_v12 = vld [vmem:[%s951_s1 + $0x1e8] sm:$0xff]  ;;  %v40_v14 = vld [vmem:[%s951_s1 + $0x58] sm:$0xff]  ;;  %v89_v15 = vld [vmem:[%s951_s1 + $0x1e0] sm:$0xff] }
   0x6   :  { %179 = vmatpush.msra.mxu0 %v42_v3  ;;  %238 = vmatpush.msra.mxu3 %v91_v8  ;;  %v58_v13 = vld [vmem:[%s951_s1 + $0xe8] sm:$0xff]  ;;  %v72_v16 = vld [vmem:[%s951_s1 + $0x158] sm:$0xff]  ;;  %v57_v17 = vld [vmem:[%s951_s1 + $0xe0] sm:$0xff] }
   0x7   :  { %219 = vmatpush.msra.mxu2 %v74_v7  ;;  %198 = vmatpush.msra.mxu1 %v59_v10  ;;  %v39_v18 = vld [vmem:[%s951_s1 + $0x50] sm:$0xff]  ;;  %v88_v19 = vld [vmem:[%s951_s1 + $0x1d8] sm:$0xff]  ;;  %v38_v22 = vld [vmem:[%s951_s1 + $0x48] sm:$0xff] }
   0x8   :  { %180 = vmatpush.msra.mxu0 %v41_v9  ;;  %239 = vmatpush.msra.mxu3 %v90_v12  ;;  %v71_v20 = vld [vmem:[%s951_s1 + $0x150] sm:$0xff]  ;;  %v56_v21 = vld [vmem:[%s951_s1 + $0xd8] sm:$0xff]  ;;  %v70_v24 = vld [vmem:[%s951_s1 + $0x148] sm:$0xff] }
   0x9   :  { %220 = vmatpush.msra.mxu2 %v73_v11  ;;  %199 = vmatpush.msra.mxu1 %v58_v13  ;;  %v87_v23 = vld [vmem:[%s951_s1 + $0x1d0] sm:$0xff]  ;;  %v37_v26 = vld [vmem:[%s951_s1 + $0x40] sm:$0xff]  ;;  %v86_v27 = vld [vmem:[%s951_s1 + $0x1c8] sm:$0xff] }
   0xa   :  { %181 = vmatpush.msra.mxu0 %v40_v14  ;;  %240 = vmatpush.msra.mxu3 %v89_v15  ;;  %v55_v25 = vld [vmem:[%s951_s1 + $0xd0] sm:$0xff]  ;;  %v69_v28 = vld [vmem:[%s951_s1 + $0x140] sm:$0xff]  ;;  %v54_v29 = vld [vmem:[%s951_s1 + $0xc8] sm:$0xff] }
   0xb   :  { %221 = vmatpush.msra.mxu2 %v72_v16  ;;  %200 = vmatpush.msra.mxu1 %v57_v17  ;;  %v36_v30 = vld [vmem:[%s951_s1 + $0x38] sm:$0xff]  ;;  %v85_v31 = vld [vmem:[%s951_s1 + $0x1c0] sm:$0xff]  ;;  %v35_v34 = vld [vmem:[%s951_s1 + $0x30] sm:$0xff] }
   0xc   :  { %182 = vmatpush.msra.mxu0 %v39_v18  ;;  %241 = vmatpush.msra.mxu3 %v88_v19  ;;  %v68_v32 = vld [vmem:[%s951_s1 + $0x138] sm:$0xff]  ;;  %v53_v33 = vld [vmem:[%s951_s1 + $0xc0] sm:$0xff]  ;;  %v67_v36 = vld [vmem:[%s951_s1 + $0x130] sm:$0xff] }
   0xd   :  { %222 = vmatpush.msra.mxu2 %v71_v20  ;;  %201 = vmatpush.msra.mxu1 %v56_v21  ;;  %v84_v35 = vld [vmem:[%s951_s1 + $0x1b8] sm:$0xff]  ;;  %v34_v38 = vld [vmem:[%s951_s1 + $0x28] sm:$0xff]  ;;  %v83_v39 = vld [vmem:[%s951_s1 + $0x1b0] sm:$0xff] }
   0xe   :  { %183 = vmatpush.msra.mxu0 %v38_v22  ;;  %242 = vmatpush.msra.mxu3 %v87_v23  ;;  %v52_v37 = vld [vmem:[%s951_s1 + $0xb8] sm:$0xff]  ;;  %v66_v40 = vld [vmem:[%s951_s1 + $0x128] sm:$0xff]  ;;  %v51_v41 = vld [vmem:[%s951_s1 + $0xb0] sm:$0xff] }
   0xf   :  { %223 = vmatpush.msra.mxu2 %v70_v24  ;;  %202 = vmatpush.msra.mxu1 %v55_v25  ;;  %v33_v42 = vld [vmem:[%s951_s1 + $0x20] sm:$0xff]  ;;  %v82_v43 = vld [vmem:[%s951_s1 + $0x1a8] sm:$0xff]  ;;  %v32_v46 = vld [vmem:[%s951_s1 + $0x18] sm:$0xff] }
  0x10   :  { %184 = vmatpush.msra.mxu0 %v37_v26  ;;  %243 = vmatpush.msra.mxu3 %v86_v27  ;;  %v65_v44 = vld [vmem:[%s951_s1 + $0x120] sm:$0xff]  ;;  %v50_v45 = vld [vmem:[%s951_s1 + $0xa8] sm:$0xff]  ;;  %v64_v48 = vld [vmem:[%s951_s1 + $0x118] sm:$0xff] }
  0x11   :  { %224 = vmatpush.msra.mxu2 %v69_v28  ;;  %203 = vmatpush.msra.mxu1 %v54_v29  ;;  %v81_v47 = vld [vmem:[%s951_s1 + $0x1a0] sm:$0xff]  ;;  %v31_v50 = vld [vmem:[%s951_s1 + $0x10] sm:$0xff]  ;;  %v80_v51 = vld [vmem:[%s951_s1 + $0x198] sm:$0xff] }
  0x12   :  { %185 = vmatpush.msra.mxu0 %v36_v30  ;;  %244 = vmatpush.msra.mxu3 %v85_v31  ;;  %v49_v49 = vld [vmem:[%s951_s1 + $0xa0] sm:$0xff]  ;;  %v63_v52 = vld [vmem:[%s951_s1 + $0x110] sm:$0xff]  ;;  %v48_v53 = vld [vmem:[%s951_s1 + $0x98] sm:$0xff] }
  0x13   :  { %225 = vmatpush.msra.mxu2 %v68_v32  ;;  %204 = vmatpush.msra.mxu1 %v53_v33  ;;  %v30_v54 = vld [vmem:[%s951_s1 + $0x8] sm:$0xff]  ;;  %v79_v55 = vld [vmem:[%s951_s1 + $0x190] sm:$0xff]  ;;  %v29_v58 = vld [vmem:[%s951_s1] sm:$0xff] }
  0x14   :  { %186 = vmatpush.msra.mxu0 %v35_v34  ;;  %245 = vmatpush.msra.mxu3 %v84_v35  ;;  %v62_v56 = vld [vmem:[%s951_s1 + $0x108] sm:$0xff]  ;;  %v47_v57 = vld [vmem:[%s951_s1 + $0x90] sm:$0xff]  ;;  %v108_v60 = vld [vmem:[%s951_s1 + $0x278] sm:$0xff] }
  0x15   :  { %226 = vmatpush.msra.mxu2 %v67_v36  ;;  %205 = vmatpush.msra.mxu1 %v52_v37  ;;  %v78_v59 = vld [vmem:[%s951_s1 + $0x188] sm:$0xff]  ;;  %v61_v61 = vld [vmem:[%s951_s1 + $0x100] sm:$0xff]  ;;  %v140_v62 = vld [vmem:[%s951_s1 + $0x378] sm:$0xff] }
  0x16   :  { %187 = vmatpush.msra.mxu0 %v34_v38  ;;  %246 = vmatpush.msra.mxu3 %v83_v39  ;;  %v46_v63 = vld [vmem:[%s951_s1 + $0x88] sm:$0xff]  ;;  %v107_v0 = vld [vmem:[%s951_s1 + $0x270] sm:$0xff]  ;;  %v77_v1 = vld [vmem:[%s951_s1 + $0x180] sm:$0xff] }
  0x17   :  { %227 = vmatpush.msra.mxu2 %v66_v40  ;;  %206 = vmatpush.msra.mxu1 %v51_v41  ;;  %v139_v2 = vld [vmem:[%s951_s1 + $0x370] sm:$0xff]  ;;  %v156_v3 = vld [vmem:[%s951_s1 + $0x3f8] sm:$0xff]  ;;  %v106_v4 = vld [vmem:[%s951_s1 + $0x268] sm:$0xff] }
  0x18   :  { %188 = vmatpush.msra.mxu0 %v33_v42  ;;  %247 = vmatpush.msra.mxu3 %v82_v43  ;;  %v45_v5 = vld [vmem:[%s951_s1 + $0x80] sm:$0xff]  ;;  %v124_v6 = vld [vmem:[%s951_s1 + $0x2f8] sm:$0xff]  ;;  %v138_v7 = vld [vmem:[%s951_s1 + $0x368] sm:$0xff] }
  0x19   :  { %228 = vmatpush.msra.mxu2 %v65_v44  ;;  %207 = vmatpush.msra.mxu1 %v50_v45  ;;  %v105_v8 = vld [vmem:[%s951_s1 + $0x260] sm:$0xff]  ;;  %v155_v9 = vld [vmem:[%s951_s1 + $0x3f0] sm:$0xff]  ;;  %v104_v12 = vld [vmem:[%s951_s1 + $0x258] sm:$0xff] }
  0x1a   :  { %189 = vmatpush.msra.mxu0 %v32_v46  ;;  %248 = vmatpush.msra.mxu3 %v81_v47  ;;  %v123_v10 = vld [vmem:[%s951_s1 + $0x2f0] sm:$0xff]  ;;  %v137_v11 = vld [vmem:[%s951_s1 + $0x360] sm:$0xff]  ;;  %v154_v13 = vld [vmem:[%s951_s1 + $0x3e8] sm:$0xff] }
  0x1b   :  { %229 = vmatpush.msra.mxu2 %v64_v48  ;;  %208 = vmatpush.msra.mxu1 %v49_v49  ;;  %v122_v14 = vld [vmem:[%s951_s1 + $0x2e8] sm:$0xff]  ;;  %v136_v15 = vld [vmem:[%s951_s1 + $0x358] sm:$0xff]  ;;  %v103_v16 = vld [vmem:[%s951_s1 + $0x250] sm:$0xff] }
  0x1c   :  { %190 = vmatpush.msra.mxu0 %v31_v50  ;;  %249 = vmatpush.msra.mxu3 %v80_v51  ;;  %v153_v17 = vld [vmem:[%s951_s1 + $0x3e0] sm:$0xff]  ;;  %v135_v19 = vld [vmem:[%s951_s1 + $0x350] sm:$0xff]  ;;  %v102_v20 = vld [vmem:[%s951_s1 + $0x248] sm:$0xff] }
  0x1d   :  { %230 = vmatpush.msra.mxu2 %v63_v52  ;;  %209 = vmatpush.msra.mxu1 %v48_v53  ;;  %v121_v18 = vld [vmem:[%s951_s1 + $0x2e0] sm:$0xff]  ;;  %v152_v21 = vld [vmem:[%s951_s1 + $0x3d8] sm:$0xff]  ;;  %v134_v23 = vld [vmem:[%s951_s1 + $0x348] sm:$0xff] }
  0x1e   :  { %191 = vmatpush.msra.mxu0 %v30_v54  ;;  %250 = vmatpush.msra.mxu3 %v79_v55  ;;  %v120_v22 = vld [vmem:[%s951_s1 + $0x2d8] sm:$0xff]  ;;  %v101_v24 = vld [vmem:[%s951_s1 + $0x240] sm:$0xff]  ;;  %v151_v25 = vld [vmem:[%s951_s1 + $0x3d0] sm:$0xff] }
  0x1f   :  { %231 = vmatpush.msra.mxu2 %v62_v56  ;;  %210 = vmatpush.msra.mxu1 %v47_v57  ;;  %v119_v26 = vld [vmem:[%s951_s1 + $0x2d0] sm:$0xff]  ;;  %v133_v27 = vld [vmem:[%s951_s1 + $0x340] sm:$0xff]  ;;  %v100_v28 = vld [vmem:[%s951_s1 + $0x238] sm:$0xff] }
  0x20   :  { %192 = vmatpush.msra.mxu0 %v29_v58  ;;  %251 = vmatpush.msra.mxu3 %v78_v59  ;;  %v150_v29 = vld [vmem:[%s951_s1 + $0x3c8] sm:$0xff]  ;;  %v132_v31 = vld [vmem:[%s951_s1 + $0x338] sm:$0xff]  ;;  %v99_v32 = vld [vmem:[%s951_s1 + $0x230] sm:$0xff] }
  0x21   :  { %232 = vmatpush.msra.mxu2 %v61_v61  ;;  %211 = vmatpush.msra.mxu1 %v46_v63  ;;  %v118_v30 = vld [vmem:[%s951_s1 + $0x2c8] sm:$0xff]  ;;  %v149_v33 = vld [vmem:[%s951_s1 + $0x3c0] sm:$0xff]  ;;  %v131_v35 = vld [vmem:[%s951_s1 + $0x330] sm:$0xff] }
  0x22   :  { %257 = vmatpush.msrb.mxu0 %v108_v60  ;;  %252 = vmatpush.msra.mxu3 %v77_v1  ;;  %v117_v34 = vld [vmem:[%s951_s1 + $0x2c0] sm:$0xff]  ;;  %v98_v36 = vld [vmem:[%s951_s1 + $0x228] sm:$0xff]  ;;  %v148_v37 = vld [vmem:[%s951_s1 + $0x3b8] sm:$0xff] }
  0x23   :  { %297 = vmatpush.msrb.mxu2 %v140_v62  ;;  %212 = vmatpush.msra.mxu1 %v45_v5  ;;  %v116_v38 = vld [vmem:[%s951_s1 + $0x2b8] sm:$0xff]  ;;  %v130_v39 = vld [vmem:[%s951_s1 + $0x328] sm:$0xff]  ;;  %v97_v40 = vld [vmem:[%s951_s1 + $0x220] sm:$0xff] }
  0x24   :  { %258 = vmatpush.msrb.mxu0 %v107_v0  ;;  %317 = vmatpush.msrb.mxu3 %v156_v3  ;;  %v147_v41 = vld [vmem:[%s951_s1 + $0x3b0] sm:$0xff]  ;;  %v129_v43 = vld [vmem:[%s951_s1 + $0x320] sm:$0xff]  ;;  %v96_v44 = vld [vmem:[%s951_s1 + $0x218] sm:$0xff] }
  0x25   :  { %298 = vmatpush.msrb.mxu2 %v139_v2  ;;  %277 = vmatpush.msrb.mxu1 %v124_v6  ;;  %v115_v42 = vld [vmem:[%s951_s1 + $0x2b0] sm:$0xff]  ;;  %v146_v45 = vld [vmem:[%s951_s1 + $0x3a8] sm:$0xff]  ;;  %v128_v49 = vld [vmem:[%s951_s1 + $0x318] sm:$0xff] }
  0x26   :  { %259 = vmatpush.msrb.mxu0 %v106_v4  ;;  %318 = vmatpush.msrb.mxu3 %v155_v9  ;;  %v22_v46 = vld [vmem:[%s953_s0 + $0x10] sm:$0xff]  ;;  %v114_v47 = vld [vmem:[%s951_s1 + $0x2a8] sm:$0xff]  ;;  %v145_v50 = vld [vmem:[%s951_s1 + $0x3a0] sm:$0xff] }
  0x27   :  { %299 = vmatpush.msrb.mxu2 %v138_v7  ;;  %278 = vmatpush.msrb.mxu1 %v123_v10  ;;  %v95_v48 = vld [vmem:[%s951_s1 + $0x210] sm:$0xff]  ;;  %v20_v51 = vld [vmem:[%s953_s0] sm:$0xff]  ;;  %v94_v52 = vld [vmem:[%s951_s1 + $0x208] sm:$0xff] }
  0x28   :  { %260 = vmatpush.msrb.mxu0 %v105_v8  ;;  %319 = vmatpush.msrb.mxu3 %v154_v13  ;;  %v23_v53 = vld [vmem:[%s953_s0 + $0x18] sm:$0xff]  ;;  %v113_v54 = vld [vmem:[%s951_s1 + $0x2a0] sm:$0xff]  ;;  %v127_v55 = vld [vmem:[%s951_s1 + $0x310] sm:$0xff] }
  0x29   :  { %300 = vmatpush.msrb.mxu2 %v137_v11  ;;  %279 = vmatpush.msrb.mxu1 %v122_v14  ;;  %v93_v56 = vld [vmem:[%s951_s1 + $0x200] sm:$0xff]  ;;  %v144_v57 = vld [vmem:[%s951_s1 + $0x398] sm:$0xff]  ;;  %v21_v59 = vld [vmem:[%s953_s0 + $0x8] sm:$0xff] }
  0x2a   :  { %261 = vmatpush.msrb.mxu0 %v104_v12  ;;  %320 = vmatpush.msrb.mxu3 %v153_v17  ;;  %v172_v58 = vld [vmem:[%s951_s1 + $0x478] sm:$0xff]  ;;  %v126_v61 = vld [vmem:[%s951_s1 + $0x308] sm:$0xff]  ;;  %v171_v62 = vld [vmem:[%s951_s1 + $0x470] sm:$0xff] }
  0x2b   :  { %301 = vmatpush.msrb.mxu2 %v136_v15  ;;  %280 = vmatpush.msrb.mxu1 %v121_v18  ;;  %v112_v60 = vld [vmem:[%s951_s1 + $0x298] sm:$0xff]  ;;  %v143_v63 = vld [vmem:[%s951_s1 + $0x390] sm:$0xff]  ;;  %v125_v1 = vld [vmem:[%s951_s1 + $0x300] sm:$0xff] }
  0x2c   :  { %262 = vmatpush.msrb.mxu0 %v103_v16  ;;  %321 = vmatpush.msrb.mxu3 %v152_v21  ;;  %v111_v0 = vld [vmem:[%s951_s1 + $0x290] sm:$0xff]  ;;  %v170_v2 = vld [vmem:[%s951_s1 + $0x468] sm:$0xff]  ;;  %v169_v6 = vld [vmem:[%s951_s1 + $0x460] sm:$0xff] }
  0x2d   :  { %302 = vmatpush.msrb.mxu2 %v135_v19  ;;  %281 = vmatpush.msrb.mxu1 %v120_v22  ;;  %v142_v3 = vld [vmem:[%s951_s1 + $0x388] sm:$0xff]  ;;  %v26_v4 = vld [vmem:[%s953_s0 + $0x30] sm:$0xff]  ;;  %v141_v7 = vld [vmem:[%s951_s1 + $0x380] sm:$0xff] }
  0x2e   :  { %263 = vmatpush.msrb.mxu0 %v102_v20  ;;  %322 = vmatpush.msrb.mxu3 %v151_v25  ;;  %v110_v5 = vld [vmem:[%s951_s1 + $0x288] sm:$0xff]  ;;  %v24_v8 = vld [vmem:[%s953_s0 + $0x20] sm:$0xff]  ;;  %v27_v9 = vld [vmem:[%s953_s0 + $0x38] sm:$0xff] }
  0x2f   :  { %303 = vmatpush.msrb.mxu2 %v134_v23  ;;  %282 = vmatpush.msrb.mxu1 %v119_v26  ;;  %v168_v10 = vld [vmem:[%s951_s1 + $0x458] sm:$0xff]  ;;  %v109_v11 = vld [vmem:[%s951_s1 + $0x280] sm:$0xff]  ;;  %v25_v12 = vld [vmem:[%s953_s0 + $0x28] sm:$0xff] }
  0x30   :  { %264 = vmatpush.msrb.mxu0 %v101_v24  ;;  %323 = vmatpush.msrb.mxu3 %v150_v29  ;;  %v167_v13 = vld [vmem:[%s951_s1 + $0x450] sm:$0xff]  ;;  %v166_v14 = vld [vmem:[%s951_s1 + $0x448] sm:$0xff]  ;;  %v165_v15 = vld [vmem:[%s951_s1 + $0x440] sm:$0xff] }
  0x31   :  { %304 = vmatpush.msrb.mxu2 %v133_v27  ;;  %283 = vmatpush.msrb.mxu1 %v118_v30  ;;  %v164_v16 = vld [vmem:[%s951_s1 + $0x438] sm:$0xff]  ;;  %v163_v17 = vld [vmem:[%s951_s1 + $0x430] sm:$0xff]  ;;  %v162_v18 = vld [vmem:[%s951_s1 + $0x428] sm:$0xff] }
  0x32   :  { %265 = vmatpush.msrb.mxu0 %v100_v28  ;;  %324 = vmatpush.msrb.mxu3 %v149_v33  ;;  %v161_v19 = vld [vmem:[%s951_s1 + $0x420] sm:$0xff]  ;;  %v160_v20 = vld [vmem:[%s951_s1 + $0x418] sm:$0xff]  ;;  %v159_v21 = vld [vmem:[%s951_s1 + $0x410] sm:$0xff] }
  0x33   :  { %305 = vmatpush.msrb.mxu2 %v132_v31  ;;  %284 = vmatpush.msrb.mxu1 %v117_v34  ;;  %v158_v22 = vld [vmem:[%s951_s1 + $0x408] sm:$0xff]  ;;  %v157_v23 = vld [vmem:[%s951_s1 + $0x400] sm:$0xff]  ;;  %v373_v25 = vld [vmem:[%s955_s3 + $0x78] sm:$0xff] }
  0x34   :  { %266 = vmatpush.msrb.mxu0 %v99_v32  ;;  %325 = vmatpush.msrb.mxu3 %v148_v37  ;;  %v28_v24 = vld [vmem:[%s953_s0 + $0x40] sm:$0xff]  ;;  %v372_v26 = vld [vmem:[%s955_s3 + $0x70] sm:$0xff]  ;;  %v371_v27 = vld [vmem:[%s955_s3 + $0x68] sm:$0xff] }
  0x35   :  { %306 = vmatpush.msrb.mxu2 %v131_v35  ;;  %285 = vmatpush.msrb.mxu1 %v116_v38  ;;  %v370_v28 = vld [vmem:[%s955_s3 + $0x60] sm:$0xff]  ;;  %v369_v29 = vld [vmem:[%s955_s3 + $0x58] sm:$0xff]  ;;  %v368_v30 = vld [vmem:[%s955_s3 + $0x50] sm:$0xff] }
  0x36   :  { %267 = vmatpush.msrb.mxu0 %v98_v36  ;;  %326 = vmatpush.msrb.mxu3 %v147_v41  ;;  %v367_v31 = vld [vmem:[%s955_s3 + $0x48] sm:$0xff]  ;;  %v366_v32 = vld [vmem:[%s955_s3 + $0x40] sm:$0xff]  ;;  %v365_v33 = vld [vmem:[%s955_s3 + $0x38] sm:$0xff] }
  0x37   :  { %307 = vmatpush.msrb.mxu2 %v130_v39  ;;  %286 = vmatpush.msrb.mxu1 %v115_v42  ;;  %v364_v34 = vld [vmem:[%s955_s3 + $0x30] sm:$0xff]  ;;  %v363_v35 = vld [vmem:[%s955_s3 + $0x28] sm:$0xff]  ;;  %v362_v36 = vld [vmem:[%s955_s3 + $0x20] sm:$0xff] }
  0x38   :  { %268 = vmatpush.msrb.mxu0 %v97_v40  ;;  %327 = vmatpush.msrb.mxu3 %v146_v45  ;;  %v361_v37 = vld [vmem:[%s955_s3 + $0x18] sm:$0xff]  ;;  %v403_v38 = vld [vmem:[%s952_s2] ss:$0 sm:$0xff]  ;;  %v360_v39 = vld [vmem:[%s955_s3 + $0x10] sm:$0xff] }
  0x39   :  { %308 = vmatpush.msrb.mxu2 %v129_v43  ;;  %287 = vmatpush.msrb.mxu1 %v114_v47  ;;  %v359_v41 = vld [vmem:[%s955_s3 + $0x8] sm:$0xff]  ;;  %v358_v43 = vld [vmem:[%s955_s3] sm:$0xff] }
  0x3a   :  { %269 = vmatpush.msrb.mxu0 %v96_v44  ;;  %233 = vmatmul.f32.vlgmr.msra.gmra.mxu2 %v22_v46 }
  0x3b   :  { %309 = vmatpush.msrb.mxu2 %v128_v49  ;;  %328 = vmatpush.msrb.mxu3 %v145_v50 }
  0x3c   :  { %270 = vmatpush.msrb.mxu0 %v95_v48  ;;  %253 = vmatmul.f32.vlgmr.msra.gmra.mxu3 %v23_v53 }
  0x3d   :  { %193 = vmatmul.f32.vlgmr.msra.gmra.mxu0 %v20_v51  ;;  %288 = vmatpush.msrb.mxu1 %v113_v54 }
  0x3e   :  { %271 = vmatpush.msrb.mxu0 %v94_v52  ;;  %310 = vmatpush.msrb.mxu2 %v127_v55 }
  0x3f   :  { %329 = vmatpush.msrb.mxu3 %v144_v57  ;;  %213 = vmatmul.f32.vlgmr.msra.gmra.mxu1 %v21_v59 }
  0x40   :  { %272 = vmatpush.msrb.mxu0 %v93_v56  ;;  %289 = vmatpush.msrb.mxu1 %v112_v60 }
  0x41   :  { %311 = vmatpush.msrb.mxu2 %v126_v61  ;;  %330 = vmatpush.msrb.mxu3 %v143_v63  ;;  %v404_v61 = vld [vmem:[%s954_s4] ss:$0 sm:$0xff] }
  0x42   :  { %337 = vmatpush.msra.mxu0 %v172_v58  ;;  %290 = vmatpush.msrb.mxu1 %v111_v0 }
  0x43   :  { %312 = vmatpush.msrb.mxu2 %v125_v1  ;;  %331 = vmatpush.msrb.mxu3 %v142_v3 }
  0x44   :  { %338 = vmatpush.msra.mxu0 %v171_v62  ;;  %313 = vmatmul.f32.vlgmr.msrb.gmra.mxu2 %v26_v4 }
  0x45   :  { %291 = vmatpush.msrb.mxu1 %v110_v5  ;;  %332 = vmatpush.msrb.mxu3 %v141_v7 }
  0x46   :  { %339 = vmatpush.msra.mxu0 %v170_v2  ;;  %333 = vmatmul.f32.vlgmr.msrb.gmra.mxu3 %v27_v9 }
  0x47   :  { %273 = vmatmul.f32.vlgmr.msrb.gmra.mxu0 %v24_v8  ;;  %292 = vmatpush.msrb.mxu1 %v109_v11 }
  0x48   :  { %340 = vmatpush.msra.mxu0 %v169_v6  ;;  %293 = vmatmul.f32.vlgmr.msrb.gmra.mxu1 %v25_v12 }
  0x49   :  { %378 = vmatpush.msra.mxu1 %v373_v25 }
  0x4a   :  { %341 = vmatpush.msra.mxu0 %v168_v10 }
  0x4b   :  { %379 = vmatpush.msra.mxu1 %v372_v26 }
  0x4c   :  { %342 = vmatpush.msra.mxu0 %v167_v13 }
  0x4d   :  { %380 = vmatpush.msra.mxu1 %v371_v27 }
  0x4e   :  { %343 = vmatpush.msra.mxu0 %v166_v14 }
  0x4f   :  { %381 = vmatpush.msra.mxu1 %v370_v28 }
  0x50   :  { %344 = vmatpush.msra.mxu0 %v165_v15 }
  0x51   :  { %382 = vmatpush.msra.mxu1 %v369_v29 }
  0x52   :  { %345 = vmatpush.msra.mxu0 %v164_v16 }
  0x53   :  { %383 = vmatpush.msra.mxu1 %v368_v30 }
  0x54   :  { %346 = vmatpush.msra.mxu0 %v163_v17 }
  0x55   :  { %384 = vmatpush.msra.mxu1 %v367_v31 }
  0x56   :  { %347 = vmatpush.msra.mxu0 %v162_v18 }
  0x57   :  { %385 = vmatpush.msra.mxu1 %v366_v32 }
  0x58   :  { %348 = vmatpush.msra.mxu0 %v161_v19 }
  0x59   :  { %386 = vmatpush.msra.mxu1 %v365_v33 }
  0x5a   :  { %349 = vmatpush.msra.mxu0 %v160_v20 }
  0x5b   :  { %387 = vmatpush.msra.mxu1 %v364_v34 }
  0x5c   :  { %350 = vmatpush.msra.mxu0 %v159_v21 }
  0x5d   :  { %388 = vmatpush.msra.mxu1 %v363_v35 }
  0x5e   :  { %351 = vmatpush.msra.mxu0 %v158_v22 }
  0x5f   :  { %389 = vmatpush.msra.mxu1 %v362_v36 }
  0x60   :  { %352 = vmatpush.msra.mxu0 %v157_v23 }
  0x61   :  { %353 = vmatmul.f32.vlgmr.msra.gmra.mxu0 %v28_v24  ;;  %390 = vmatpush.msra.mxu1 %v361_v37 }
  0x63   :  { %391 = vmatpush.msra.mxu1 %v360_v39 }
  0x65   :  { %392 = vmatpush.msra.mxu1 %v359_v41 }
  0x67   :  { %393 = vmatpush.msra.mxu1 %v358_v43 }
  0xba   :  { %v194_v40 = vpop.f32.mrf.mxu0 }
  0xbb   :  { %v195_v42 = vadd.f32 %v403_v38, %v194_v40 }
  0xbc   :  { %v214_v44 = vpop.f32.mrf.mxu1 }
  0xbd   :  { %v215_v45 = vadd.f32 %v214_v44, %v195_v42  ;;  %v234_v46 = vpop.f32.mrf.mxu2 }
  0xbf   :  { %v235_v47 = vadd.f32 %v234_v46, %v215_v45  ;;  %v254_v48 = vpop.f32.mrf.mxu3 }
  0xc1   :  { %v255_v49 = vadd.f32 %v254_v48, %v235_v47 }
  0xc4   :  { %v274_v50 = vpop.f32.mrf.mxu0 }
  0xc5   :  { %v275_v51 = vadd.f32 %v274_v50, %v255_v49  ;;  %v294_v52 = vpop.f32.mrf.mxu1 }
  0xc7   :  { %v295_v53 = vadd.f32 %v294_v52, %v275_v51  ;;  %v314_v54 = vpop.f32.mrf.mxu2 }
  0xc9   :  { %v315_v55 = vadd.f32 %v314_v54, %v295_v53  ;;  %v334_v56 = vpop.f32.mrf.mxu3 }
  0xcb   :  { %v335_v57 = vadd.f32 %v334_v56, %v315_v55 }
  0xde   :  { %v354_v58 = vpop.f32.mrf.mxu0 }
  0xdf   :  { %v355_v59 = vadd.f32 %v354_v58, %v335_v57 }
  0xe1   :  { %v357_v60 = vmax.f32 %v355_v59, 0.0 }
  0xe3   :  { %394 = vmatmul.f32.vlgmr.msra.gmra.mxu1 %v357_v60 }
 0x160   :  { %v395_v62 = vpop.f32.mrf.mxu1 }
 0x161   :  { %v396_v63 = vadd.f32 %v404_v61, %v395_v62 }
 0x163   :  { %398 = vst [vmem:[%s956_s5] sm:$0xff] %v396_v63 }

// kernel: mnist_cnn_forward.6
= control target key start
LH: loop header
LB: loop body
LE: loop exit
PB: predicated region body
PF: predicated region fallthrough
CT: control target
= control target key end

     0   :  { %s1731_s12 = smov 0   ;;  %s3244_s0 = inlined_call_operand.vmem [shape: f32[2,5,5,128], index: 0, kind: input, shape index: {}]   ;;  %s3245_s1 = inlined_call_operand.vmem [shape: f32[9,128,128], index: 1, kind: input, shape index: {}]   ;;  %s3246_s2 = inlined_call_operand.vmem [shape: f32[1,128], index: 2, kind: input, shape index: {}]   ;;  %s3247_s3 = inlined_call_operand.vmem [shape: f32[2,3,3,128], index: 3, kind: output, shape index: {}]  }
   0x1 LB: > { %s1273_s13 = sadd.s32 4294967295, %s1709_s12   ;;  %p1277_p0 = scmp.ge.s32.totalorder %s1709_s12, 1  ;;  %s1709_s12 = sphi %s1731_s12, %s13_s12  }
   0x2   : > { %p137_p1 = scmp.lt.s32.totalorder %s1709_s12, 3 }
   0x4   : > { %p138_p2 = pnand %p1277_p0, %p137_p1 }
   0x6   : > { %141 = sbr.rel (%p138_p2) target bundleno = 396 (0x18c), region = 32 }
   0xb   : > { %v1742_v0 = vld [vmem:[%s3245_s1 + $0xf8] sm:$0xff]  ;;  %v1752_v2 = vld [vmem:[%s3245_s1 + $0xf0] sm:$0xff]  ;;  %v1770_v5 = vld [vmem:[%s3245_s1 + $0xe8] sm:$0xff]  ;;  %p2287_p3 = scmp.lt.s32.totalorder %s1273_s13, 1 }
   0xc   : > { %v1747_v1 = vld [vmem:[%s3245_s1 + $0x178] sm:$0xff]  ;;  %207 = vmatpush.msra.mxu0 %v1742_v0  ;;  %v1764_v4 = vld [vmem:[%s3245_s1 + $0x170] sm:$0xff]  ;;  %v1780_v7 = vld [vmem:[%s3245_s1 + $0x168] sm:$0xff] }
   0xd   : > { %265 = vmatpush.msra.mxu2 %v1747_v1  ;;  %v1759_v3 = vld [vmem:[%s3245_s1 + $0x78] sm:$0xff]  ;;  %v1775_v6 = vld [vmem:[%s3245_s1 + $0x70] sm:$0xff]  ;;  %v1787_v8 = vld [vmem:[%s3245_s1 + $0x68] sm:$0xff]  ;;  %s3454_s13 = smov (!%p2287_p3, %s1273_s13), 1 }
   0xe   : > { %227 = vmatpush.msra.mxu1 %v1759_v3  ;;  %208 = vmatpush.msra.mxu0 %v1752_v2  ;;  %v1793_v9 = vld [vmem:[%s3245_s1 + $0xe0] sm:$0xff]  ;;  %v1803_v11 = vld [vmem:[%s3245_s1 + $0x1f8] sm:$0xff]  ;;  %v1827_v15 = vld [vmem:[%s3245_s1 + $0x1f0] sm:$0xff]  ;;  %s1692_s4 = smul.u32 40, %s3454_s13 }
   0xf   : > { %266 = vmatpush.msra.mxu2 %v1764_v4  ;;  %v1798_v10 = vld [vmem:[%s3245_s1 + $0x160] sm:$0xff]  ;;  %v1816_v13 = vld [vmem:[%s3245_s1 + $0xd8] sm:$0xff]  ;;  %305 = vmatpush.msra.mxu3 %v1803_v11  ;;  %v1839_v17 = vld [vmem:[%s3245_s1 + $0x1e8] sm:$0xff]  ;;  %s1693_s11 = smul.u32 12, %s3454_s13 }
  0x10   : > { %228 = vmatpush.msra.mxu1 %v1775_v6  ;;  %209 = vmatpush.msra.mxu0 %v1770_v5  ;;  %v1810_v12 = vld [vmem:[%s3245_s1 + $0x60] sm:$0xff]  ;;  %v1821_v14 = vld [vmem:[%s3245_s1 + $0x158] sm:$0xff]  ;;  %v1845_v18 = vld [vmem:[%s3245_s1 + $0xd0] sm:$0xff]  ;;  %s2445_s25 = scalar_lea.vmem %s3244_s0, %s1692_s4 }
  0x11   : > { %267 = vmatpush.msra.mxu2 %v1780_v7  ;;  %v1834_v16 = vld [vmem:[%s3245_s1 + $0x58] sm:$0xff]  ;;  %v1850_v19 = vld [vmem:[%s3245_s1 + $0x150] sm:$0xff]  ;;  %306 = vmatpush.msra.mxu3 %v1827_v15  ;;  %v1863_v21 = vld [vmem:[%s3245_s1 + $0x1e0] sm:$0xff]  ;;  %s3216_s28 = scalar_lea.vmem %s3247_s3, %s1693_s11 }
  0x12   : > { %229 = vmatpush.msra.mxu1 %v1787_v8  ;;  %210 = vmatpush.msra.mxu0 %v1793_v9  ;;  %v1858_v20 = vld [vmem:[%s3245_s1 + $0x50] sm:$0xff]  ;;  %3316 = vst [vmem:[#allocation2_spill] sm:$0xff] %v1863_v21  ;;  %v1869_v22 = vld [vmem:[%s3245_s1 + $0xc8] sm:$0xff]  ;;  %v1887_v25 = vld [vmem:[%s3245_s1 + $0x1d8] sm:$0xff] }
  0x13   : > { %268 = vmatpush.msra.mxu2 %v1798_v10  ;;  %v1874_v23 = vld [vmem:[%s3245_s1 + $0x148] sm:$0xff]  ;;  %307 = vmatpush.msra.mxu3 %v1839_v17  ;;  %3317 = vst [vmem:[#allocation3_spill] sm:$0xff] %v1887_v25  ;;  %v1893_v26 = vld [vmem:[%s3245_s1 + $0xc0] sm:$0xff]  ;;  %v1911_v29 = vld [vmem:[%s3245_s1 + $0x1d0] sm:$0xff] }
  0x14   : > { %230 = vmatpush.msra.mxu1 %v1810_v12  ;;  %211 = vmatpush.msra.mxu0 %v1816_v13  ;;  %v1882_v24 = vld [vmem:[%s3245_s1 + $0x48] sm:$0xff]  ;;  %v1898_v27 = vld [vmem:[%s3245_s1 + $0x140] sm:$0xff]  ;;  %3318 = vst [vmem:[#allocation4_spill] sm:$0xff] %v1911_v29  ;;  %v1917_v30 = vld [vmem:[%s3245_s1 + $0xb8] sm:$0xff] }
  0x15   : > { %269 = vmatpush.msra.mxu2 %v1821_v14  ;;  %308 = vmatpush.msra.mxu3 %v1863_v21  ;;  %v1906_v28 = vld [vmem:[%s3245_s1 + $0x40] sm:$0xff]  ;;  %v1922_v31 = vld [vmem:[%s3245_s1 + $0x138] sm:$0xff]  ;;  %v1935_v33 = vld [vmem:[%s3245_s1 + $0x1c8] sm:$0xff] }
  0x16   : > { %231 = vmatpush.msra.mxu1 %v1834_v16  ;;  %212 = vmatpush.msra.mxu0 %v1845_v18  ;;  %v1930_v32 = vld [vmem:[%s3245_s1 + $0x38] sm:$0xff]  ;;  %3319 = vst [vmem:[#allocation5_spill] sm:$0xff] %v1935_v33  ;;  %v1941_v34 = vld [vmem:[%s3245_s1 + $0xb0] sm:$0xff]  ;;  %v1959_v37 = vld [vmem:[%s3245_s1 + $0x1c0] sm:$0xff] }
  0x17   : > { %270 = vmatpush.msra.mxu2 %v1850_v19  ;;  %309 = vmatpush.msra.mxu3 %v1887_v25  ;;  %v1946_v35 = vld [vmem:[%s3245_s1 + $0x130] sm:$0xff]  ;;  %3320 = vst [vmem:[#allocation6_spill] sm:$0xff] %v1959_v37  ;;  %v1965_v38 = vld [vmem:[%s3245_s1 + $0xa8] sm:$0xff]  ;;  %v1983_v41 = vld [vmem:[%s3245_s1 + $0x1b8] sm:$0xff] }
  0x18   : > { %232 = vmatpush.msra.mxu1 %v1858_v20  ;;  %213 = vmatpush.msra.mxu0 %v1869_v22  ;;  %v1954_v36 = vld [vmem:[%s3245_s1 + $0x30] sm:$0xff]  ;;  %v1970_v39 = vld [vmem:[%s3245_s1 + $0x128] sm:$0xff]  ;;  %3321 = vst [vmem:[#allocation7_spill] sm:$0xff] %v1983_v41  ;;  %v1989_v42 = vld [vmem:[%s3245_s1 + $0xa0] sm:$0xff] }
  0x19   : > { %271 = vmatpush.msra.mxu2 %v1874_v23  ;;  %310 = vmatpush.msra.mxu3 %v1911_v29  ;;  %v1978_v40 = vld [vmem:[%s3245_s1 + $0x28] sm:$0xff]  ;;  %v1994_v43 = vld [vmem:[%s3245_s1 + $0x120] sm:$0xff]  ;;  %v2007_v45 = vld [vmem:[%s3245_s1 + $0x1b0] sm:$0xff] }
  0x1a   : > { %233 = vmatpush.msra.mxu1 %v1882_v24  ;;  %214 = vmatpush.msra.mxu0 %v1893_v26  ;;  %v2002_v44 = vld [vmem:[%s3245_s1 + $0x20] sm:$0xff]  ;;  %3322 = vst [vmem:[#allocation8_spill] sm:$0xff] %v2007_v45  ;;  %v2013_v46 = vld [vmem:[%s3245_s1 + $0x98] sm:$0xff]  ;;  %v2031_v49 = vld [vmem:[%s3245_s1 + $0x1a8] sm:$0xff] }
  0x1b   : > { %272 = vmatpush.msra.mxu2 %v1898_v27  ;;  %311 = vmatpush.msra.mxu3 %v1935_v33  ;;  %v2018_v47 = vld [vmem:[%s3245_s1 + $0x118] sm:$0xff]  ;;  %3323 = vst [vmem:[#allocation9_spill] sm:$0xff] %v2031_v49  ;;  %v2037_v50 = vld [vmem:[%s3245_s1 + $0x90] sm:$0xff]  ;;  %v2055_v53 = vld [vmem:[%s3245_s1 + $0x1a0] sm:$0xff] }
  0x1c   : > { %234 = vmatpush.msra.mxu1 %v1906_v28  ;;  %215 = vmatpush.msra.mxu0 %v1917_v30  ;;  %v2026_v48 = vld [vmem:[%s3245_s1 + $0x18] sm:$0xff]  ;;  %v2042_v51 = vld [vmem:[%s3245_s1 + $0x110] sm:$0xff]  ;;  %3324 = vst [vmem:[#allocation10_spill] sm:$0xff] %v2055_v53  ;;  %v2061_v54 = vld [vmem:[%s3245_s1 + $0x88] sm:$0xff] }
  0x1d   : > { %273 = vmatpush.msra.mxu2 %v1922_v31  ;;  %312 = vmatpush.msra.mxu3 %v1959_v37  ;;  %v2050_v52 = vld [vmem:[%s3245_s1 + $0x10] sm:$0xff]  ;;  %v2066_v55 = vld [vmem:[%s3245_s1 + $0x108] sm:$0xff]  ;;  %v2079_v57 = vld [vmem:[%s3245_s1 + $0x198] sm:$0xff] }
  0x1e   : > { %235 = vmatpush.msra.mxu1 %v1930_v32  ;;  %216 = vmatpush.msra.mxu0 %v1941_v34  ;;  %3325 = vst [vmem:[#allocation11_spill] sm:$0xff] %v2066_v55  ;;  %v2074_v56 = vld [vmem:[%s3245_s1 + $0x8] sm:$0xff]  ;;  %v2085_v58 = vld [vmem:[%s3245_s1 + $0x80] sm:$0xff]  ;;  %v2098_v60 = vld [vmem:[%s3245_s1 + $0x278] sm:$0xff] }
  0x1f   : > { %274 = vmatpush.msra.mxu2 %v1946_v35  ;;  %313 = vmatpush.msra.mxu3 %v1983_v41  ;;  %3326 = vst [vmem:[#allocation12_spill] sm:$0xff] %v2079_v57  ;;  %v2090_v59 = vld [vmem:[%s3245_s1 + $0x100] sm:$0xff]  ;;  %v2103_v61 = vld [vmem:[%s3245_s1 + $0x378] sm:$0xff]  ;;  %v2115_v63 = vld [vmem:[%s3245_s1 + $0x190] sm:$0xff] }
  0x20   : > { %236 = vmatpush.msra.mxu1 %v1954_v36  ;;  %217 = vmatpush.msra.mxu0 %v1965_v38  ;;  %3327 = vst [vmem:[#allocation13_spill] sm:$0xff] %v2090_v59  ;;  %v2109_v62 = vld [vmem:[%s3245_s1] sm:$0xff]  ;;  %v2146_v41 = vld [vmem:[%s3245_s1 + $0x268] sm:$0xff]  ;;  %v2151_v37 = vld [vmem:[%s3245_s1 + $0x2f0] sm:$0xff] }
  0x21   : > { %275 = vmatpush.msra.mxu2 %v1970_v39  ;;  %314 = vmatpush.msra.mxu3 %v2007_v45  ;;  %3328 = vst [vmem:[#allocation14_spill] sm:$0xff] %v2103_v61  ;;  %v2139_v45 = vld [vmem:[%s3245_s1 + $0x188] sm:$0xff]  ;;  %v2170_v29 = vld [vmem:[%s3245_s1 + $0x260] sm:$0xff]  ;;  %v2194_v25 = vld [vmem:[%s3245_s1 + $0x258] sm:$0xff] }
  0x22   : > { %237 = vmatpush.msra.mxu1 %v1978_v40  ;;  %218 = vmatpush.msra.mxu0 %v1989_v42  ;;  %3329 = vst [vmem:[#allocation15_spill] sm:$0xff] %v2115_v63  ;;  %v2158_v33 = vld [vmem:[%s3245_s1 + $0x368] sm:$0xff]  ;;  %v247_v21 = vld [vmem:[%s2445_s25 + $0x2] sm:$0x7] }
  0x23   : > { %276 = vmatpush.msra.mxu2 %v1994_v43  ;;  %315 = vmatpush.msra.mxu3 %v2031_v49  ;;  %v2127_v49 = vld [vmem:[%s3245_s1 + $0x2f8] sm:$0xff]  ;;  %3331 = vst [vmem:[#allocation17_spill] sm:$0xff] %v2139_v45 }
  0x24   : > { %238 = vmatpush.msra.mxu1 %v2002_v44  ;;  %219 = vmatpush.msra.mxu0 %v2013_v46  ;;  %3332 = vst [vmem:[#allocation18_spill] sm:$0xff] %v2146_v41 }
  0x25   : > { %277 = vmatpush.msra.mxu2 %v2018_v47  ;;  %316 = vmatpush.msra.mxu3 %v2055_v53  ;;  %v2122_v53 = vld [vmem:[%s3245_s1 + $0x270] sm:$0xff]  ;;  %3333 = vst [vmem:[#allocation19_spill] sm:$0xff] %v2158_v33 }
  0x26   : > { %239 = vmatpush.msra.mxu1 %v2026_v48  ;;  %220 = vmatpush.msra.mxu0 %v2037_v50  ;;  %3335 = vst [vmem:[#allocation21_spill] sm:$0xff] %v2170_v29 }
  0x27   : > { %278 = vmatpush.msra.mxu2 %v2042_v51  ;;  %317 = vmatpush.msra.mxu3 %v2079_v57  ;;  %v2134_v57 = vld [vmem:[%s3245_s1 + $0x370] sm:$0xff]  ;;  %3338 = vst [vmem:[#allocation24_spill] sm:$0xff] %v2194_v25 }
  0x28   : > { %240 = vmatpush.msra.mxu1 %v2050_v52  ;;  %221 = vmatpush.msra.mxu0 %v2061_v54  ;;  %3330 = vst [vmem:[#allocation16_spill] sm:$0xff] %v2134_v57 }
  0x29   : > { %279 = vmatpush.msra.mxu2 %v2066_v55  ;;  %318 = vmatpush.msra.mxu3 %v2115_v63  ;;  %v2163_v63 = vld [vmem:[%s3245_s1 + $0x180] sm:$0xff]  ;;  %v1312_v55 = vld [vmem:[%s2445_s25 + $0x8] sm:$0x7] }
  0x2a   : > { %241 = vmatpush.msra.mxu1 %v2074_v56  ;;  %222 = vmatpush.msra.mxu0 %v2085_v58  ;;  %3334 = vst [vmem:[#allocation20_spill] sm:$0xff] %v2163_v63 }
  0x2b   : > { %280 = vmatpush.msra.mxu2 %v2090_v59  ;;  %319 = vmatpush.msra.mxu3 %v2139_v45  ;;  %v2187_v45 = vld [vmem:[%s3245_s1 + $0x3f8] sm:$0xff]  ;;  %v2199_v59 = vld [vmem:[%s3245_s1 + $0x2e0] sm:$0xff] }
  0x2c   : > { %344 = vmatpush.msrb.mxu0 %v2098_v60  ;;  %242 = vmatpush.msra.mxu1 %v2109_v62  ;;  %3337 = vst [vmem:[#allocation23_spill] sm:$0xff] %v2187_v45 }
  0x2d   : > { %423 = vmatpush.msrb.mxu2 %v2103_v61  ;;  %v2175_v61 = vld [vmem:[%s3245_s1 + $0x2e8] sm:$0xff]  ;;  %320 = vmatpush.msra.mxu3 %v2163_v63  ;;  %3339 = vst [vmem:[#allocation25_spill] sm:$0xff] %v2199_v59  ;;  %v2211_v63 = vld [vmem:[%s3245_s1 + $0x3f0] sm:$0xff] }
  0x2e   : > { %345 = vmatpush.msrb.mxu0 %v2122_v53  ;;  %383 = vmatpush.msrb.mxu1 %v2127_v49  ;;  %3341 = vst [vmem:[#allocation27_spill] sm:$0xff] %v2211_v63 }
  0x2f   : > { %424 = vmatpush.msrb.mxu2 %v2134_v57  ;;  %v2182_v57 = vld [vmem:[%s3245_s1 + $0x360] sm:$0xff]  ;;  %462 = vmatpush.msrb.mxu3 %v2187_v45  ;;  %v2235_v45 = vld [vmem:[%s3245_s1 + $0x3e8] sm:$0xff] }
  0x30   : > { %346 = vmatpush.msrb.mxu0 %v2146_v41  ;;  %384 = vmatpush.msrb.mxu1 %v2151_v37  ;;  %3336 = vst [vmem:[#allocation22_spill] sm:$0xff] %v2182_v57  ;;  %v2223_v41 = vld [vmem:[%s3245_s1 + $0x2d8] sm:$0xff] }
  0x31   : > { %425 = vmatpush.msrb.mxu2 %v2158_v33  ;;  %v2206_v33 = vld [vmem:[%s3245_s1 + $0x358] sm:$0xff]  ;;  %3343 = vst [vmem:[#allocation29_spill] sm:$0xff] %v2223_v41  ;;  %463 = vmatpush.msrb.mxu3 %v2211_v63  ;;  %v2259_v63 = vld [vmem:[%s3245_s1 + $0x3e0] sm:$0xff] }
  0x32   : > { %347 = vmatpush.msrb.mxu0 %v2170_v29  ;;  %385 = vmatpush.msrb.mxu1 %v2175_v61  ;;  %3340 = vst [vmem:[#allocation26_spill] sm:$0xff] %v2206_v33  ;;  %v2218_v29 = vld [vmem:[%s3245_s1 + $0x250] sm:$0xff] }
  0x33   : > { %426 = vmatpush.msrb.mxu2 %v2182_v57  ;;  %3342 = vst [vmem:[#allocation28_spill] sm:$0xff] %v2218_v29  ;;  %v2230_v57 = vld [vmem:[%s3245_s1 + $0x350] sm:$0xff]  ;;  %464 = vmatpush.msrb.mxu3 %v2235_v45 }
  0x34   : > { %348 = vmatpush.msrb.mxu0 %v2194_v25  ;;  %386 = vmatpush.msrb.mxu1 %v2199_v59  ;;  %3344 = vst [vmem:[#allocation30_spill] sm:$0xff] %v2230_v57  ;;  %v2242_v25 = vld [vmem:[%s3245_s1 + $0x248] sm:$0xff]  ;;  %v2247_v59 = vld [vmem:[%s3245_s1 + $0x2d0] sm:$0xff] }
  0x35   : > { %3345 = vst [vmem:[#allocation31_spill] sm:$0xff] %v2235_v45  ;;  %427 = vmatpush.msrb.mxu2 %v2206_v33  ;;  %v2254_v33 = vld [vmem:[%s3245_s1 + $0x348] sm:$0xff]  ;;  %v2283_v45 = vld [vmem:[%s3245_s1 + $0x3d8] sm:$0xff]  ;;  %465 = vmatpush.msrb.mxu3 %v2259_v63 }
  0x36   : > { %3346 = vst [vmem:[#allocation32_spill] sm:$0xff] %v2242_v25  ;;  %349 = vmatpush.msrb.mxu0 %v2218_v29  ;;  %387 = vmatpush.msrb.mxu1 %v2223_v41  ;;  %v2266_v29 = vld [vmem:[%s3245_s1 + $0x240] sm:$0xff]  ;;  %v2271_v41 = vld [vmem:[%s3245_s1 + $0x2c8] sm:$0xff] }
  0x37   : > { %3347 = vst [vmem:[#allocation33_spill] sm:$0xff] %v2247_v59  ;;  %428 = vmatpush.msrb.mxu2 %v2230_v57  ;;  %v2278_v57 = vld [vmem:[%s3245_s1 + $0x340] sm:$0xff]  ;;  %466 = vmatpush.msrb.mxu3 %v2283_v45 }
  0x38   : > { %3348 = vst [vmem:[#allocation34_spill] sm:$0xff] %v2254_v33  ;;  %350 = vmatpush.msrb.mxu0 %v2242_v25  ;;  %388 = vmatpush.msrb.mxu1 %v2247_v59  ;;  %v2296_v25 = vld [vmem:[%s3245_s1 + $0x238] sm:$0xff]  ;;  %v2301_v59 = vld [vmem:[%s3245_s1 + $0x2c0] sm:$0xff] }
  0x39   : > { %3349 = vst [vmem:[#allocation35_spill] sm:$0xff] %v2259_v63  ;;  %429 = vmatpush.msrb.mxu2 %v2254_v33  ;;  %v2308_v33 = vld [vmem:[%s3245_s1 + $0x338] sm:$0xff]  ;;  %v2313_v63 = vld [vmem:[%s3245_s1 + $0x3d0] sm:$0xff]  ;;  %321 = vmatmul.f32.vlgmr.msra.gmra.mxu3 %v1312_v55  ;;  %v2531_v55 = vld [vmem:[%s3245_s1 + $0x468] sm:$0xff] }
  0x3a   : > { %3350 = vst [vmem:[#allocation36_spill] sm:$0xff] %v2266_v29  ;;  %351 = vmatpush.msrb.mxu0 %v2266_v29  ;;  %389 = vmatpush.msrb.mxu1 %v2271_v41  ;;  %v2320_v29 = vld [vmem:[%s3245_s1 + $0x230] sm:$0xff] }
  0x3b   : > { %3351 = vst [vmem:[#allocation37_spill] sm:$0xff] %v2271_v41  ;;  %430 = vmatpush.msrb.mxu2 %v2278_v57  ;;  %v2325_v41 = vld [vmem:[%s3245_s1 + $0x2b8] sm:$0xff]  ;;  %467 = vmatpush.msrb.mxu3 %v2313_v63 }
  0x3c   : > { %3352 = vst [vmem:[#allocation38_spill] sm:$0xff] %v2278_v57  ;;  %352 = vmatpush.msrb.mxu0 %v2296_v25  ;;  %390 = vmatpush.msrb.mxu1 %v2301_v59  ;;  %v2332_v57 = vld [vmem:[%s3245_s1 + $0x330] sm:$0xff] }
  0x3d   : > { %3353 = vst [vmem:[#allocation39_spill] sm:$0xff] %v2283_v45  ;;  %v2337_v45 = vld [vmem:[%s3245_s1 + $0x3c8] sm:$0xff]  ;;  %431 = vmatpush.msrb.mxu2 %v2308_v33 }
  0x3e   : > { %3355 = vst [vmem:[#allocation40_spill] sm:$0xff] %v2296_v25  ;;  %v2350_v25 = vld [vmem:[%s3245_s1 + $0x228] sm:$0xff]  ;;  %353 = vmatpush.msrb.mxu0 %v2320_v29  ;;  %391 = vmatpush.msrb.mxu1 %v2325_v41 }
  0x3f   : > { %3356 = vst [vmem:[#allocation41_spill] sm:$0xff] %v2301_v59  ;;  %v2355_v59 = vld [vmem:[%s3245_s1 + $0x2b0] sm:$0xff]  ;;  %432 = vmatpush.msrb.mxu2 %v2332_v57  ;;  %468 = vmatpush.msrb.mxu3 %v2337_v45 }
  0x40   : > { %3357 = vst [vmem:[#allocation42_spill] sm:$0xff] %v2308_v33  ;;  %v2362_v33 = vld [vmem:[%s3245_s1 + $0x328] sm:$0xff]  ;;  %354 = vmatpush.msrb.mxu0 %v2350_v25  ;;  %392 = vmatpush.msrb.mxu1 %v2355_v59 }
  0x41   : > { %3358 = vst [vmem:[#allocation43_spill] sm:$0xff] %v2313_v63  ;;  %v2367_v63 = vld [vmem:[%s3245_s1 + $0x3c0] sm:$0xff]  ;;  %433 = vmatpush.msrb.mxu2 %v2362_v33 }
  0x42   : > { %3359 = vst [vmem:[#allocation44_spill] sm:$0xff] %v2320_v29  ;;  %v2374_v29 = vld [vmem:[%s3245_s1 + $0x220] sm:$0xff]  ;;  %469 = vmatpush.msrb.mxu3 %v2367_v63  ;;  %281 = vmatmul.f32.vlgmr.msra.gmra.mxu2 %v247_v21  ;;  %v2511_v21 = vld [vmem:[%s3245_s1 + $0x398] sm:$0xff] }
  0x43   : > { %3360 = vst [vmem:[#allocation45_spill] sm:$0xff] %v2325_v41  ;;  %v2379_v41 = vld [vmem:[%s3245_s1 + $0x2a8] sm:$0xff]  ;;  %355 = vmatpush.msrb.mxu0 %v2374_v29 }
  0x44   : > { %3361 = vst [vmem:[#allocation46_spill] sm:$0xff] %v2332_v57  ;;  %v2386_v57 = vld [vmem:[%s3245_s1 + $0x320] sm:$0xff]  ;;  %393 = vmatpush.msrb.mxu1 %v2379_v41 }
  0x45   : > { %3362 = vst [vmem:[#allocation47_spill] sm:$0xff] %v2337_v45  ;;  %v2391_v45 = vld [vmem:[%s3245_s1 + $0x3b8] sm:$0xff]  ;;  %434 = vmatpush.msrb.mxu2 %v2386_v57 }
  0x46   : > { %3363 = vst [vmem:[#allocation48_spill] sm:$0xff] %v2350_v25  ;;  %v2399_v25 = vld [vmem:[%s3245_s1 + $0x218] sm:$0xff]  ;;  %470 = vmatpush.msrb.mxu3 %v2391_v45 }
  0x47   : > { %3364 = vst [vmem:[#allocation49_spill] sm:$0xff] %v2355_v59  ;;  %v2404_v59 = vld [vmem:[%s3245_s1 + $0x2a0] sm:$0xff]  ;;  %356 = vmatpush.msrb.mxu0 %v2399_v25 }
  0x48   : > { %3365 = vst [vmem:[#allocation50_spill] sm:$0xff] %v2362_v33  ;;  %v2411_v33 = vld [vmem:[%s3245_s1 + $0x318] sm:$0xff]  ;;  %394 = vmatpush.msrb.mxu1 %v2404_v59 }
  0x49   : > { %3366 = vst [vmem:[#allocation51_spill] sm:$0xff] %v2367_v63  ;;  %v2416_v63 = vld [vmem:[%s3245_s1 + $0x3b0] sm:$0xff]  ;;  %435 = vmatpush.msrb.mxu2 %v2411_v33 }
  0x4a   : > { %3367 = vst [vmem:[#allocation52_spill] sm:$0xff] %v2374_v29  ;;  %v2423_v29 = vld [vmem:[%s3245_s1 + $0x210] sm:$0xff]  ;;  %471 = vmatpush.msrb.mxu3 %v2416_v63 }
  0x4b   : > { %3368 = vst [vmem:[#allocation53_spill] sm:$0xff] %v2379_v41  ;;  %v2428_v41 = vld [vmem:[%s3245_s1 + $0x298] sm:$0xff]  ;;  %357 = vmatpush.msrb.mxu0 %v2423_v29 }
  0x4c   : > { %3369 = vst [vmem:[#allocation54_spill] sm:$0xff] %v2386_v57  ;;  %v2435_v57 = vld [vmem:[%s3245_s1 + $0x310] sm:$0xff]  ;;  %395 = vmatpush.msrb.mxu1 %v2428_v41 }
  0x4d   : > { %3370 = vst [vmem:[#allocation55_spill] sm:$0xff] %v2391_v45  ;;  %v2440_v45 = vld [vmem:[%s3245_s1 + $0x3a8] sm:$0xff]  ;;  %436 = vmatpush.msrb.mxu2 %v2435_v57 }
  0x4e   : > { %3371 = vst [vmem:[#allocation56_spill] sm:$0xff] %v2399_v25  ;;  %v2452_v25 = vld [vmem:[%s3245_s1 + $0x208] sm:$0xff]  ;;  %472 = vmatpush.msrb.mxu3 %v2440_v45 }
  0x4f   : > { %3372 = vst [vmem:[#allocation57_spill] sm:$0xff] %v2404_v59  ;;  %v2457_v59 = vld [vmem:[%s3245_s1 + $0x290] sm:$0xff]  ;;  %358 = vmatpush.msrb.mxu0 %v2452_v25 }
  0x50   : > { %3373 = vst [vmem:[#allocation58_spill] sm:$0xff] %v2411_v33  ;;  %v2469_v33 = vld [vmem:[%s3245_s1 + $0x3a0] sm:$0xff]  ;;  %396 = vmatpush.msrb.mxu1 %v2457_v59 }
  0x51   : > { %3374 = vst [vmem:[#allocation59_spill] sm:$0xff] %v2416_v63  ;;  %v2464_v63 = vld [vmem:[%s3245_s1 + $0x308] sm:$0xff]  ;;  %473 = vmatpush.msrb.mxu3 %v2469_v33 }
  0x52   : > { %3375 = vst [vmem:[#allocation60_spill] sm:$0xff] %v2423_v29  ;;  %v2477_v29 = vld [vmem:[%s3245_s1 + $0x200] sm:$0xff]  ;;  %437 = vmatpush.msrb.mxu2 %v2464_v63 }
  0x53   : > { %3376 = vst [vmem:[#allocation61_spill] sm:$0xff] %v2428_v41  ;;  %v2484_v41 = vld [vmem:[%s3245_s1 + $0x288] sm:$0xff]  ;;  %359 = vmatpush.msrb.mxu0 %v2477_v29  ;;  %474 = vmatpush.msrb.mxu3 %v2511_v21 }
  0x54   : > { %3377 = vst [vmem:[#allocation62_spill] sm:$0xff] %v2435_v57  ;;  %v189_v57 = vld [vmem:[%s2445_s25 + $0x1] sm:$0x7]  ;;  %397 = vmatpush.msrb.mxu1 %v2484_v41 }
  0x55   : > { %3378 = vst [vmem:[#allocation63_spill] sm:$0xff] %v2440_v45  ;;  %v2489_v45 = vld [vmem:[%s3245_s1 + $0x300] sm:$0xff]  ;;  %223 = vmatmul.f32.vlgmr.msra.gmra.mxu0 %v189_v57  ;;  %v1363_v57 = vld [vmem:[%s2445_s25 + $0x10] sm:$0x7] }
  0x56   : > { %3379 = vst [vmem:[#allocation64_spill] sm:$0xff] %v2452_v25  ;;  %v2499_v25 = vld [vmem:[%s3245_s1 + $0x478] sm:$0xff]  ;;  %438 = vmatpush.msrb.mxu2 %v2489_v45 }
  0x57   : > { %3380 = vst [vmem:[#allocation65_spill] sm:$0xff] %v2464_v63  ;;  %v2506_v63 = vld [vmem:[%s3245_s1 + $0x280] sm:$0xff]  ;;  %501 = vmatpush.msra.mxu0 %v2499_v25  ;;  %439 = vmatmul.f32.vlgmr.msrb.gmra.mxu2 %v1363_v57  ;;  %v2572_v57 = vld [vmem:[%s3245_s1 + $0x450] sm:$0xff] }
  0x58   : > { %3381 = vst [vmem:[#allocation66_spill] sm:$0xff] %v2469_v33  ;;  %v172_v33 = vld [vmem:[%s2445_s25] sm:$0x7]  ;;  %582 = vmatpush.msra.mxu2 %v1759_v3  ;;  %398 = vmatpush.msrb.mxu1 %v2506_v63  ;;  %v2539_v3 = vld [vmem:[%s3245_s1 + $0x388] sm:$0xff] }
  0x59   : > { %3382 = vst [vmem:[#allocation67_spill] sm:$0xff] %v2477_v29  ;;  %v2517_v29 = vld [vmem:[%s3245_s1 + $0x470] sm:$0xff]  ;;  %243 = vmatmul.f32.vlgmr.msra.gmra.mxu1 %v172_v33  ;;  %v2547_v33 = vld [vmem:[%s3245_s1 + $0x460] sm:$0xff] }
  0x5a   : > { %3383 = vst [vmem:[#allocation68_spill] sm:$0xff] %v2489_v45  ;;  %v2526_v45 = vld [vmem:[%s3245_s1 + $0x390] sm:$0xff]  ;;  %502 = vmatpush.msra.mxu0 %v2517_v29  ;;  %562 = vmatpush.msra.mxu1 %v1742_v0  ;;  %v2554_v0 = vld [vmem:[%s3245_s1 + $0x380] sm:$0xff] }
  0x5b   : > { %3384 = vst [vmem:[#allocation69_spill] sm:$0xff] %v2526_v45  ;;  %583 = vmatpush.msra.mxu2 %v1775_v6  ;;  %475 = vmatpush.msrb.mxu3 %v2526_v45  ;;  %v1329_v6 = vld [vmem:[%s2445_s25 + $0x9] sm:$0x7]  ;;  %v1380_v45 = vld [vmem:[%s2445_s25 + $0x11] sm:$0x7] }
  0x5c   : > { %503 = vmatpush.msra.mxu0 %v2531_v55  ;;  %563 = vmatpush.msra.mxu1 %v1752_v2  ;;  %v2564_v2 = vld [vmem:[%s3245_s1 + $0x458] sm:$0xff] }
  0x5d   : > { %584 = vmatpush.msra.mxu2 %v1787_v8  ;;  %476 = vmatpush.msrb.mxu3 %v2539_v3  ;;  %v1346_v8 = vld [vmem:[%s2445_s25 + $0xa] sm:$0x7] }
  0x5e   : > { %504 = vmatpush.msra.mxu0 %v2547_v33  ;;  %564 = vmatpush.msra.mxu1 %v1770_v5  ;;  %v2581_v5 = vld [vmem:[%s3245_s1 + $0x448] sm:$0xff] }
  0x5f   : > { %585 = vmatpush.msra.mxu2 %v1810_v12  ;;  %477 = vmatpush.msrb.mxu3 %v2554_v0  ;;  %v2634_v12 = vld [vmem:[%s3245_s1 + $0x418] sm:$0xff] }
  0x60   : > { %360 = vmatmul.f32.vlgmr.msrb.gmra.mxu0 %v1329_v6  ;;  %478 = vmatmul.f32.vlgmr.msrb.gmra.mxu3 %v1380_v45  ;;  %v3409_v45 = vld [vmem:[#allocation26_spill] sm:$0xff]  ;;  %v3424_v6 = vld [vmem:[#allocation61_spill] sm:$0xff] }
  0x61   : > { %505 = vmatpush.msra.mxu0 %v2564_v2  ;;  %565 = vmatpush.msra.mxu1 %v1793_v9  ;;  %v2589_v9 = vld [vmem:[%s3245_s1 + $0x440] sm:$0xff] }
  0x62   : > { %586 = vmatpush.msra.mxu2 %v1834_v16  ;;  %619 = vmatpush.msra.mxu3 %v1747_v1  ;;  %v2598_v1 = vld [vmem:[%s3245_s1 + $0x438] sm:$0xff]  ;;  %v2661_v16 = vld [vmem:[%s3245_s1 + $0x400] sm:$0xff] }
  0x63   : > { %399 = vmatmul.f32.vlgmr.msrb.gmra.mxu1 %v1346_v8  ;;  %506 = vmatpush.msra.mxu0 %v2572_v57  ;;  %v3425_v8 = vld [vmem:[#allocation42_spill] sm:$0xff] }
  0x64   : > { %566 = vmatpush.msra.mxu1 %v1816_v13  ;;  %587 = vmatpush.msra.mxu2 %v1858_v20  ;;  %v2643_v13 = vld [vmem:[%s3245_s1 + $0x410] sm:$0xff]  ;;  %v3387_v20 = vld [vmem:[#allocation18_spill] sm:$0xff] }
  0x65   : > { %620 = vmatpush.msra.mxu3 %v1764_v4  ;;  %507 = vmatpush.msra.mxu0 %v2581_v5  ;;  %v2607_v4 = vld [vmem:[%s3245_s1 + $0x430] sm:$0xff] }
  0x66   : > { %567 = vmatpush.msra.mxu1 %v1845_v18  ;;  %588 = vmatpush.msra.mxu2 %v1882_v24  ;;  %v1397_v18 = vld [vmem:[%s2445_s25 + $0x12] sm:$0x7]  ;;  %v3391_v24 = vld [vmem:[#allocation21_spill] sm:$0xff] }
  0x67   : > { %621 = vmatpush.msra.mxu3 %v1780_v7  ;;  %508 = vmatpush.msra.mxu0 %v2589_v9  ;;  %v2616_v7 = vld [vmem:[%s3245_s1 + $0x428] sm:$0xff] }
  0x68   : > { %568 = vmatpush.msra.mxu1 %v1869_v22  ;;  %589 = vmatpush.msra.mxu2 %v1906_v28  ;;  %v3388_v22 = vld [vmem:[#allocation25_spill] sm:$0xff]  ;;  %v3395_v28 = vld [vmem:[#allocation24_spill] sm:$0xff] }
  0x69   : > { %622 = vmatpush.msra.mxu3 %v1798_v10  ;;  %509 = vmatpush.msra.mxu0 %v2598_v1  ;;  %v2625_v10 = vld [vmem:[%s3245_s1 + $0x420] sm:$0xff] }
  0x6a   : > { %569 = vmatpush.msra.mxu1 %v1893_v26  ;;  %590 = vmatpush.msra.mxu2 %v1930_v32  ;;  %v3392_v26 = vld [vmem:[#allocation29_spill] sm:$0xff] }
  0x6b   : > { %623 = vmatpush.msra.mxu3 %v1821_v14  ;;  %510 = vmatpush.msra.mxu0 %v2607_v4  ;;  %v2652_v14 = vld [vmem:[%s3245_s1 + $0x408] sm:$0xff]  ;;  %v3398_v32 = vld [vmem:[#allocation5_spill] sm:$0xff] }
  0x6c   : > { %570 = vmatpush.msra.mxu1 %v1917_v30  ;;  %591 = vmatpush.msra.mxu2 %v1954_v36  ;;  %v3396_v30 = vld [vmem:[#allocation33_spill] sm:$0xff]  ;;  %v3401_v36 = vld [vmem:[#allocation19_spill] sm:$0xff] }
  0x6d   : > { %624 = vmatpush.msra.mxu3 %v1850_v19  ;;  %511 = vmatpush.msra.mxu0 %v2616_v7  ;;  %v3386_v19 = vld [vmem:[#allocation2_spill] sm:$0xff] }
  0x6e   : > { %571 = vmatpush.msra.mxu1 %v1941_v34  ;;  %592 = vmatpush.msra.mxu2 %v1978_v40  ;;  %v3399_v34 = vld [vmem:[#allocation28_spill] sm:$0xff]  ;;  %v3405_v40 = vld [vmem:[#allocation22_spill] sm:$0xff] }
  0x6f   : > { %625 = vmatpush.msra.mxu3 %v1874_v23  ;;  %512 = vmatpush.msra.mxu0 %v2625_v10  ;;  %v3390_v23 = vld [vmem:[#allocation3_spill] sm:$0xff] }
  0x70   : > { %572 = vmatpush.msra.mxu1 %v1965_v38  ;;  %593 = vmatpush.msra.mxu2 %v2002_v44  ;;  %v3403_v38 = vld [vmem:[#allocation32_spill] sm:$0xff]  ;;  %v3408_v44 = vld [vmem:[#allocation45_spill] sm:$0xff] }
  0x71   : > { %626 = vmatpush.msra.mxu3 %v1898_v27  ;;  %513 = vmatpush.msra.mxu0 %v2634_v12  ;;  %v3394_v27 = vld [vmem:[#allocation4_spill] sm:$0xff] }
  0x72   : > { %573 = vmatpush.msra.mxu1 %v1989_v42  ;;  %594 = vmatpush.msra.mxu2 %v2026_v48  ;;  %v3406_v42 = vld [vmem:[#allocation7_spill] sm:$0xff]  ;;  %v3412_v48 = vld [vmem:[#allocation49_spill] sm:$0xff] }
  0x73   : > { %627 = vmatpush.msra.mxu3 %v1922_v31  ;;  %514 = vmatpush.msra.mxu0 %v2643_v13  ;;  %v3397_v31 = vld [vmem:[#allocation16_spill] sm:$0xff] }
  0x74   : > { %574 = vmatpush.msra.mxu1 %v2013_v46  ;;  %595 = vmatpush.msra.mxu2 %v2050_v52  ;;  %v3410_v46 = vld [vmem:[#allocation8_spill] sm:$0xff]  ;;  %v3416_v52 = vld [vmem:[#allocation53_spill] sm:$0xff] }
  0x75   : > { %628 = vmatpush.msra.mxu3 %v1946_v35  ;;  %515 = vmatpush.msra.mxu0 %v2652_v14  ;;  %v3400_v35 = vld [vmem:[#allocation37_spill] sm:$0xff] }
  0x76   : > { %575 = vmatpush.msra.mxu1 %v2037_v50  ;;  %596 = vmatpush.msra.mxu2 %v2074_v56  ;;  %v3414_v50 = vld [vmem:[#allocation9_spill] sm:$0xff]  ;;  %v3419_v56 = vld [vmem:[#allocation48_spill] sm:$0xff] }
  0x77   : > { %629 = vmatpush.msra.mxu3 %v1970_v39  ;;  %516 = vmatpush.msra.mxu0 %v2661_v16  ;;  %v3404_v39 = vld [vmem:[#allocation41_spill] sm:$0xff] }
  0x78   : > { %576 = vmatpush.msra.mxu1 %v2061_v54  ;;  %597 = vmatpush.msra.mxu2 %v2109_v62  ;;  %v3418_v54 = vld [vmem:[#allocation10_spill] sm:$0xff]  ;;  %v3423_v62 = vld [vmem:[#allocation52_spill] sm:$0xff] }
  0x79   : > { %630 = vmatpush.msra.mxu3 %v1994_v43  ;;  %517 = vmatmul.f32.vlgmr.msra.gmra.mxu0 %v1397_v18  ;;  %v3407_v43 = vld [vmem:[#allocation36_spill] sm:$0xff]  ;;  %v3426_v18 = vld [vmem:[#allocation15_spill] sm:$0xff] }
  0x7a   : > { %657 = vmatpush.msrb.mxu0 %v1803_v11  ;;  %733 = vmatpush.msrb.mxu2 %v2127_v49  ;;  %v3385_v11 = vld [vmem:[#allocation11_spill] sm:$0xff]  ;;  %v3413_v49 = vld [vmem:[#allocation30_spill] sm:$0xff] }
  0x7b   : > { %577 = vmatpush.msra.mxu1 %v2085_v58  ;;  %631 = vmatpush.msra.mxu3 %v2018_v47  ;;  %v3411_v47 = vld [vmem:[#allocation40_spill] sm:$0xff]  ;;  %v3420_v58 = vld [vmem:[#allocation57_spill] sm:$0xff] }
  0x7c   : > { %658 = vmatpush.msrb.mxu0 %v1827_v15  ;;  %734 = vmatpush.msrb.mxu2 %v2151_v37  ;;  %v3389_v15 = vld [vmem:[#allocation13_spill] sm:$0xff]  ;;  %v3402_v37 = vld [vmem:[#allocation6_spill] sm:$0xff] }
  0x7d   : > { %695 = vmatpush.msrb.mxu1 %v2098_v60  ;;  %632 = vmatpush.msra.mxu3 %v2042_v51  ;;  %v3415_v51 = vld [vmem:[#allocation44_spill] sm:$0xff]  ;;  %v3421_v60 = vld [vmem:[#allocation38_spill] sm:$0xff] }
  0x7e   : > { %659 = vmatpush.msrb.mxu0 %v1839_v17  ;;  %735 = vmatpush.msrb.mxu2 %v2175_v61  ;;  %v3393_v17 = vld [vmem:[#allocation14_spill] sm:$0xff]  ;;  %v3422_v61 = vld [vmem:[#allocation12_spill] sm:$0xff] }
  0x7f   : > { %696 = vmatpush.msrb.mxu1 %v2122_v53  ;;  %633 = vmatpush.msra.mxu3 %v3385_v11  ;;  %v3417_v53 = vld [vmem:[#allocation34_spill] sm:$0xff]  ;;  %v3427_v11 = vld [vmem:[#allocation56_spill] sm:$0xff] }
  0x80   : > { %660 = vmatpush.msrb.mxu0 %v3386_v19  ;;  %736 = vmatpush.msrb.mxu2 %v3388_v22  ;;  %v3428_v19 = vld [vmem:[#allocation46_spill] sm:$0xff]  ;;  %v3429_v22 = vld [vmem:[#allocation17_spill] sm:$0xff] }
  0x81   : > { %697 = vmatpush.msrb.mxu1 %v3387_v20  ;;  %634 = vmatpush.msra.mxu3 %v3389_v15  ;;  %v1414_v20 = vld [vmem:[%s2445_s25 + $0x8] sm:$0x7]  ;;  %v3430_v15 = vld [vmem:[#allocation60_spill] sm:$0xff] }
  0x82   : > { %661 = vmatpush.msrb.mxu0 %v3390_v23  ;;  %737 = vmatpush.msrb.mxu2 %v3392_v26  ;;  %v3431_v23 = vld [vmem:[#allocation50_spill] sm:$0xff]  ;;  %v1432_v26 = vld [vmem:[%s2445_s25 + $0xa] sm:$0x7] }
  0x83   : > { %698 = vmatpush.msrb.mxu1 %v3391_v24  ;;  %772 = vmatpush.msrb.mxu3 %v3393_v17  ;;  %v3432_v24 = vld [vmem:[#allocation20_spill] sm:$0xff]  ;;  %v1569_v17 = vld [vmem:[%s3245_s1 + $0xf8] sm:$0xff] }
  0x84   : > { %662 = vmatpush.msrb.mxu0 %v3394_v27  ;;  %738 = vmatpush.msrb.mxu2 %v3396_v30  ;;  %v3434_v27 = vld [vmem:[#allocation54_spill] sm:$0xff]  ;;  %v1568_v30 = vld [vmem:[%s3245_s1 + $0xf0] sm:$0xff] }
  0x85   : > { %699 = vmatpush.msrb.mxu1 %v3395_v28  ;;  %773 = vmatpush.msrb.mxu3 %v3397_v31  ;;  %v3435_v28 = vld [vmem:[#allocation23_spill] sm:$0xff] }
  0x86   : > { %663 = vmatpush.msrb.mxu0 %v3398_v32  ;;  %739 = vmatpush.msrb.mxu2 %v3400_v35  ;;  %v3436_v31 = vld [vmem:[#allocation67_spill] sm:$0xff]  ;;  %v3437_v32 = vld [vmem:[#allocation58_spill] sm:$0xff]  ;;  %v1483_v35 = vld [vmem:[%s2445_s25 + $0x12] sm:$0x7] }
  0x87   : > { %700 = vmatpush.msrb.mxu1 %v3399_v34  ;;  %774 = vmatpush.msrb.mxu3 %v3401_v36  ;;  %v3438_v34 = vld [vmem:[#allocation27_spill] sm:$0xff]  ;;  %v3439_v36 = vld [vmem:[#allocation62_spill] sm:$0xff] }
  0x88   : > { %664 = vmatpush.msrb.mxu0 %v3402_v37  ;;  %740 = vmatpush.msrb.mxu2 %v3404_v39  ;;  %v3440_v37 = vld [vmem:[#allocation31_spill] sm:$0xff]  ;;  %v3441_v39 = vld [vmem:[#allocation65_spill] sm:$0xff] }
  0x89   : > { %701 = vmatpush.msrb.mxu1 %v3403_v38  ;;  %775 = vmatpush.msrb.mxu3 %v3405_v40  ;;  %v1566_v38 = vld [vmem:[%s3245_s1 + $0xe0] sm:$0xff]  ;;  %v1449_v40 = vld [vmem:[%s2445_s25 + $0x10] sm:$0x7] }
  0x8a   : > { %665 = vmatpush.msrb.mxu0 %v3406_v42  ;;  %741 = vmatpush.msrb.mxu2 %v3408_v44  ;;  %v1500_v42 = vld [vmem:[%s2445_s25 + $0x18] sm:$0x7] }
  0x8b   : > { %702 = vmatpush.msrb.mxu1 %v3407_v43  ;;  %776 = vmatpush.msrb.mxu3 %v3409_v45  ;;  %v3443_v43 = vld [vmem:[#allocation68_spill] sm:$0xff]  ;;  %v889_v44 = vld [vmem:[%s3245_s1 + $0x78] sm:$0xff] }
  0x8c   : > { %666 = vmatpush.msrb.mxu0 %v3410_v46  ;;  %742 = vmatpush.msrb.mxu2 %v3412_v48  ;;  %v1466_v45 = vld [vmem:[%s2445_s25 + $0x11] sm:$0x7]  ;;  %v3444_v46 = vld [vmem:[#allocation39_spill] sm:$0xff] }
  0x8d   : > { %703 = vmatpush.msrb.mxu1 %v3411_v47  ;;  %777 = vmatpush.msrb.mxu3 %v3413_v49  ;;  %v888_v47 = vld [vmem:[%s3245_s1 + $0x70] sm:$0xff]  ;;  %v3445_v48 = vld [vmem:[#allocation43_spill] sm:$0xff] }
  0x8e   : > { %667 = vmatpush.msrb.mxu0 %v3414_v50  ;;  %743 = vmatpush.msrb.mxu2 %v3416_v52  ;;  %v1563_v49 = vld [vmem:[%s3245_s1 + $0xc8] sm:$0xff]  ;;  %v886_v52 = vld [vmem:[%s3245_s1 + $0x60] sm:$0xff] }
  0x8f   : > { %704 = vmatpush.msrb.mxu1 %v3415_v51  ;;  %778 = vmatpush.msrb.mxu3 %v3417_v53  ;;  %v3446_v50 = vld [vmem:[#allocation47_spill] sm:$0xff]  ;;  %v1562_v51 = vld [vmem:[%s3245_s1 + $0xc0] sm:$0xff]  ;;  %v1561_v53 = vld [vmem:[%s3245_s1 + $0xb8] sm:$0xff] }
  0x90   : > { %668 = vmatpush.msrb.mxu0 %v3418_v54  ;;  %744 = vmatpush.msrb.mxu2 %v3420_v58  ;;  %v885_v54 = vld [vmem:[%s3245_s1 + $0x58] sm:$0xff]  ;;  %v884_v58 = vld [vmem:[%s3245_s1 + $0x50] sm:$0xff] }
  0x91   : > { %705 = vmatpush.msrb.mxu1 %v3419_v56  ;;  %779 = vmatpush.msrb.mxu3 %v3421_v60  ;;  %v1560_v56 = vld [vmem:[%s3245_s1 + $0xb0] sm:$0xff]  ;;  %v1559_v60 = vld [vmem:[%s3245_s1 + $0xa8] sm:$0xff] }
  0x92   : > { %669 = vmatpush.msrb.mxu0 %v3422_v61  ;;  %745 = vmatpush.msrb.mxu2 %v3424_v6  ;;  %v883_v61 = vld [vmem:[%s3245_s1 + $0x48] sm:$0xff]  ;;  %v882_v6 = vld [vmem:[%s3245_s1 + $0x40] sm:$0xff] }
  0x93   : > { %706 = vmatpush.msrb.mxu1 %v3423_v62  ;;  %780 = vmatpush.msrb.mxu3 %v3425_v8  ;;  %v1558_v62 = vld [vmem:[%s3245_s1 + $0xa0] sm:$0xff]  ;;  %v1557_v8 = vld [vmem:[%s3245_s1 + $0x98] sm:$0xff] }
  0x94   : > { %670 = vmatpush.msrb.mxu0 %v3426_v18  ;;  %746 = vmatpush.msrb.mxu2 %v2457_v59  ;;  %v3433_v59 = vld [vmem:[#allocation64_spill] sm:$0xff]  ;;  %v881_v18 = vld [vmem:[%s3245_s1 + $0x38] sm:$0xff] }
  0x95   : > { %707 = vmatpush.msrb.mxu1 %v3427_v11  ;;  %781 = vmatpush.msrb.mxu3 %v3428_v19  ;;  %v3452_v11 = vld [vmem:[#allocation69_spill] sm:$0xff]  ;;  %v1555_v19 = vld [vmem:[%s3245_s1 + $0x88] sm:$0xff] }
  0x96   : > { %671 = vmatpush.msrb.mxu0 %v3429_v22  ;;  %747 = vmatpush.msrb.mxu2 %v2484_v41  ;;  %v1415_v41 = vld [vmem:[%s2445_s25 + $0x9] sm:$0x7]  ;;  %v1586_v22 = vld [vmem:[%s3245_s1 + $0x178] sm:$0xff] }
  0x97   : > { %708 = vmatpush.msrb.mxu1 %v3430_v15  ;;  %782 = vmatpush.msrb.mxu3 %v3431_v23  ;;  %v1534_v15 = vld [vmem:[%s2445_s25 + $0x1a] sm:$0x7] }
  0x98   : > { %598 = vmatmul.f32.vlgmr.msra.gmra.mxu2 %v1414_v20  ;;  %672 = vmatpush.msrb.mxu0 %v3432_v24  ;;  %v1517_v20 = vld [vmem:[%s2445_s25 + $0x19] sm:$0x7]  ;;  %v876_v24 = vld [vmem:[%s3245_s1 + $0x10] sm:$0xff] }
  0x99   : > { %709 = vmatpush.msrb.mxu1 %v3433_v59  ;;  %748 = vmatpush.msrb.mxu2 %v2506_v63  ;;  %v1567_v63 = vld [vmem:[%s3245_s1 + $0xe8] sm:$0xff]  ;;  %v1603_v23 = vld [vmem:[%s3245_s1 + $0x1f8] sm:$0xff] }
  0x9a   : > { %783 = vmatpush.msrb.mxu3 %v3434_v27  ;;  %810 = vmatpush.msra.mxu0 %v3435_v28  ;;  %v1618_v59 = vld [vmem:[%s3245_s1 + $0x268] sm:$0xff]  ;;  %v1583_v27 = vld [vmem:[%s3245_s1 + $0x160] sm:$0xff] }
  0x9b   : > { %635 = vmatmul.f32.vlgmr.msra.gmra.mxu3 %v1432_v26  ;;  %907 = vmatpush.msra.mxu2 %v1569_v17  ;;  %v1584_v26 = vld [vmem:[%s3245_s1 + $0x168] sm:$0xff]  ;;  %v1602_v17 = vld [vmem:[%s3245_s1 + $0x1f0] sm:$0xff] }
  0x9c   : > { %710 = vmatpush.msrb.mxu1 %v3436_v31  ;;  %784 = vmatpush.msrb.mxu3 %v3437_v32  ;;  %v1601_v28 = vld [vmem:[%s3245_s1 + $0x1e8] sm:$0xff]  ;;  %v1582_v31 = vld [vmem:[%s3245_s1 + $0x158] sm:$0xff]  ;;  %v1600_v32 = vld [vmem:[%s3245_s1 + $0x1e0] sm:$0xff] }
  0x9d   : > { %578 = vmatmul.f32.vlgmr.msra.gmra.mxu1 %v1415_v41  ;;  %811 = vmatpush.msra.mxu0 %v3438_v34  ;;  %v1617_v41 = vld [vmem:[%s3245_s1 + $0x260] sm:$0xff]  ;;  %v1616_v34 = vld [vmem:[%s3245_s1 + $0x258] sm:$0xff] }
  0x9e   : > { %848 = vmatpush.msra.mxu1 %v2499_v25  ;;  %908 = vmatpush.msra.mxu2 %v1568_v30  ;;  %v3442_v25 = vld [vmem:[#allocation35_spill] sm:$0xff]  ;;  %v874_v30 = vld [vmem:[%s3245_s1] sm:$0xff] }
  0x9f   : > { %785 = vmatpush.msrb.mxu3 %v3439_v36  ;;  %812 = vmatpush.msra.mxu0 %v3440_v37  ;;  %v1599_v36 = vld [vmem:[%s3245_s1 + $0x1d8] sm:$0xff]  ;;  %v1615_v37 = vld [vmem:[%s3245_s1 + $0x250] sm:$0xff] }
  0xa0   : > { %849 = vmatpush.msra.mxu1 %v2517_v29  ;;  %909 = vmatpush.msra.mxu2 %v1567_v63  ;;  %v1565_v29 = vld [vmem:[%s3245_s1 + $0xd8] sm:$0xff] }
  0xa1   : > { %786 = vmatpush.msrb.mxu3 %v3441_v39  ;;  %749 = vmatmul.f32.vlgmr.msrb.gmra.mxu2 %v1483_v35  ;;  %v1637_v63 = vld [vmem:[%s3245_s1 + $0x2f8] sm:$0xff]  ;;  %v1581_v35 = vld [vmem:[%s3245_s1 + $0x150] sm:$0xff]  ;;  %v1580_v39 = vld [vmem:[%s3245_s1 + $0x148] sm:$0xff] }
  0xa2   : > { %813 = vmatpush.msra.mxu0 %v3442_v25  ;;  %850 = vmatpush.msra.mxu1 %v2531_v55  ;;  %v1564_v55 = vld [vmem:[%s3245_s1 + $0xd0] sm:$0xff]  ;;  %v1635_v25 = vld [vmem:[%s3245_s1 + $0x2e8] sm:$0xff] }
  0xa3   : > { %910 = vmatpush.msra.mxu2 %v1566_v38  ;;  %787 = vmatpush.msrb.mxu3 %v3443_v43  ;;  %v1636_v38 = vld [vmem:[%s3245_s1 + $0x2f0] sm:$0xff]  ;;  %v1579_v43 = vld [vmem:[%s3245_s1 + $0x140] sm:$0xff] }
  0xa4   : > { %673 = vmatmul.f32.vlgmr.msrb.gmra.mxu0 %v1449_v40  ;;  %788 = vmatmul.f32.vlgmr.msrb.gmra.mxu3 %v1500_v42  ;;  %v1598_v40 = vld [vmem:[%s3245_s1 + $0x1d0] sm:$0xff]  ;;  %v1614_v42 = vld [vmem:[%s3245_s1 + $0x248] sm:$0xff] }
  0xa5   : > { %814 = vmatpush.msra.mxu0 %v3444_v46  ;;  %851 = vmatpush.msra.mxu1 %v2547_v33  ;;  %v887_v33 = vld [vmem:[%s3245_s1 + $0x68] sm:$0xff]  ;;  %v1578_v46 = vld [vmem:[%s3245_s1 + $0x138] sm:$0xff] }
  0xa6   : > { %911 = vmatpush.msra.mxu2 %v1565_v29  ;;  %927 = vmatpush.msra.mxu3 %v889_v44  ;;  %v1597_v29 = vld [vmem:[%s3245_s1 + $0x1c8] sm:$0xff]  ;;  %v1613_v44 = vld [vmem:[%s3245_s1 + $0x240] sm:$0xff] }
  0xa7   : > { %711 = vmatmul.f32.vlgmr.msrb.gmra.mxu1 %v1466_v45  ;;  %815 = vmatpush.msra.mxu0 %v3445_v48  ;;  %v1634_v45 = vld [vmem:[%s3245_s1 + $0x2e0] sm:$0xff]  ;;  %v1633_v48 = vld [vmem:[%s3245_s1 + $0x2d8] sm:$0xff] }
  0xa8   : > { %852 = vmatpush.msra.mxu1 %v2564_v2  ;;  %912 = vmatpush.msra.mxu2 %v1564_v55  ;;  %v3447_v2 = vld [vmem:[#allocation51_spill] sm:$0xff]  ;;  %v1596_v55 = vld [vmem:[%s3245_s1 + $0x1c0] sm:$0xff] }
  0xa9   : > { %928 = vmatpush.msra.mxu3 %v888_v47  ;;  %816 = vmatpush.msra.mxu0 %v3446_v50  ;;  %v1612_v47 = vld [vmem:[%s3245_s1 + $0x238] sm:$0xff]  ;;  %v1611_v50 = vld [vmem:[%s3245_s1 + $0x230] sm:$0xff] }
  0xaa   : > { %853 = vmatpush.msra.mxu1 %v2572_v57  ;;  %913 = vmatpush.msra.mxu2 %v1563_v49  ;;  %v3448_v57 = vld [vmem:[#allocation55_spill] sm:$0xff]  ;;  %v1577_v49 = vld [vmem:[%s3245_s1 + $0x130] sm:$0xff] }
  0xab   : > { %929 = vmatpush.msra.mxu3 %v887_v33  ;;  %817 = vmatpush.msra.mxu0 %v3447_v2  ;;  %v1595_v33 = vld [vmem:[%s3245_s1 + $0x1b8] sm:$0xff]  ;;  %v1594_v2 = vld [vmem:[%s3245_s1 + $0x1b0] sm:$0xff] }
  0xac   : > { %854 = vmatpush.msra.mxu1 %v2581_v5  ;;  %914 = vmatpush.msra.mxu2 %v1562_v51  ;;  %v3449_v5 = vld [vmem:[#allocation59_spill] sm:$0xff]  ;;  %v1632_v51 = vld [vmem:[%s3245_s1 + $0x2d0] sm:$0xff] }
  0xad   : > { %930 = vmatpush.msra.mxu3 %v886_v52  ;;  %818 = vmatpush.msra.mxu0 %v3448_v57  ;;  %v1576_v52 = vld [vmem:[%s3245_s1 + $0x128] sm:$0xff]  ;;  %v1575_v57 = vld [vmem:[%s3245_s1 + $0x120] sm:$0xff] }
  0xae   : > { %855 = vmatpush.msra.mxu1 %v2589_v9  ;;  %915 = vmatpush.msra.mxu2 %v1561_v53  ;;  %v3450_v9 = vld [vmem:[#allocation63_spill] sm:$0xff] }
  0xaf   : > { %931 = vmatpush.msra.mxu3 %v885_v54  ;;  %819 = vmatpush.msra.mxu0 %v3449_v5  ;;  %v1610_v53 = vld [vmem:[%s3245_s1 + $0x228] sm:$0xff]  ;;  %v1630_v5 = vld [vmem:[%s3245_s1 + $0x2c0] sm:$0xff] }
  0xb0   : > { %856 = vmatpush.msra.mxu1 %v2598_v1  ;;  %916 = vmatpush.msra.mxu2 %v1560_v56  ;;  %v3451_v1 = vld [vmem:[#allocation66_spill] sm:$0xff]  ;;  %v1631_v54 = vld [vmem:[%s3245_s1 + $0x2c8] sm:$0xff] }
  0xb1   : > { %932 = vmatpush.msra.mxu3 %v884_v58  ;;  %820 = vmatpush.msra.mxu0 %v3450_v9  ;;  %v1593_v56 = vld [vmem:[%s3245_s1 + $0x1a8] sm:$0xff]  ;;  %v1609_v58 = vld [vmem:[%s3245_s1 + $0x220] sm:$0xff]  ;;  %v1608_v9 = vld [vmem:[%s3245_s1 + $0x218] sm:$0xff] }
  0xb2   : > { %857 = vmatpush.msra.mxu1 %v2607_v4  ;;  %917 = vmatpush.msra.mxu2 %v1559_v60  ;;  %v1556_v4 = vld [vmem:[%s3245_s1 + $0x90] sm:$0xff]  ;;  %v1574_v60 = vld [vmem:[%s3245_s1 + $0x118] sm:$0xff] }
  0xb3   : > { %933 = vmatpush.msra.mxu3 %v883_v61  ;;  %821 = vmatpush.msra.mxu0 %v3451_v1  ;;  %v1592_v61 = vld [vmem:[%s3245_s1 + $0x1a0] sm:$0xff]  ;;  %v1591_v1 = vld [vmem:[%s3245_s1 + $0x198] sm:$0xff] }
  0xb4   : > { %858 = vmatpush.msra.mxu1 %v2616_v7  ;;  %918 = vmatpush.msra.mxu2 %v1558_v62  ;;  %v880_v7 = vld [vmem:[%s3245_s1 + $0x30] sm:$0xff]  ;;  %v1629_v62 = vld [vmem:[%s3245_s1 + $0x2b8] sm:$0xff] }
  0xb5   : > { %934 = vmatpush.msra.mxu3 %v882_v6  ;;  %822 = vmatpush.msra.mxu0 %v2511_v21  ;;  %v879_v21 = vld [vmem:[%s3245_s1 + $0x28] sm:$0xff]  ;;  %v1573_v6 = vld [vmem:[%s3245_s1 + $0x110] sm:$0xff] }
  0xb6   : > { %859 = vmatpush.msra.mxu1 %v2625_v10  ;;  %919 = vmatpush.msra.mxu2 %v1557_v8  ;;  %v1554_v10 = vld [vmem:[%s3245_s1 + $0x80] sm:$0xff]  ;;  %v1607_v8 = vld [vmem:[%s3245_s1 + $0x210] sm:$0xff] }
  0xb7   : > { %935 = vmatpush.msra.mxu3 %v881_v18  ;;  %823 = vmatpush.msra.mxu0 %v3452_v11  ;;  %v1628_v18 = vld [vmem:[%s3245_s1 + $0x2b0] sm:$0xff]  ;;  %v1606_v11 = vld [vmem:[%s3245_s1 + $0x208] sm:$0xff] }
  0xb8   : > { %860 = vmatpush.msra.mxu1 %v2634_v12  ;;  %920 = vmatpush.msra.mxu2 %v1556_v4  ;;  %v878_v12 = vld [vmem:[%s3245_s1 + $0x20] sm:$0xff]  ;;  %v1572_v4 = vld [vmem:[%s3245_s1 + $0x108] sm:$0xff] }
  0xb9   : > { %936 = vmatpush.msra.mxu3 %v880_v7  ;;  %824 = vmatpush.msra.mxu0 %v2539_v3  ;;  %v1620_v3 = vld [vmem:[%s3245_s1 + $0x278] sm:$0xff]  ;;  %v1590_v7 = vld [vmem:[%s3245_s1 + $0x190] sm:$0xff] }
  0xba   : > { %861 = vmatpush.msra.mxu1 %v2643_v13  ;;  %921 = vmatpush.msra.mxu2 %v1555_v19  ;;  %v877_v13 = vld [vmem:[%s3245_s1 + $0x18] sm:$0xff]  ;;  %v1627_v19 = vld [vmem:[%s3245_s1 + $0x2a8] sm:$0xff] }
  0xbb   : > { %937 = vmatpush.msra.mxu3 %v879_v21  ;;  %825 = vmatpush.msra.mxu0 %v2554_v0  ;;  %v1585_v0 = vld [vmem:[%s3245_s1 + $0x170] sm:$0xff] }
  0xbc   : > { %862 = vmatpush.msra.mxu1 %v2652_v14  ;;  %922 = vmatpush.msra.mxu2 %v1554_v10  ;;  %v1619_v14 = vld [vmem:[%s3245_s1 + $0x270] sm:$0xff]  ;;  %v1571_v10 = vld [vmem:[%s3245_s1 + $0x100] sm:$0xff] }
  0xbd   : > { %938 = vmatpush.msra.mxu3 %v878_v12  ;;  %826 = vmatmul.f32.vlgmr.msra.gmra.mxu0 %v1517_v20  ;;  %v1553_v21 = vld [vmem:[%s2445_s25 + $0x11] sm:$0x7]  ;;  %v1589_v12 = vld [vmem:[%s3245_s1 + $0x188] sm:$0xff] }
  0xbe   : > { %964 = vmatpush.msrb.mxu0 %v1586_v22  ;;  %1040 = vmatpush.msrb.mxu2 %v1620_v3  ;;  %v1605_v22 = vld [vmem:[%s3245_s1 + $0x200] sm:$0xff] }
  0xbf   : > { %863 = vmatpush.msra.mxu1 %v2661_v16  ;;  %939 = vmatpush.msra.mxu3 %v877_v13  ;;  %v875_v16 = vld [vmem:[%s3245_s1 + $0x8] sm:$0xff]  ;;  %v1626_v3 = vld [vmem:[%s3245_s1 + $0x2a0] sm:$0xff]  ;;  %v1552_v13 = vld [vmem:[%s2445_s25 + $0x10] sm:$0x7] }
  0xc0   : > { %864 = vmatmul.f32.vlgmr.msra.gmra.mxu1 %v1534_v15  ;;  %965 = vmatpush.msrb.mxu0 %v1585_v0  ;;  %v1654_v15 = vld [vmem:[%s3245_s1 + $0x378] sm:$0xff] }
  0xc1   : > { %1002 = vmatpush.msrb.mxu1 %v1603_v23  ;;  %1041 = vmatpush.msrb.mxu2 %v1619_v14  ;;  %v1688_v23 = vld [vmem:[%s3245_s1 + $0x478] sm:$0xff]  ;;  %v1588_v14 = vld [vmem:[%s3245_s1 + $0x180] sm:$0xff] }
  0xc2   : > { %940 = vmatpush.msra.mxu3 %v876_v24  ;;  %966 = vmatpush.msrb.mxu0 %v1584_v26  ;;  %v1625_v26 = vld [vmem:[%s3245_s1 + $0x298] sm:$0xff] }
  0xc3   : > { %1003 = vmatpush.msrb.mxu1 %v1602_v17  ;;  %1042 = vmatpush.msrb.mxu2 %v1618_v59  ;;  %v1653_v17 = vld [vmem:[%s3245_s1 + $0x370] sm:$0xff] }
  0xc4   : > { %941 = vmatpush.msra.mxu3 %v875_v16  ;;  %967 = vmatpush.msrb.mxu0 %v1583_v27  ;;  %v1671_v16 = vld [vmem:[%s3245_s1 + $0x3f8] sm:$0xff]  ;;  %v1687_v27 = vld [vmem:[%s3245_s1 + $0x470] sm:$0xff] }
  0xc5   : > { %1004 = vmatpush.msrb.mxu1 %v1601_v28  ;;  %1043 = vmatpush.msrb.mxu2 %v1617_v41  ;;  %v282_v59 = vpop.f32.mrf.mxu2  ;;  %v1624_v28 = vld [vmem:[%s3245_s1 + $0x290] sm:$0xff]  ;;  %v1652_v41 = vld [vmem:[%s3245_s1 + $0x368] sm:$0xff] }
  0xc6   : > { %942 = vmatpush.msra.mxu3 %v874_v30  ;;  %968 = vmatpush.msrb.mxu0 %v1582_v31  ;;  %v1670_v30 = vld [vmem:[%s3245_s1 + $0x3f0] sm:$0xff]  ;;  %v1686_v31 = vld [vmem:[%s3245_s1 + $0x468] sm:$0xff] }
  0xc7   : > { %1005 = vmatpush.msrb.mxu1 %v1600_v32  ;;  %1044 = vmatpush.msrb.mxu2 %v1616_v34  ;;  %v1623_v34 = vld [vmem:[%s3245_s1 + $0x288] sm:$0xff] }
  0xc8   : > { %1078 = vmatpush.msrb.mxu3 %v1637_v63  ;;  %969 = vmatpush.msrb.mxu0 %v1581_v35  ;;  %v1604_v63 = vld [vmem:[%s2445_s25 + $0x19] sm:$0x7]  ;;  %v322_v35 = vpop.f32.mrf.mxu3 }
  0xc9   : > { %1006 = vmatpush.msrb.mxu1 %v1599_v36  ;;  %1045 = vmatpush.msrb.mxu2 %v1615_v37  ;;  %v1651_v36 = vld [vmem:[%s3245_s1 + $0x360] sm:$0xff]  ;;  %v1669_v37 = vld [vmem:[%s3245_s1 + $0x3e8] sm:$0xff] }
  0xca   : > { %1079 = vmatpush.msrb.mxu3 %v1636_v38  ;;  %970 = vmatpush.msrb.mxu0 %v1580_v39  ;;  %v1685_v38 = vld [vmem:[%s3245_s1 + $0x460] sm:$0xff] }
  0xcb   : > { %1007 = vmatpush.msrb.mxu1 %v1598_v40  ;;  %1046 = vmatpush.msrb.mxu2 %v1614_v42  ;;  %v1622_v39 = vld [vmem:[%s3245_s1 + $0x280] sm:$0xff]  ;;  %v1570_v42 = vld [vmem:[%s2445_s25 + $0x12] sm:$0x7] }
  0xcc   : > { %1080 = vmatpush.msrb.mxu3 %v1635_v25  ;;  %971 = vmatpush.msrb.mxu0 %v1579_v43  ;;  %v1621_v25 = vld [vmem:[%s2445_s25 + $0x1a] sm:$0x7] }
  0xcd   : > { %1008 = vmatpush.msrb.mxu1 %v1597_v29  ;;  %1047 = vmatpush.msrb.mxu2 %v1613_v44  ;;  %v1650_v43 = vld [vmem:[%s3245_s1 + $0x358] sm:$0xff]  ;;  %v1668_v29 = vld [vmem:[%s3245_s1 + $0x3e0] sm:$0xff] }
  0xce   : > { %1081 = vmatpush.msrb.mxu3 %v1634_v45  ;;  %972 = vmatpush.msrb.mxu0 %v1578_v46  ;;  %v1684_v45 = vld [vmem:[%s3245_s1 + $0x458] sm:$0xff] }
  0xcf   : > { %1009 = vmatpush.msrb.mxu1 %v1596_v55  ;;  %1048 = vmatpush.msrb.mxu2 %v1612_v47  ;;  %v1587_v46 = vld [vmem:[%s2445_s25 + $0x18] sm:$0x7]  ;;  %v1649_v55 = vld [vmem:[%s3245_s1 + $0x350] sm:$0xff] }
  0xd0   : > { %1082 = vmatpush.msrb.mxu3 %v1633_v48  ;;  %973 = vmatpush.msrb.mxu0 %v1577_v49  ;;  %v1667_v47 = vld [vmem:[%s3245_s1 + $0x3d8] sm:$0xff]  ;;  %v1683_v49 = vld [vmem:[%s3245_s1 + $0x450] sm:$0xff] }
  0xd1   : > { %1010 = vmatpush.msrb.mxu1 %v1595_v33  ;;  %1049 = vmatpush.msrb.mxu2 %v1611_v50  ;;  %v1648_v50 = vld [vmem:[%s3245_s1 + $0x348] sm:$0xff] }
  0xd2   : > { %1083 = vmatpush.msrb.mxu3 %v1632_v51  ;;  %974 = vmatpush.msrb.mxu0 %v1576_v52  ;;  %v224_v0 = vpop.f32.mrf.mxu0  ;;  %v1666_v51 = vld [vmem:[%s3245_s1 + $0x3d0] sm:$0xff]  ;;  %v1682_v52 = vld [vmem:[%s3245_s1 + $0x448] sm:$0xff] }
  0xd3   : > { %1011 = vmatpush.msrb.mxu1 %v1594_v2  ;;  %1050 = vmatpush.msrb.mxu2 %v1610_v53  ;;  %v1647_v2 = vld [vmem:[%s3245_s1 + $0x340] sm:$0xff]  ;;  %v1665_v53 = vld [vmem:[%s3245_s1 + $0x3c8] sm:$0xff] }
  0xd4   : > { %1084 = vmatpush.msrb.mxu3 %v1631_v54  ;;  %975 = vmatpush.msrb.mxu0 %v1575_v57  ;;  %v1681_v57 = vld [vmem:[%s3245_s1 + $0x440] sm:$0xff] }
  0xd5   : > { %1012 = vmatpush.msrb.mxu1 %v1593_v56  ;;  %1051 = vmatpush.msrb.mxu2 %v1609_v58  ;;  %v1646_v58 = vld [vmem:[%s3245_s1 + $0x338] sm:$0xff] }
  0xd6   : > { %1085 = vmatpush.msrb.mxu3 %v1630_v5  ;;  %976 = vmatpush.msrb.mxu0 %v1574_v60  ;;  %v244_v20 = vpop.f32.mrf.mxu1  ;;  %v1664_v5 = vld [vmem:[%s3245_s1 + $0x3c0] sm:$0xff]  ;;  %v1680_v60 = vld [vmem:[%s3245_s1 + $0x438] sm:$0xff] }
  0xd7   : > { %1013 = vmatpush.msrb.mxu1 %v1592_v61  ;;  %1052 = vmatpush.msrb.mxu2 %v1608_v9  ;;  %v245_v24 = vadd.f32 %v244_v20, %v224_v0  ;;  %v1645_v61 = vld [vmem:[%s3245_s1 + $0x330] sm:$0xff]  ;;  %v1663_v9 = vld [vmem:[%s3245_s1 + $0x3b8] sm:$0xff]  ;;  %v1660_v20 = vld [vmem:[%s3245_s1 + $0x3a0] sm:$0xff] }
  0xd8   : > { %1086 = vmatpush.msrb.mxu3 %v1629_v62  ;;  %977 = vmatpush.msrb.mxu0 %v1573_v6  ;;  %v1679_v6 = vld [vmem:[%s3245_s1 + $0x430] sm:$0xff]  ;;  %v1659_v0 = vld [vmem:[%s3245_s1 + $0x398] sm:$0xff] }
  0xd9   : > { %1014 = vmatpush.msrb.mxu1 %v1591_v1  ;;  %1053 = vmatpush.msrb.mxu2 %v1607_v8  ;;  %v285_v32 = vadd.f32 %v282_v59, %v245_v24  ;;  %v1644_v8 = vld [vmem:[%s3245_s1 + $0x328] sm:$0xff] }
  0xda   : > { %1087 = vmatpush.msrb.mxu3 %v1628_v18  ;;  %978 = vmatpush.msrb.mxu0 %v1572_v4  ;;  %v440_v56 = vpop.f32.mrf.mxu2  ;;  %v1662_v18 = vld [vmem:[%s3245_s1 + $0x3b0] sm:$0xff]  ;;  %v1678_v4 = vld [vmem:[%s3245_s1 + $0x428] sm:$0xff] }
  0xdb   : > { %1015 = vmatpush.msrb.mxu1 %v1590_v7  ;;  %1054 = vmatpush.msrb.mxu2 %v1606_v11  ;;  %v325_v40 = vadd.f32 %v322_v35, %v285_v32  ;;  %v1643_v7 = vld [vmem:[%s3245_s1 + $0x320] sm:$0xff]  ;;  %v1661_v11 = vld [vmem:[%s3245_s1 + $0x3a8] sm:$0xff] }
  0xdc   : > { %1088 = vmatpush.msrb.mxu3 %v1627_v19  ;;  %923 = vmatmul.f32.vlgmr.msra.gmra.mxu2 %v1553_v21  ;;  %v1677_v21 = vld [vmem:[%s3245_s1 + $0x420] sm:$0xff]  ;;  %v1640_v24 = vld [vmem:[%s3245_s1 + $0x308] sm:$0xff] }
  0xdd   : > { %979 = vmatpush.msrb.mxu0 %v1571_v10  ;;  %1016 = vmatpush.msrb.mxu1 %v1589_v12  ;;  %v361_v44 = vpop.f32.mrf.mxu0  ;;  %v3185_v10 = vld [vmem:[%s3246_s2] ss:$0 sm:$0xff]  ;;  %v1642_v12 = vld [vmem:[%s3245_s1 + $0x318] sm:$0xff]  ;;  %v1655_v32 = vld [vmem:[%s2445_s25 + $0x21] sm:$0x7] }
  0xde   : > { %1055 = vmatpush.msrb.mxu2 %v1605_v22  ;;  %1089 = vmatpush.msrb.mxu3 %v1626_v3  ;;  %v364_v48 = vadd.f32 %v361_v44, %v325_v40  ;;  %v1676_v3 = vld [vmem:[%s3245_s1 + $0x418] sm:$0xff] }
  0xdf   : > { %943 = vmatmul.f32.vlgmr.msra.gmra.mxu3 %v1552_v13  ;;  %1117 = vmatpush.msra.mxu0 %v1654_v15  ;;  %v1641_v15 = vld [vmem:[%s3245_s1 + $0x310] sm:$0xff] }
  0xe0   : > { %1193 = vmatpush.msra.mxu2 %v1688_v23  ;;  %1017 = vmatpush.msrb.mxu1 %v1588_v14  ;;  %v400_v33 = vpop.f32.mrf.mxu1  ;;  %v1675_v23 = vld [vmem:[%s3245_s1 + $0x410] sm:$0xff] }
  0xe1   : > { %1090 = vmatpush.msrb.mxu3 %v1625_v26  ;;  %1118 = vmatpush.msra.mxu0 %v1653_v17  ;;  %v403_v54 = vadd.f32 %v400_v33, %v364_v48  ;;  %v1658_v26 = vld [vmem:[%s3245_s1 + $0x390] sm:$0xff]  ;;  %v1674_v17 = vld [vmem:[%s3245_s1 + $0x408] sm:$0xff] }
  0xe2   : > { %1155 = vmatpush.msra.mxu1 %v1671_v16  ;;  %1194 = vmatpush.msra.mxu2 %v1687_v27  ;;  %v1639_v16 = vld [vmem:[%s3245_s1 + $0x300] sm:$0xff]  ;;  %v1657_v27 = vld [vmem:[%s3245_s1 + $0x388] sm:$0xff] }
  0xe3   : > { %1091 = vmatpush.msrb.mxu3 %v1624_v28  ;;  %1119 = vmatpush.msra.mxu0 %v1652_v41  ;;  %v443_v62 = vadd.f32 %v440_v56, %v403_v54  ;;  %v479_v1 = vpop.f32.mrf.mxu3  ;;  %v1673_v28 = vld [vmem:[%s3245_s1 + $0x400] sm:$0xff] }
  0xe4   : > { %1156 = vmatpush.msra.mxu1 %v1670_v30  ;;  %1195 = vmatpush.msra.mxu2 %v1686_v31  ;;  %v1638_v41 = vld [vmem:[%s2445_s25 + $0x20] sm:$0x7] }
  0xe5   : > { %1092 = vmatpush.msrb.mxu3 %v1623_v34  ;;  %1056 = vmatmul.f32.vlgmr.msrb.gmra.mxu2 %v1604_v63  ;;  %v482_v19 = vadd.f32 %v479_v1, %v443_v62  ;;  %v1672_v30 = vld [vmem:[%s2445_s25 + $0x22] sm:$0x7] }
  0xe6   : > { %1120 = vmatpush.msra.mxu0 %v1651_v36  ;;  %1157 = vmatpush.msra.mxu1 %v1669_v37  ;;  %v1656_v31 = vld [vmem:[%s3245_s1 + $0x380] sm:$0xff] }
  0xe7   : > { %1196 = vmatpush.msra.mxu2 %v1685_v38  ;;  %1093 = vmatpush.msrb.mxu3 %v1622_v39 }
  0xe8   : > { %980 = vmatmul.f32.vlgmr.msrb.gmra.mxu0 %v1570_v42  ;;  %1094 = vmatmul.f32.vlgmr.msrb.gmra.mxu3 %v1621_v25 }
  0xe9   : > { %1121 = vmatpush.msra.mxu0 %v1650_v43  ;;  %1158 = vmatpush.msra.mxu1 %v1668_v29 }
  0xea   : > { %1197 = vmatpush.msra.mxu2 %v1684_v45  ;;  %1018 = vmatmul.f32.vlgmr.msrb.gmra.mxu1 %v1587_v46 }
  0xeb   : > { %1122 = vmatpush.msra.mxu0 %v1649_v55  ;;  %1159 = vmatpush.msra.mxu1 %v1667_v47 }
  0xec   : > { %1198 = vmatpush.msra.mxu2 %v1683_v49 }
  0xed   : > { %1123 = vmatpush.msra.mxu0 %v1648_v50  ;;  %1160 = vmatpush.msra.mxu1 %v1666_v51 }
  0xee   : > { %1199 = vmatpush.msra.mxu2 %v1682_v52 }
  0xef   : > { %1124 = vmatpush.msra.mxu0 %v1647_v2  ;;  %1161 = vmatpush.msra.mxu1 %v1665_v53 }
  0xf0   : > { %1200 = vmatpush.msra.mxu2 %v1681_v57 }
  0xf1   : > { %1125 = vmatpush.msra.mxu0 %v1646_v58  ;;  %1162 = vmatpush.msra.mxu1 %v1664_v5 }
  0xf2   : > { %1201 = vmatpush.msra.mxu2 %v1680_v60 }
  0xf3   : > { %1126 = vmatpush.msra.mxu0 %v1645_v61  ;;  %1163 = vmatpush.msra.mxu1 %v1663_v9 }
  0xf4   : > { %1202 = vmatpush.msra.mxu2 %v1679_v6 }
  0xf5   : > { %1127 = vmatpush.msra.mxu0 %v1644_v8  ;;  %1164 = vmatpush.msra.mxu1 %v1662_v18 }
  0xf6   : > { %1203 = vmatpush.msra.mxu2 %v1678_v4  ;;  %v518_v22 = vpop.f32.mrf.mxu0 }
  0xf7   : > { %1128 = vmatpush.msra.mxu0 %v1643_v7  ;;  %1165 = vmatpush.msra.mxu1 %v1661_v11  ;;  %v521_v13 = vadd.f32 %v518_v22, %v482_v19 }
  0xf8   : > { %1204 = vmatpush.msra.mxu2 %v1677_v21 }
  0xf9   : > { %1129 = vmatpush.msra.mxu0 %v1642_v12  ;;  %1166 = vmatpush.msra.mxu1 %v1660_v20  ;;  %v525_v14 = vadd.f32 %v3185_v10, %v521_v13 }
  0xfa   : > { %1205 = vmatpush.msra.mxu2 %v1676_v3 }
  0xfb   : > { %1130 = vmatpush.msra.mxu0 %v1641_v15  ;;  %1167 = vmatpush.msra.mxu1 %v1659_v0  ;;  %v526_v59 = vmax.f32 %v525_v14, 0.0 }
  0xfc   : > { %1206 = vmatpush.msra.mxu2 %v1675_v23 }
  0xfd   : > { %1131 = vmatpush.msra.mxu0 %v1640_v24  ;;  %1168 = vmatpush.msra.mxu1 %v1658_v26  ;;  %527 = vst [vmem:[%s3216_s28] sm:$0x7] %v526_v59 }
  0xfe   : > { %1207 = vmatpush.msra.mxu2 %v1674_v17 }
  0xff   : > { %1132 = vmatpush.msra.mxu0 %v1639_v16  ;;  %1169 = vmatpush.msra.mxu1 %v1657_v27 }
 0x100   : > { %1208 = vmatpush.msra.mxu2 %v1673_v28  ;;  %1133 = vmatmul.f32.vlgmr.msra.gmra.mxu0 %v1638_v41 }
 0x101   : > { %1209 = vmatmul.f32.vlgmr.msra.gmra.mxu2 %v1672_v30  ;;  %1170 = vmatpush.msra.mxu1 %v1656_v31 }
 0x102   : > { %1171 = vmatmul.f32.vlgmr.msra.gmra.mxu1 %v1655_v32 }
 0x11a   : > { %v579_v63 = vpop.f32.mrf.mxu1 }
 0x11b   : > { %v599_v34 = vpop.f32.mrf.mxu2 }
 0x11c   : > { %v600_v35 = vadd.f32 %v599_v34, %v579_v63 }
 0x11e   : > { %v636_v36 = vpop.f32.mrf.mxu3 }
 0x11f   : > { %v639_v37 = vadd.f32 %v636_v36, %v600_v35 }
 0x121   : > { %v674_v38 = vpop.f32.mrf.mxu0 }
 0x122   : > { %v677_v39 = vadd.f32 %v674_v38, %v639_v37 }
 0x124   : > { %v712_v40 = vpop.f32.mrf.mxu1  ;;  %v750_v25 = vpop.f32.mrf.mxu2 }
 0x125   : > { %v715_v42 = vadd.f32 %v712_v40, %v677_v39 }
 0x127   : > { %v753_v43 = vadd.f32 %v750_v25, %v715_v42  ;;  %v789_v29 = vpop.f32.mrf.mxu3 }
 0x129   : > { %v792_v44 = vadd.f32 %v789_v29, %v753_v43 }
 0x13a   : > { %v827_v45 = vpop.f32.mrf.mxu0 }
 0x13b   : > { %v830_v46 = vadd.f32 %v827_v45, %v792_v44 }
 0x13d   : > { %v865_v55 = vpop.f32.mrf.mxu1 }
 0x13e   : > { %v868_v47 = vadd.f32 %v865_v55, %v830_v46 }
 0x140   : > { %v869_v48 = vadd.f32 %v3185_v10, %v868_v47 }
 0x142   : > { %v870_v49 = vmax.f32 %v869_v48, 0.0 }
 0x144   : > { %1551 = vst [vmem:[%s3216_s28 + $0x4] sm:$0x7] %v870_v49 }
 0x15f   : > { %v924_v50 = vpop.f32.mrf.mxu2 }
 0x162   : > { %v944_v33 = vpop.f32.mrf.mxu3 }
 0x163   : > { %v945_v51 = vadd.f32 %v944_v33, %v924_v50 }
 0x165   : > { %v981_v52 = vpop.f32.mrf.mxu0 }
 0x166   : > { %v984_v2 = vadd.f32 %v981_v52, %v945_v51 }
 0x167   : > { %v1019_v53 = vpop.f32.mrf.mxu1 }
 0x168   : > { %v1022_v54 = vadd.f32 %v1019_v53, %v984_v2  ;;  %v1057_v57 = vpop.f32.mrf.mxu2 }
 0x16a   : > { %v1060_v56 = vadd.f32 %v1057_v57, %v1022_v54 }
 0x16b   : > { %v1095_v58 = vpop.f32.mrf.mxu3 }
 0x16c   : > { %v1098_v5 = vadd.f32 %v1095_v58, %v1060_v56 }
 0x17d   : > { %v1134_v60 = vpop.f32.mrf.mxu0 }
 0x17e   : > { %v1137_v61 = vadd.f32 %v1134_v60, %v1098_v5 }
 0x17f   : > { %v1172_v9 = vpop.f32.mrf.mxu1 }
 0x180   : > { %v1175_v62 = vadd.f32 %v1172_v9, %v1137_v61 }
 0x184   : > { %v1210_v6 = vpop.f32.mrf.mxu2 }
 0x185   : > { %v1213_v1 = vadd.f32 %v1210_v6, %v1175_v62 }
 0x187   : > { %v1214_v8 = vadd.f32 %v3185_v10, %v1213_v1 }
 0x189   : > { %v1215_v18 = vmax.f32 %v1214_v8, 0.0 }
 0x18b   : > { %1689 = vst [vmem:[%s3216_s28 + $0x8] sm:$0x7] %v1215_v18 }
 0x18c PF: > { %s13_s12 = sadd.s32 1, %s1709_s12  }
 0x18d   : > { %p10_p4 = scmp.ge.s32.totalorder %s13_s12, 4  }
 0x18f   :  { %12 = sbr.rel (!%p10_p4) target bundleno = 1 (0x1), region = 76 }

</bundles_post_ra>
